<compile_context>
chip_gen: v7x
topology: tpu7x:2x2x1
jax: 0.10.0
libtpu: 0.0.40
codegen_flags: <defaults>
</compile_context>

<pallas_src>
import jax
import jax.numpy as jnp
from jax.experimental import pallas as pl
from jax.experimental.pallas import tpu as pltpu

INPUT_DIM = 3
LATENT_DIM = 8
PAD = 128                      # lane width: params / hidden activations use 128 lanes
BN_EPS = 1e-5
LRELU_SLOPE = 0.2

ENC_DIMS = [INPUT_DIM, 128, 64, 32, 16, LATENT_DIM]
DEC_DIMS = [LATENT_DIM, 16, 32, 64, 128, INPUT_DIM]

# (fan_in, fan_out, has_bn) for every Linear, encoder layers then decoder layers.
LAYER_SPECS = []
for _dims in (ENC_DIMS, DEC_DIMS):
    _n = len(_dims) - 1
    for _i in range(_n):
        LAYER_SPECS.append((_dims[_i], _dims[_i + 1], _i < _n - 1))

N_LIN = len(LAYER_SPECS)                                  # 10 linear layers
N_VEC = sum(3 if bn else 1 for _, _, bn in LAYER_SPECS)   # 26 bias/gamma/beta rows
N_ENC_LIN = len(ENC_DIMS) - 1
N_DEC_LIN = len(DEC_DIMS) - 1

PARAM_BYTES = (N_LIN * PAD * PAD + N_VEC * PAD) * 4       # ~0.66 MiB
_FLOPS_PER_ROW = 2 * sum(fi * fo for fi, fo, _ in LAYER_SPECS)
_N_BN = sum(1 for _, _, bn in LAYER_SPECS if bn)          # 8 BatchNorm layers


# ---------------- generation-aware VMEM budget --------------------------------
def _vmem_capacity_bytes():
    try:
        info = pltpu.get_tpu_info()
        cap = getattr(info, "vmem_capacity_bytes", None)
        if cap:
            return int(cap)
    except Exception:
        pass
    return 64 * 1024 * 1024        # conservative default = v7x per-core VMEM


_VMEM_CAP = _vmem_capacity_bytes()
# Peak live bytes per batch row: x (12 B) + a handful of live 128-lane f32
# activations (h, BN temp, z held across the decoder) + the narrow outputs.
# ~5 * 512 B raw; budgeted with 2x headroom.
_ROW_BYTES = 5 * PAD * 4
_VMEM_CEILING = int(_VMEM_CAP * 0.70)      # ~45 MiB on v7x, ~90 MiB on v5e/v6e
MAX_BATCH = max((_VMEM_CEILING - PARAM_BYTES) // (2 * _ROW_BYTES), 256)


def _vmem_limit_bytes(n):
    needed = PARAM_BYTES + n * 2 * _ROW_BYTES
    return int(min(max(needed, 16 * 1024 * 1024), _VMEM_CEILING))


# ---------------- kernel -------------------------------------------------------
def autoencoder_kernel(x_ref, w_ref, vec_ref, xr_ref, z_ref):
    """x_ref: (N,3) input; w_ref: (10,128,128) weights stored (in,out),
    zero-padded; vec_ref: (26,128) bias/gamma/beta rows in consumption order;
    xr_ref: (N,3); z_ref: (N,8).  Everything lives in VMEM; the whole batch is
    processed in one invocation so BatchNorm sees true batch statistics."""
    vecs = vec_ref[...]          # (N_VEC, 128), ~13 KB, loaded once
    w_idx = 0
    v_idx = 0

    def next_vec():
        nonlocal v_idx
        v = vecs[v_idx:v_idx + 1, :]          # (1, 128), static slice
        v_idx += 1
        return v

    def linear(h):
        nonlocal w_idx
        w = w_ref[w_idx]                      # (128, 128), static block index
        w_idx += 1
        return jnp.dot(h, w, preferred_element_type=jnp.float32) + next_vec()

    def leaky_relu(h):
        # max(h, a*h) == LeakyReLU for slope in [0, 1]; 2 VPU ops per element.
        return jnp.maximum(h, LRELU_SLOPE * h)

    def batchnorm(h):
        # Training-mode BN (biased batch variance), folded to one scale/shift.
        gamma = next_vec()
        beta = next_vec()
        mean = jnp.mean(h, axis=0, keepdims=True)
        var = jnp.mean(h * h, axis=0, keepdims=True) - mean * mean
        var = jnp.maximum(var, 0.0)           # guard single-pass cancellation
        scale = gamma * jax.lax.rsqrt(var + BN_EPS)
        shift = beta - mean * scale
        return h * scale + shift              # padded lanes: 0*0+0 = 0

    # ---- encoder ------------------------------------------------------------
    # First Linear (3 -> 128) on the VPU: three broadcast FMAs against rows
    # 0..2 of W0.  Avoids padding x to 128 lanes and a mostly-zero MXU matmul.
    x = x_ref[...]                            # (N, 3)
    b0 = next_vec()
    w0 = w_ref[0]                             # (128, 128); only rows 0..2 nonzero
    w_idx = 1
    h = x[:, 0:1] * w0[0:1, :] + b0
    for k in range(1, INPUT_DIM):
        h = h + x[:, k:k + 1] * w0[k:k + 1, :]
    h = batchnorm(leaky_relu(h))
    for _ in range(N_ENC_LIN - 2):
        h = batchnorm(leaky_relu(linear(h)))
    z = linear(h)                             # (N, 128); lanes >= 8 are exactly 0
    z_ref[...] = z[:, :LATENT_DIM]

    # ---- decoder ------------------------------------------------------------
    h = z
    for _ in range(N_DEC_LIN - 1):
        h = batchnorm(leaky_relu(linear(h)))
    xr = linear(h)                            # (N, 128); lanes >= 3 are exactly 0
    xr_ref[...] = xr[:, :INPUT_DIM]


# ---------------- params -------------------------------------------------------
def make_params(key):
    """Per-layer params mimicking PyTorch defaults:
    Linear W, b ~ U(-1/sqrt(fan_in), 1/sqrt(fan_in)); BatchNorm gamma=1, beta=0."""
    layers = []
    for fan_in, fan_out, has_bn in LAYER_SPECS:
        key, kw, kb = jax.random.split(key, 3)
        bound = float(fan_in) ** -0.5
        w = jax.random.uniform(kw, (fan_in, fan_out), jnp.float32, -bound, bound)
        b = jax.random.uniform(kb, (fan_out,), jnp.float32, -bound, bound)
        if has_bn:
            layers.append((w, b,
                           jnp.ones((fan_out,), jnp.float32),
                           jnp.zeros((fan_out,), jnp.float32)))
        else:
            layers.append((w, b, None, None))
    return layers


def pack_params(layers):
    """Pack all params into two lane-dense, zero-padded VMEM slabs."""
    w_slab = jnp.zeros((N_LIN, PAD, PAD), jnp.float32)
    vec_slab = jnp.zeros((N_VEC, PAD), jnp.float32)
    v = 0
    for i, (w, b, gamma, beta) in enumerate(layers):
        fan_in, fan_out = w.shape
        w_slab = w_slab.at[i, :fan_in, :fan_out].set(w)
        vec_slab = vec_slab.at[v, :fan_out].set(b); v += 1
        if gamma is not None:
            vec_slab = vec_slab.at[v, :fan_out].set(gamma); v += 1
            vec_slab = vec_slab.at[v, :fan_out].set(beta); v += 1
    assert v == N_VEC
    return w_slab, vec_slab


# ---------------- wrapper ------------------------------------------------------
@jax.jit
def autoencoder_forward(x, w_slab, vec_slab):
    n = x.shape[0]
    if n > MAX_BATCH:
        # TODO(synk): for batches beyond the VMEM budget, grid the batch and use
        # a two-pass (sum / sum-of-squares) BatchNorm with persistent scratch so
        # statistics stay batch-wide; per-tile BN would change the semantics.
        raise ValueError(f"batch {n} exceeds single-invocation cap {MAX_BATCH}")

    vmem = pl.BlockSpec(memory_space=pltpu.MemorySpace.VMEM)
    cost = pl.CostEstimate(
        flops=n * _FLOPS_PER_ROW,
        transcendentals=_N_BN * PAD,                             # one rsqrt row per BN
        bytes_accessed=n * (2 * INPUT_DIM + LATENT_DIM) * 4 + PARAM_BYTES,
    )

    xr, z = pl.pallas_call(
        autoencoder_kernel,
        out_shape=(jax.ShapeDtypeStruct((n, INPUT_DIM), jnp.float32),    # xr
                   jax.ShapeDtypeStruct((n, LATENT_DIM), jnp.float32)),  # z
        in_specs=[vmem, vmem, vmem],
        out_specs=(vmem, vmem),
        compiler_params=pltpu.CompilerParams(
            vmem_limit_bytes=_vmem_limit_bytes(n)),
        cost_estimate=cost,
    )(x, w_slab, vec_slab)
    return xr, z


# ---------------- reference ----------------------------------------------------
def reference_forward(x, layers):
    """Pure-JAX correctness oracle (two-pass variance, unpadded params)."""
    def apply(h, layer_params):
        for w, b, gamma, beta in layer_params:
            h = h @ w + b
            if gamma is not None:
                h = jnp.where(h > 0, h, LRELU_SLOPE * h)
                mean = jnp.mean(h, axis=0, keepdims=True)
                var = jnp.mean((h - mean) ** 2, axis=0, keepdims=True)
                h = gamma * (h - mean) / jnp.sqrt(var + BN_EPS) + beta
        return h

    z = apply(x, layers[:N_ENC_LIN])
    xr = apply(z, layers[N_ENC_LIN:])
    return xr, z


if __name__ == "__main__":
    key = jax.random.PRNGKey(0)
    key, kx, kp = jax.random.split(key, 3)

    # 256 rows fills the MXU M dimension while remaining a small problem (256x3).
    batch = 256
    x = jax.random.normal(kx, (batch, INPUT_DIM), dtype=jnp.float32)

    layers = make_params(kp)
    w_slab, vec_slab = pack_params(layers)

    xr, z = autoencoder_forward(x, w_slab, vec_slab)
    jax.block_until_ready((xr, z))

    xr_ref, z_ref = reference_forward(x, layers)
    assert xr.shape == (batch, INPUT_DIM) and z.shape == (batch, LATENT_DIM)
    assert jnp.allclose(z, z_ref, atol=5e-4, rtol=5e-4), float(jnp.max(jnp.abs(z - z_ref)))
    assert jnp.allclose(xr, xr_ref, atol=5e-4, rtol=5e-4), float(jnp.max(jnp.abs(xr - xr_ref)))

    print("KERNEL_OK")
</pallas_src>

<mosaic_0001>
module attributes {stable_mosaic.version = 11 : i64} {
  func.func @autoencoder_kernel(%arg0: memref<256x3xf32, #tpu.memory_space<vmem>>, %arg1: memref<10x128x128xf32, #tpu.memory_space<vmem>>, %arg2: memref<26x128xf32, #tpu.memory_space<vmem>>, %arg3: memref<256x3xf32, #tpu.memory_space<vmem>>, %arg4: memref<256x8xf32, #tpu.memory_space<vmem>>) attributes {dimension_semantics = [], scalar_prefetch = 0 : i64, scratch_operands = 0 : i64, tpu.core_type = #tpu.core_type<tc>} {
    %c0 = arith.constant 0 : index
    %c0_0 = arith.constant 0 : index
    %0 = vector.load %arg2[%c0, %c0_0] : memref<26x128xf32, #tpu.memory_space<vmem>>, vector<26x128xf32>
    %c0_1 = arith.constant 0 : index
    %c0_2 = arith.constant 0 : index
    %1 = vector.load %arg0[%c0_1, %c0_2] : memref<256x3xf32, #tpu.memory_space<vmem>>, vector<256x3xf32>
    %2 = vector.extract_strided_slice %0 {offsets = [0, 0], sizes = [1, 128], strides = [1, 1]} : vector<26x128xf32> to vector<1x128xf32>
    %c0_3 = arith.constant 0 : index
    %c0_4 = arith.constant 0 : index
    %c0_5 = arith.constant 0 : index
    %3 = vector.load %arg1[%c0_3, %c0_4, %c0_5] : memref<10x128x128xf32, #tpu.memory_space<vmem>>, vector<1x128x128xf32>
    %4 = vector.shape_cast %3 : vector<1x128x128xf32> to vector<128x128xf32>
    %5 = vector.extract_strided_slice %1 {offsets = [0, 0], sizes = [256, 1], strides = [1, 1]} : vector<256x3xf32> to vector<256x1xf32>
    %6 = vector.extract_strided_slice %4 {offsets = [0, 0], sizes = [1, 128], strides = [1, 1]} : vector<128x128xf32> to vector<1x128xf32>
    %7 = vector.broadcast %5 : vector<256x1xf32> to vector<256x128xf32>
    %8 = vector.broadcast %6 : vector<1x128xf32> to vector<256x128xf32>
    %9 = arith.mulf %7, %8 : vector<256x128xf32>
    %10 = vector.broadcast %2 : vector<1x128xf32> to vector<256x128xf32>
    %11 = arith.addf %9, %10 : vector<256x128xf32>
    %12 = vector.extract_strided_slice %1 {offsets = [0, 1], sizes = [256, 1], strides = [1, 1]} : vector<256x3xf32> to vector<256x1xf32>
    %13 = vector.extract_strided_slice %4 {offsets = [1, 0], sizes = [1, 128], strides = [1, 1]} : vector<128x128xf32> to vector<1x128xf32>
    %14 = vector.broadcast %12 : vector<256x1xf32> to vector<256x128xf32>
    %15 = vector.broadcast %13 : vector<1x128xf32> to vector<256x128xf32>
    %16 = arith.mulf %14, %15 : vector<256x128xf32>
    %17 = arith.addf %11, %16 : vector<256x128xf32>
    %18 = vector.extract_strided_slice %1 {offsets = [0, 2], sizes = [256, 1], strides = [1, 1]} : vector<256x3xf32> to vector<256x1xf32>
    %19 = vector.extract_strided_slice %4 {offsets = [2, 0], sizes = [1, 128], strides = [1, 1]} : vector<128x128xf32> to vector<1x128xf32>
    %20 = vector.broadcast %18 : vector<256x1xf32> to vector<256x128xf32>
    %21 = vector.broadcast %19 : vector<1x128xf32> to vector<256x128xf32>
    %22 = arith.mulf %20, %21 : vector<256x128xf32>
    %23 = arith.addf %17, %22 : vector<256x128xf32>
    %cst = arith.constant 2.000000e-01 : f32
    %24 = vector.broadcast %cst : f32 to vector<256x128xf32>
    %25 = arith.mulf %24, %23 : vector<256x128xf32>
    %26 = arith.maximumf %23, %25 : vector<256x128xf32>
    %27 = vector.extract_strided_slice %0 {offsets = [1, 0], sizes = [1, 128], strides = [1, 1]} : vector<26x128xf32> to vector<1x128xf32>
    %28 = vector.extract_strided_slice %0 {offsets = [2, 0], sizes = [1, 128], strides = [1, 1]} : vector<26x128xf32> to vector<1x128xf32>
    %cst_6 = arith.constant dense<0.000000e+00> : vector<128xf32>
    %29 = vector.multi_reduction <add>, %26, %cst_6 [0] : vector<256x128xf32> to vector<128xf32>
    %30 = vector.shape_cast %29 : vector<128xf32> to vector<1x128xf32>
    %cst_7 = arith.constant 2.560000e+02 : f32
    %31 = vector.broadcast %cst_7 : f32 to vector<1x128xf32>
    %32 = arith.divf %30, %31 : vector<1x128xf32>
    %33 = arith.mulf %26, %26 : vector<256x128xf32>
    %cst_8 = arith.constant dense<0.000000e+00> : vector<128xf32>
    %34 = vector.multi_reduction <add>, %33, %cst_8 [0] : vector<256x128xf32> to vector<128xf32>
    %35 = vector.shape_cast %34 : vector<128xf32> to vector<1x128xf32>
    %cst_9 = arith.constant 2.560000e+02 : f32
    %36 = vector.broadcast %cst_9 : f32 to vector<1x128xf32>
    %37 = arith.divf %35, %36 : vector<1x128xf32>
    %38 = arith.mulf %32, %32 : vector<1x128xf32>
    %39 = arith.subf %37, %38 : vector<1x128xf32>
    %cst_10 = arith.constant 0.000000e+00 : f32
    %40 = vector.broadcast %cst_10 : f32 to vector<1x128xf32>
    %41 = arith.maximumf %39, %40 : vector<1x128xf32>
    %cst_11 = arith.constant 9.99999974E-6 : f32
    %42 = vector.broadcast %cst_11 : f32 to vector<1x128xf32>
    %43 = arith.addf %41, %42 : vector<1x128xf32>
    %44 = math.rsqrt %43 : vector<1x128xf32>
    %45 = arith.mulf %27, %44 : vector<1x128xf32>
    %46 = arith.mulf %32, %45 : vector<1x128xf32>
    %47 = arith.subf %28, %46 : vector<1x128xf32>
    %48 = vector.broadcast %45 : vector<1x128xf32> to vector<256x128xf32>
    %49 = arith.mulf %26, %48 : vector<256x128xf32>
    %50 = vector.broadcast %47 : vector<1x128xf32> to vector<256x128xf32>
    %51 = arith.addf %49, %50 : vector<256x128xf32>
    %c1 = arith.constant 1 : index
    %c0_12 = arith.constant 0 : index
    %c0_13 = arith.constant 0 : index
    %52 = vector.load %arg1[%c1, %c0_12, %c0_13] : memref<10x128x128xf32, #tpu.memory_space<vmem>>, vector<1x128x128xf32>
    %53 = vector.shape_cast %52 : vector<1x128x128xf32> to vector<128x128xf32>
    %cst_14 = arith.constant dense<0.000000e+00> : vector<256x128xf32>
    %54 = tpu.matmul %51, %53, %cst_14 {dimension_numbers = #tpu.dot_dimension_numbers<[1], [0], [0], [1], [0, 0, 1, 1], [], []>} : vector<256x128xf32>, vector<128x128xf32>, vector<256x128xf32> -> vector<256x128xf32>
    %55 = vector.extract_strided_slice %0 {offsets = [3, 0], sizes = [1, 128], strides = [1, 1]} : vector<26x128xf32> to vector<1x128xf32>
    %56 = vector.broadcast %55 : vector<1x128xf32> to vector<256x128xf32>
    %57 = arith.addf %54, %56 : vector<256x128xf32>
    %cst_15 = arith.constant 2.000000e-01 : f32
    %58 = vector.broadcast %cst_15 : f32 to vector<256x128xf32>
    %59 = arith.mulf %58, %57 : vector<256x128xf32>
    %60 = arith.maximumf %57, %59 : vector<256x128xf32>
    %61 = vector.extract_strided_slice %0 {offsets = [4, 0], sizes = [1, 128], strides = [1, 1]} : vector<26x128xf32> to vector<1x128xf32>
    %62 = vector.extract_strided_slice %0 {offsets = [5, 0], sizes = [1, 128], strides = [1, 1]} : vector<26x128xf32> to vector<1x128xf32>
    %cst_16 = arith.constant dense<0.000000e+00> : vector<128xf32>
    %63 = vector.multi_reduction <add>, %60, %cst_16 [0] : vector<256x128xf32> to vector<128xf32>
    %64 = vector.shape_cast %63 : vector<128xf32> to vector<1x128xf32>
    %cst_17 = arith.constant 2.560000e+02 : f32
    %65 = vector.broadcast %cst_17 : f32 to vector<1x128xf32>
    %66 = arith.divf %64, %65 : vector<1x128xf32>
    %67 = arith.mulf %60, %60 : vector<256x128xf32>
    %cst_18 = arith.constant dense<0.000000e+00> : vector<128xf32>
    %68 = vector.multi_reduction <add>, %67, %cst_18 [0] : vector<256x128xf32> to vector<128xf32>
    %69 = vector.shape_cast %68 : vector<128xf32> to vector<1x128xf32>
    %cst_19 = arith.constant 2.560000e+02 : f32
    %70 = vector.broadcast %cst_19 : f32 to vector<1x128xf32>
    %71 = arith.divf %69, %70 : vector<1x128xf32>
    %72 = arith.mulf %66, %66 : vector<1x128xf32>
    %73 = arith.subf %71, %72 : vector<1x128xf32>
    %cst_20 = arith.constant 0.000000e+00 : f32
    %74 = vector.broadcast %cst_20 : f32 to vector<1x128xf32>
    %75 = arith.maximumf %73, %74 : vector<1x128xf32>
    %cst_21 = arith.constant 9.99999974E-6 : f32
    %76 = vector.broadcast %cst_21 : f32 to vector<1x128xf32>
    %77 = arith.addf %75, %76 : vector<1x128xf32>
    %78 = math.rsqrt %77 : vector<1x128xf32>
    %79 = arith.mulf %61, %78 : vector<1x128xf32>
    %80 = arith.mulf %66, %79 : vector<1x128xf32>
    %81 = arith.subf %62, %80 : vector<1x128xf32>
    %82 = vector.broadcast %79 : vector<1x128xf32> to vector<256x128xf32>
    %83 = arith.mulf %60, %82 : vector<256x128xf32>
    %84 = vector.broadcast %81 : vector<1x128xf32> to vector<256x128xf32>
    %85 = arith.addf %83, %84 : vector<256x128xf32>
    %c2 = arith.constant 2 : index
    %c0_22 = arith.constant 0 : index
    %c0_23 = arith.constant 0 : index
    %86 = vector.load %arg1[%c2, %c0_22, %c0_23] : memref<10x128x128xf32, #tpu.memory_space<vmem>>, vector<1x128x128xf32>
    %87 = vector.shape_cast %86 : vector<1x128x128xf32> to vector<128x128xf32>
    %cst_24 = arith.constant dense<0.000000e+00> : vector<256x128xf32>
    %88 = tpu.matmul %85, %87, %cst_24 {dimension_numbers = #tpu.dot_dimension_numbers<[1], [0], [0], [1], [0, 0, 1, 1], [], []>} : vector<256x128xf32>, vector<128x128xf32>, vector<256x128xf32> -> vector<256x128xf32>
    %89 = vector.extract_strided_slice %0 {offsets = [6, 0], sizes = [1, 128], strides = [1, 1]} : vector<26x128xf32> to vector<1x128xf32>
    %90 = vector.broadcast %89 : vector<1x128xf32> to vector<256x128xf32>
    %91 = arith.addf %88, %90 : vector<256x128xf32>
    %cst_25 = arith.constant 2.000000e-01 : f32
    %92 = vector.broadcast %cst_25 : f32 to vector<256x128xf32>
    %93 = arith.mulf %92, %91 : vector<256x128xf32>
    %94 = arith.maximumf %91, %93 : vector<256x128xf32>
    %95 = vector.extract_strided_slice %0 {offsets = [7, 0], sizes = [1, 128], strides = [1, 1]} : vector<26x128xf32> to vector<1x128xf32>
    %96 = vector.extract_strided_slice %0 {offsets = [8, 0], sizes = [1, 128], strides = [1, 1]} : vector<26x128xf32> to vector<1x128xf32>
    %cst_26 = arith.constant dense<0.000000e+00> : vector<128xf32>
    %97 = vector.multi_reduction <add>, %94, %cst_26 [0] : vector<256x128xf32> to vector<128xf32>
    %98 = vector.shape_cast %97 : vector<128xf32> to vector<1x128xf32>
    %cst_27 = arith.constant 2.560000e+02 : f32
    %99 = vector.broadcast %cst_27 : f32 to vector<1x128xf32>
    %100 = arith.divf %98, %99 : vector<1x128xf32>
    %101 = arith.mulf %94, %94 : vector<256x128xf32>
    %cst_28 = arith.constant dense<0.000000e+00> : vector<128xf32>
    %102 = vector.multi_reduction <add>, %101, %cst_28 [0] : vector<256x128xf32> to vector<128xf32>
    %103 = vector.shape_cast %102 : vector<128xf32> to vector<1x128xf32>
    %cst_29 = arith.constant 2.560000e+02 : f32
    %104 = vector.broadcast %cst_29 : f32 to vector<1x128xf32>
    %105 = arith.divf %103, %104 : vector<1x128xf32>
    %106 = arith.mulf %100, %100 : vector<1x128xf32>
    %107 = arith.subf %105, %106 : vector<1x128xf32>
    %cst_30 = arith.constant 0.000000e+00 : f32
    %108 = vector.broadcast %cst_30 : f32 to vector<1x128xf32>
    %109 = arith.maximumf %107, %108 : vector<1x128xf32>
    %cst_31 = arith.constant 9.99999974E-6 : f32
    %110 = vector.broadcast %cst_31 : f32 to vector<1x128xf32>
    %111 = arith.addf %109, %110 : vector<1x128xf32>
    %112 = math.rsqrt %111 : vector<1x128xf32>
    %113 = arith.mulf %95, %112 : vector<1x128xf32>
    %114 = arith.mulf %100, %113 : vector<1x128xf32>
    %115 = arith.subf %96, %114 : vector<1x128xf32>
    %116 = vector.broadcast %113 : vector<1x128xf32> to vector<256x128xf32>
    %117 = arith.mulf %94, %116 : vector<256x128xf32>
    %118 = vector.broadcast %115 : vector<1x128xf32> to vector<256x128xf32>
    %119 = arith.addf %117, %118 : vector<256x128xf32>
    %c3 = arith.constant 3 : index
    %c0_32 = arith.constant 0 : index
    %c0_33 = arith.constant 0 : index
    %120 = vector.load %arg1[%c3, %c0_32, %c0_33] : memref<10x128x128xf32, #tpu.memory_space<vmem>>, vector<1x128x128xf32>
    %121 = vector.shape_cast %120 : vector<1x128x128xf32> to vector<128x128xf32>
    %cst_34 = arith.constant dense<0.000000e+00> : vector<256x128xf32>
    %122 = tpu.matmul %119, %121, %cst_34 {dimension_numbers = #tpu.dot_dimension_numbers<[1], [0], [0], [1], [0, 0, 1, 1], [], []>} : vector<256x128xf32>, vector<128x128xf32>, vector<256x128xf32> -> vector<256x128xf32>
    %123 = vector.extract_strided_slice %0 {offsets = [9, 0], sizes = [1, 128], strides = [1, 1]} : vector<26x128xf32> to vector<1x128xf32>
    %124 = vector.broadcast %123 : vector<1x128xf32> to vector<256x128xf32>
    %125 = arith.addf %122, %124 : vector<256x128xf32>
    %cst_35 = arith.constant 2.000000e-01 : f32
    %126 = vector.broadcast %cst_35 : f32 to vector<256x128xf32>
    %127 = arith.mulf %126, %125 : vector<256x128xf32>
    %128 = arith.maximumf %125, %127 : vector<256x128xf32>
    %129 = vector.extract_strided_slice %0 {offsets = [10, 0], sizes = [1, 128], strides = [1, 1]} : vector<26x128xf32> to vector<1x128xf32>
    %130 = vector.extract_strided_slice %0 {offsets = [11, 0], sizes = [1, 128], strides = [1, 1]} : vector<26x128xf32> to vector<1x128xf32>
    %cst_36 = arith.constant dense<0.000000e+00> : vector<128xf32>
    %131 = vector.multi_reduction <add>, %128, %cst_36 [0] : vector<256x128xf32> to vector<128xf32>
    %132 = vector.shape_cast %131 : vector<128xf32> to vector<1x128xf32>
    %cst_37 = arith.constant 2.560000e+02 : f32
    %133 = vector.broadcast %cst_37 : f32 to vector<1x128xf32>
    %134 = arith.divf %132, %133 : vector<1x128xf32>
    %135 = arith.mulf %128, %128 : vector<256x128xf32>
    %cst_38 = arith.constant dense<0.000000e+00> : vector<128xf32>
    %136 = vector.multi_reduction <add>, %135, %cst_38 [0] : vector<256x128xf32> to vector<128xf32>
    %137 = vector.shape_cast %136 : vector<128xf32> to vector<1x128xf32>
    %cst_39 = arith.constant 2.560000e+02 : f32
    %138 = vector.broadcast %cst_39 : f32 to vector<1x128xf32>
    %139 = arith.divf %137, %138 : vector<1x128xf32>
    %140 = arith.mulf %134, %134 : vector<1x128xf32>
    %141 = arith.subf %139, %140 : vector<1x128xf32>
    %cst_40 = arith.constant 0.000000e+00 : f32
    %142 = vector.broadcast %cst_40 : f32 to vector<1x128xf32>
    %143 = arith.maximumf %141, %142 : vector<1x128xf32>
    %cst_41 = arith.constant 9.99999974E-6 : f32
    %144 = vector.broadcast %cst_41 : f32 to vector<1x128xf32>
    %145 = arith.addf %143, %144 : vector<1x128xf32>
    %146 = math.rsqrt %145 : vector<1x128xf32>
    %147 = arith.mulf %129, %146 : vector<1x128xf32>
    %148 = arith.mulf %134, %147 : vector<1x128xf32>
    %149 = arith.subf %130, %148 : vector<1x128xf32>
    %150 = vector.broadcast %147 : vector<1x128xf32> to vector<256x128xf32>
    %151 = arith.mulf %128, %150 : vector<256x128xf32>
    %152 = vector.broadcast %149 : vector<1x128xf32> to vector<256x128xf32>
    %153 = arith.addf %151, %152 : vector<256x128xf32>
    %c4 = arith.constant 4 : index
    %c0_42 = arith.constant 0 : index
    %c0_43 = arith.constant 0 : index
    %154 = vector.load %arg1[%c4, %c0_42, %c0_43] : memref<10x128x128xf32, #tpu.memory_space<vmem>>, vector<1x128x128xf32>
    %155 = vector.shape_cast %154 : vector<1x128x128xf32> to vector<128x128xf32>
    %cst_44 = arith.constant dense<0.000000e+00> : vector<256x128xf32>
    %156 = tpu.matmul %153, %155, %cst_44 {dimension_numbers = #tpu.dot_dimension_numbers<[1], [0], [0], [1], [0, 0, 1, 1], [], []>} : vector<256x128xf32>, vector<128x128xf32>, vector<256x128xf32> -> vector<256x128xf32>
    %157 = vector.extract_strided_slice %0 {offsets = [12, 0], sizes = [1, 128], strides = [1, 1]} : vector<26x128xf32> to vector<1x128xf32>
    %158 = vector.broadcast %157 : vector<1x128xf32> to vector<256x128xf32>
    %159 = arith.addf %156, %158 : vector<256x128xf32>
    %160 = vector.extract_strided_slice %159 {offsets = [0, 0], sizes = [256, 8], strides = [1, 1]} : vector<256x128xf32> to vector<256x8xf32>
    %c0_45 = arith.constant 0 : index
    %c0_46 = arith.constant 0 : index
    %161 = vector.load %arg4[%c0_45, %c0_46] : memref<256x8xf32, #tpu.memory_space<vmem>>, vector<256x8xf32>
    tpu.vector_store %arg4[%c0_45, %c0_46], %160 {strides = array<i32>} : memref<256x8xf32, #tpu.memory_space<vmem>>, vector<256x8xf32>,
    %c5 = arith.constant 5 : index
    %c0_47 = arith.constant 0 : index
    %c0_48 = arith.constant 0 : index
    %162 = vector.load %arg1[%c5, %c0_47, %c0_48] : memref<10x128x128xf32, #tpu.memory_space<vmem>>, vector<1x128x128xf32>
    %163 = vector.shape_cast %162 : vector<1x128x128xf32> to vector<128x128xf32>
    %cst_49 = arith.constant dense<0.000000e+00> : vector<256x128xf32>
    %164 = tpu.matmul %159, %163, %cst_49 {dimension_numbers = #tpu.dot_dimension_numbers<[1], [0], [0], [1], [0, 0, 1, 1], [], []>} : vector<256x128xf32>, vector<128x128xf32>, vector<256x128xf32> -> vector<256x128xf32>
    %165 = vector.extract_strided_slice %0 {offsets = [13, 0], sizes = [1, 128], strides = [1, 1]} : vector<26x128xf32> to vector<1x128xf32>
    %166 = vector.broadcast %165 : vector<1x128xf32> to vector<256x128xf32>
    %167 = arith.addf %164, %166 : vector<256x128xf32>
    %cst_50 = arith.constant 2.000000e-01 : f32
    %168 = vector.broadcast %cst_50 : f32 to vector<256x128xf32>
    %169 = arith.mulf %168, %167 : vector<256x128xf32>
    %170 = arith.maximumf %167, %169 : vector<256x128xf32>
    %171 = vector.extract_strided_slice %0 {offsets = [14, 0], sizes = [1, 128], strides = [1, 1]} : vector<26x128xf32> to vector<1x128xf32>
    %172 = vector.extract_strided_slice %0 {offsets = [15, 0], sizes = [1, 128], strides = [1, 1]} : vector<26x128xf32> to vector<1x128xf32>
    %cst_51 = arith.constant dense<0.000000e+00> : vector<128xf32>
    %173 = vector.multi_reduction <add>, %170, %cst_51 [0] : vector<256x128xf32> to vector<128xf32>
    %174 = vector.shape_cast %173 : vector<128xf32> to vector<1x128xf32>
    %cst_52 = arith.constant 2.560000e+02 : f32
    %175 = vector.broadcast %cst_52 : f32 to vector<1x128xf32>
    %176 = arith.divf %174, %175 : vector<1x128xf32>
    %177 = arith.mulf %170, %170 : vector<256x128xf32>
    %cst_53 = arith.constant dense<0.000000e+00> : vector<128xf32>
    %178 = vector.multi_reduction <add>, %177, %cst_53 [0] : vector<256x128xf32> to vector<128xf32>
    %179 = vector.shape_cast %178 : vector<128xf32> to vector<1x128xf32>
    %cst_54 = arith.constant 2.560000e+02 : f32
    %180 = vector.broadcast %cst_54 : f32 to vector<1x128xf32>
    %181 = arith.divf %179, %180 : vector<1x128xf32>
    %182 = arith.mulf %176, %176 : vector<1x128xf32>
    %183 = arith.subf %181, %182 : vector<1x128xf32>
    %cst_55 = arith.constant 0.000000e+00 : f32
    %184 = vector.broadcast %cst_55 : f32 to vector<1x128xf32>
    %185 = arith.maximumf %183, %184 : vector<1x128xf32>
    %cst_56 = arith.constant 9.99999974E-6 : f32
    %186 = vector.broadcast %cst_56 : f32 to vector<1x128xf32>
    %187 = arith.addf %185, %186 : vector<1x128xf32>
    %188 = math.rsqrt %187 : vector<1x128xf32>
    %189 = arith.mulf %171, %188 : vector<1x128xf32>
    %190 = arith.mulf %176, %189 : vector<1x128xf32>
    %191 = arith.subf %172, %190 : vector<1x128xf32>
    %192 = vector.broadcast %189 : vector<1x128xf32> to vector<256x128xf32>
    %193 = arith.mulf %170, %192 : vector<256x128xf32>
    %194 = vector.broadcast %191 : vector<1x128xf32> to vector<256x128xf32>
    %195 = arith.addf %193, %194 : vector<256x128xf32>
    %c6 = arith.constant 6 : index
    %c0_57 = arith.constant 0 : index
    %c0_58 = arith.constant 0 : index
    %196 = vector.load %arg1[%c6, %c0_57, %c0_58] : memref<10x128x128xf32, #tpu.memory_space<vmem>>, vector<1x128x128xf32>
    %197 = vector.shape_cast %196 : vector<1x128x128xf32> to vector<128x128xf32>
    %cst_59 = arith.constant dense<0.000000e+00> : vector<256x128xf32>
    %198 = tpu.matmul %195, %197, %cst_59 {dimension_numbers = #tpu.dot_dimension_numbers<[1], [0], [0], [1], [0, 0, 1, 1], [], []>} : vector<256x128xf32>, vector<128x128xf32>, vector<256x128xf32> -> vector<256x128xf32>
    %199 = vector.extract_strided_slice %0 {offsets = [16, 0], sizes = [1, 128], strides = [1, 1]} : vector<26x128xf32> to vector<1x128xf32>
    %200 = vector.broadcast %199 : vector<1x128xf32> to vector<256x128xf32>
    %201 = arith.addf %198, %200 : vector<256x128xf32>
    %cst_60 = arith.constant 2.000000e-01 : f32
    %202 = vector.broadcast %cst_60 : f32 to vector<256x128xf32>
    %203 = arith.mulf %202, %201 : vector<256x128xf32>
    %204 = arith.maximumf %201, %203 : vector<256x128xf32>
    %205 = vector.extract_strided_slice %0 {offsets = [17, 0], sizes = [1, 128], strides = [1, 1]} : vector<26x128xf32> to vector<1x128xf32>
    %206 = vector.extract_strided_slice %0 {offsets = [18, 0], sizes = [1, 128], strides = [1, 1]} : vector<26x128xf32> to vector<1x128xf32>
    %cst_61 = arith.constant dense<0.000000e+00> : vector<128xf32>
    %207 = vector.multi_reduction <add>, %204, %cst_61 [0] : vector<256x128xf32> to vector<128xf32>
    %208 = vector.shape_cast %207 : vector<128xf32> to vector<1x128xf32>
    %cst_62 = arith.constant 2.560000e+02 : f32
    %209 = vector.broadcast %cst_62 : f32 to vector<1x128xf32>
    %210 = arith.divf %208, %209 : vector<1x128xf32>
    %211 = arith.mulf %204, %204 : vector<256x128xf32>
    %cst_63 = arith.constant dense<0.000000e+00> : vector<128xf32>
    %212 = vector.multi_reduction <add>, %211, %cst_63 [0] : vector<256x128xf32> to vector<128xf32>
    %213 = vector.shape_cast %212 : vector<128xf32> to vector<1x128xf32>
    %cst_64 = arith.constant 2.560000e+02 : f32
    %214 = vector.broadcast %cst_64 : f32 to vector<1x128xf32>
    %215 = arith.divf %213, %214 : vector<1x128xf32>
    %216 = arith.mulf %210, %210 : vector<1x128xf32>
    %217 = arith.subf %215, %216 : vector<1x128xf32>
    %cst_65 = arith.constant 0.000000e+00 : f32
    %218 = vector.broadcast %cst_65 : f32 to vector<1x128xf32>
    %219 = arith.maximumf %217, %218 : vector<1x128xf32>
    %cst_66 = arith.constant 9.99999974E-6 : f32
    %220 = vector.broadcast %cst_66 : f32 to vector<1x128xf32>
    %221 = arith.addf %219, %220 : vector<1x128xf32>
    %222 = math.rsqrt %221 : vector<1x128xf32>
    %223 = arith.mulf %205, %222 : vector<1x128xf32>
    %224 = arith.mulf %210, %223 : vector<1x128xf32>
    %225 = arith.subf %206, %224 : vector<1x128xf32>
    %226 = vector.broadcast %223 : vector<1x128xf32> to vector<256x128xf32>
    %227 = arith.mulf %204, %226 : vector<256x128xf32>
    %228 = vector.broadcast %225 : vector<1x128xf32> to vector<256x128xf32>
    %229 = arith.addf %227, %228 : vector<256x128xf32>
    %c7 = arith.constant 7 : index
    %c0_67 = arith.constant 0 : index
    %c0_68 = arith.constant 0 : index
    %230 = vector.load %arg1[%c7, %c0_67, %c0_68] : memref<10x128x128xf32, #tpu.memory_space<vmem>>, vector<1x128x128xf32>
    %231 = vector.shape_cast %230 : vector<1x128x128xf32> to vector<128x128xf32>
    %cst_69 = arith.constant dense<0.000000e+00> : vector<256x128xf32>
    %232 = tpu.matmul %229, %231, %cst_69 {dimension_numbers = #tpu.dot_dimension_numbers<[1], [0], [0], [1], [0, 0, 1, 1], [], []>} : vector<256x128xf32>, vector<128x128xf32>, vector<256x128xf32> -> vector<256x128xf32>
    %233 = vector.extract_strided_slice %0 {offsets = [19, 0], sizes = [1, 128], strides = [1, 1]} : vector<26x128xf32> to vector<1x128xf32>
    %234 = vector.broadcast %233 : vector<1x128xf32> to vector<256x128xf32>
    %235 = arith.addf %232, %234 : vector<256x128xf32>
    %cst_70 = arith.constant 2.000000e-01 : f32
    %236 = vector.broadcast %cst_70 : f32 to vector<256x128xf32>
    %237 = arith.mulf %236, %235 : vector<256x128xf32>
    %238 = arith.maximumf %235, %237 : vector<256x128xf32>
    %239 = vector.extract_strided_slice %0 {offsets = [20, 0], sizes = [1, 128], strides = [1, 1]} : vector<26x128xf32> to vector<1x128xf32>
    %240 = vector.extract_strided_slice %0 {offsets = [21, 0], sizes = [1, 128], strides = [1, 1]} : vector<26x128xf32> to vector<1x128xf32>
    %cst_71 = arith.constant dense<0.000000e+00> : vector<128xf32>
    %241 = vector.multi_reduction <add>, %238, %cst_71 [0] : vector<256x128xf32> to vector<128xf32>
    %242 = vector.shape_cast %241 : vector<128xf32> to vector<1x128xf32>
    %cst_72 = arith.constant 2.560000e+02 : f32
    %243 = vector.broadcast %cst_72 : f32 to vector<1x128xf32>
    %244 = arith.divf %242, %243 : vector<1x128xf32>
    %245 = arith.mulf %238, %238 : vector<256x128xf32>
    %cst_73 = arith.constant dense<0.000000e+00> : vector<128xf32>
    %246 = vector.multi_reduction <add>, %245, %cst_73 [0] : vector<256x128xf32> to vector<128xf32>
    %247 = vector.shape_cast %246 : vector<128xf32> to vector<1x128xf32>
    %cst_74 = arith.constant 2.560000e+02 : f32
    %248 = vector.broadcast %cst_74 : f32 to vector<1x128xf32>
    %249 = arith.divf %247, %248 : vector<1x128xf32>
    %250 = arith.mulf %244, %244 : vector<1x128xf32>
    %251 = arith.subf %249, %250 : vector<1x128xf32>
    %cst_75 = arith.constant 0.000000e+00 : f32
    %252 = vector.broadcast %cst_75 : f32 to vector<1x128xf32>
    %253 = arith.maximumf %251, %252 : vector<1x128xf32>
    %cst_76 = arith.constant 9.99999974E-6 : f32
    %254 = vector.broadcast %cst_76 : f32 to vector<1x128xf32>
    %255 = arith.addf %253, %254 : vector<1x128xf32>
    %256 = math.rsqrt %255 : vector<1x128xf32>
    %257 = arith.mulf %239, %256 : vector<1x128xf32>
    %258 = arith.mulf %244, %257 : vector<1x128xf32>
    %259 = arith.subf %240, %258 : vector<1x128xf32>
    %260 = vector.broadcast %257 : vector<1x128xf32> to vector<256x128xf32>
    %261 = arith.mulf %238, %260 : vector<256x128xf32>
    %262 = vector.broadcast %259 : vector<1x128xf32> to vector<256x128xf32>
    %263 = arith.addf %261, %262 : vector<256x128xf32>
    %c8 = arith.constant 8 : index
    %c0_77 = arith.constant 0 : index
    %c0_78 = arith.constant 0 : index
    %264 = vector.load %arg1[%c8, %c0_77, %c0_78] : memref<10x128x128xf32, #tpu.memory_space<vmem>>, vector<1x128x128xf32>
    %265 = vector.shape_cast %264 : vector<1x128x128xf32> to vector<128x128xf32>
    %cst_79 = arith.constant dense<0.000000e+00> : vector<256x128xf32>
    %266 = tpu.matmul %263, %265, %cst_79 {dimension_numbers = #tpu.dot_dimension_numbers<[1], [0], [0], [1], [0, 0, 1, 1], [], []>} : vector<256x128xf32>, vector<128x128xf32>, vector<256x128xf32> -> vector<256x128xf32>
    %267 = vector.extract_strided_slice %0 {offsets = [22, 0], sizes = [1, 128], strides = [1, 1]} : vector<26x128xf32> to vector<1x128xf32>
    %268 = vector.broadcast %267 : vector<1x128xf32> to vector<256x128xf32>
    %269 = arith.addf %266, %268 : vector<256x128xf32>
    %cst_80 = arith.constant 2.000000e-01 : f32
    %270 = vector.broadcast %cst_80 : f32 to vector<256x128xf32>
    %271 = arith.mulf %270, %269 : vector<256x128xf32>
    %272 = arith.maximumf %269, %271 : vector<256x128xf32>
    %273 = vector.extract_strided_slice %0 {offsets = [23, 0], sizes = [1, 128], strides = [1, 1]} : vector<26x128xf32> to vector<1x128xf32>
    %274 = vector.extract_strided_slice %0 {offsets = [24, 0], sizes = [1, 128], strides = [1, 1]} : vector<26x128xf32> to vector<1x128xf32>
    %cst_81 = arith.constant dense<0.000000e+00> : vector<128xf32>
    %275 = vector.multi_reduction <add>, %272, %cst_81 [0] : vector<256x128xf32> to vector<128xf32>
    %276 = vector.shape_cast %275 : vector<128xf32> to vector<1x128xf32>
    %cst_82 = arith.constant 2.560000e+02 : f32
    %277 = vector.broadcast %cst_82 : f32 to vector<1x128xf32>
    %278 = arith.divf %276, %277 : vector<1x128xf32>
    %279 = arith.mulf %272, %272 : vector<256x128xf32>
    %cst_83 = arith.constant dense<0.000000e+00> : vector<128xf32>
    %280 = vector.multi_reduction <add>, %279, %cst_83 [0] : vector<256x128xf32> to vector<128xf32>
    %281 = vector.shape_cast %280 : vector<128xf32> to vector<1x128xf32>
    %cst_84 = arith.constant 2.560000e+02 : f32
    %282 = vector.broadcast %cst_84 : f32 to vector<1x128xf32>
    %283 = arith.divf %281, %282 : vector<1x128xf32>
    %284 = arith.mulf %278, %278 : vector<1x128xf32>
    %285 = arith.subf %283, %284 : vector<1x128xf32>
    %cst_85 = arith.constant 0.000000e+00 : f32
    %286 = vector.broadcast %cst_85 : f32 to vector<1x128xf32>
    %287 = arith.maximumf %285, %286 : vector<1x128xf32>
    %cst_86 = arith.constant 9.99999974E-6 : f32
    %288 = vector.broadcast %cst_86 : f32 to vector<1x128xf32>
    %289 = arith.addf %287, %288 : vector<1x128xf32>
    %290 = math.rsqrt %289 : vector<1x128xf32>
    %291 = arith.mulf %273, %290 : vector<1x128xf32>
    %292 = arith.mulf %278, %291 : vector<1x128xf32>
    %293 = arith.subf %274, %292 : vector<1x128xf32>
    %294 = vector.broadcast %291 : vector<1x128xf32> to vector<256x128xf32>
    %295 = arith.mulf %272, %294 : vector<256x128xf32>
    %296 = vector.broadcast %293 : vector<1x128xf32> to vector<256x128xf32>
    %297 = arith.addf %295, %296 : vector<256x128xf32>
    %c9 = arith.constant 9 : index
    %c0_87 = arith.constant 0 : index
    %c0_88 = arith.constant 0 : index
    %298 = vector.load %arg1[%c9, %c0_87, %c0_88] : memref<10x128x128xf32, #tpu.memory_space<vmem>>, vector<1x128x128xf32>
    %299 = vector.shape_cast %298 : vector<1x128x128xf32> to vector<128x128xf32>
    %cst_89 = arith.constant dense<0.000000e+00> : vector<256x128xf32>
    %300 = tpu.matmul %297, %299, %cst_89 {dimension_numbers = #tpu.dot_dimension_numbers<[1], [0], [0], [1], [0, 0, 1, 1], [], []>} : vector<256x128xf32>, vector<128x128xf32>, vector<256x128xf32> -> vector<256x128xf32>
    %301 = vector.extract_strided_slice %0 {offsets = [25, 0], sizes = [1, 128], strides = [1, 1]} : vector<26x128xf32> to vector<1x128xf32>
    %302 = vector.broadcast %301 : vector<1x128xf32> to vector<256x128xf32>
    %303 = arith.addf %300, %302 : vector<256x128xf32>
    %304 = vector.extract_strided_slice %303 {offsets = [0, 0], sizes = [256, 3], strides = [1, 1]} : vector<256x128xf32> to vector<256x3xf32>
    %c0_90 = arith.constant 0 : index
    %c0_91 = arith.constant 0 : index
    %305 = vector.load %arg3[%c0_90, %c0_91] : memref<256x3xf32, #tpu.memory_space<vmem>>, vector<256x3xf32>
    tpu.vector_store %arg3[%c0_90, %c0_91], %304 {strides = array<i32>} : memref<256x3xf32, #tpu.memory_space<vmem>>, vector<256x3xf32>,
    return
  }
}

</mosaic_0001>

<bundles_post_ra>
// kernel: autoencoder_forward.1
= control target key start
LH: loop header
LB: loop body
LE: loop exit
PB: predicated region body
PF: predicated region fallthrough
CT: control target
= control target key end

     0   :  { %10 = vsyncpa [#allocation3], 0  ;;  %s6589_s15 = smov [#allocation2]   ;;  %s9830_s0 = inlined_call_operand.vmem [shape: f32[256,3], index: 0, kind: input, shape index: {}]   ;;  %s9831_s1 = inlined_call_operand.hbm [shape: f32[10,128,128], index: 1, kind: input, shape index: {}]   ;;  %s9832_s2 = inlined_call_operand.vmem [shape: f32[26,128], index: 2, kind: input, shape index: {}]   ;;  %s9833_s3 = inlined_call_operand.vmem [shape: f32[256,3], index: 3, kind: output, shape index: {0}]   ;;  %s9834_s4 = inlined_call_operand.vmem [shape: f32[256,8], index: 4, kind: output, shape index: {1}]  }
   0x1   :  { %s18_s16 = sshll.u32 %s6589_s15, 4  ;;  %s6565_s19 = scalar_lea.hbm %s9831_s1, 20480  ;;  %s19_s16 = int_to_ptr.vmem [resolvable:$true] %s18_s16 }
   0x2   :  { %p6566_p0 = scmp.ne.s32.totalorder %s9831_s1, %s6565_s19  ;;  %p6569_p1 = scmp.lt.u32.totalorder %s6565_s19, %s9831_s1 }
   0x4   :  { %p6571_p2 = pnand %p6569_p1, %p6566_p0 }
   0x6   :  { %6574 = shalt.err (!%p6571_p2)
}
   0x7   :  { %s6575_s24 = scalar_lea.vmem %s19_s16, 20480  ;;  %p6580_p4 = scmp.lt.s32.totalorder %s19_s16, %s19_s16 }
   0x8   :  { %p6576_p3 = scmp.ne.s32.totalorder %s19_s16, %s6575_s24  ;;  %p6581_p5 = scmp.lt.s32.totalorder %s6575_s24, %s6575_s24 }
   0xa   :  { %p6582_p6 = por %p6581_p5, %p6580_p4 }
   0xc   :  { %p6583_p7 = pnand %p6582_p6, %p6576_p3 }
   0xe   :  { %6586 = shalt.err (!%p6583_p7)
}
   0xf   :  { %s6590_s25 = smov 128   ;;  %s6591_s26 = smov 8  }
  0x10   :  { %24 = dma.hbm_to_vmem [thread:$0]  %s9831_s1, 20480, %s19_s16, [#allocation3], %s6590_s25, %s6590_s25, %s6591_s26  }
  0x11   :  { %6587 = dma.done.wait [#allocation3], 20480  }
  0x12   :  { %6588 = vsyncadd [#allocation3], 4294946816  ;;  %v9837_v0 = vmov 0   ;;  %v36_v1 = vld [vmem:[%s9830_s0 + $0x10] sm:$0xff]  ;;  %v34_v2 = vld [vmem:[%s9830_s0] sm:$0xff]  ;;  %v6593_v4 = vmov 1   ;;  %v227_v29 = vlaneseq }
  0x13   :  { %6484 = vset.pattern.permute.xlu1 %v9837_v0  ;;  %6483 = vset.pattern.permute.xlu0 %v9837_v0  ;;  %v35_v3 = vld [vmem:[%s9830_s0 + $0x8] sm:$0xff]  ;;  %v37_v5 = vld [vmem:[%s9830_s0 + $0x18] sm:$0xff]  ;;  %v38_v6 = vld [vmem:[%s9830_s0 + $0x20] sm:$0xff]  ;;  %v9835_v8 = vmov 2   ;;  %vm2696_vm0 = vcmask 64512   ;;  %vm4979_vm1 = vcmask 23552  }
  0x14   :  { %79 = vperm.xlu1 %6484, %v36_v1   ;;  %69 = vperm.xlu0 %6483, %v34_v2   ;;  %v42_v7 = vld [vmem:[%s9830_s0 + $0x40] sm:$0xff]  ;;  %v6660_v9 = vld [vmem:[%s9830_s0 + $0x48] sm:$0xff]  ;;  %v6674_v11 = vld [vmem:[%s9830_s0 + $0x70] sm:$0xff]  ;;  %v6786_v30 = vshrl.u32 %v227_v29, 7 }
  0x15   :  { %v6667_v10 = vld [vmem:[%s9830_s0 + $0x68] sm:$0xff]  ;;  %v6684_v13 = vld [vmem:[%s9830_s0 + $0x90] sm:$0xff]  ;;  %v6690_v14 = vld [vmem:[%s9830_s0 + $0x98] sm:$0xff] }
  0x16   :  { %v39_v12 = vld [vmem:[%s9830_s0 + $0x28] sm:$0xff]  ;;  %v6697_v15 = vld [vmem:[%s9830_s0 + $0xb8] sm:$0xff]  ;;  %v6704_v16 = vld [vmem:[%s9830_s0 + $0xc0] sm:$0xff]  ;;  %9848 = vst [vmem:[#allocation5_spill] sm:$0xff] %v6786_v30  ;;  %v6797_v32 = vsub.s32 0, %v6786_v30  ;;  %v6816_v38 = vsub.s32 1, %v6786_v30 }
  0x17   :  { %v40_v17 = vld [vmem:[%s9830_s0 + $0x30] sm:$0xff]  ;;  %v41_v18 = vld [vmem:[%s9830_s0 + $0x38] sm:$0xff]  ;;  %v6736_v22 = vld [vmem:[%s9830_s0 + $0x80] sm:$0xff] }
  0x18   :  { %6485 = vset.pattern.permute.xlu1 %v6593_v4  ;;  %74 = vperm.xlu0 %6483, %v35_v3   ;;  %v44_v19 = vld [vmem:[%s9830_s0 + $0x50] sm:$0xff]  ;;  %v45_v20 = vld [vmem:[%s9830_s0 + $0x58] sm:$0xff]  ;;  %v6743_v23 = vld [vmem:[%s9830_s0 + $0xa0] sm:$0xff]  ;;  %9849 = vst [vmem:[#allocation6_spill] sm:$0xff] %v6797_v32 }
  0x19   :  { %300 = vperm.xlu1 %6485, %v34_v2   ;;  %v6729_v21 = vld [vmem:[%s9830_s0 + $0x78] sm:$0xff]  ;;  %v6749_v24 = vld [vmem:[%s9830_s0 + $0xa8] sm:$0xff]  ;;  %v6763_v26 = vld [vmem:[%s9830_s0 + $0xd0] sm:$0xff] }
  0x1a   :  { %v6756_v25 = vld [vmem:[%s9830_s0 + $0xc8] sm:$0xff]  ;;  %v46_v27 = vld [vmem:[%s9830_s0 + $0x60] sm:$0xff]  ;;  %v6793_v31 = vld [vmem:[%s9830_s0 + $0xb0] sm:$0xff] }
  0x1b   :  { %v6782_v28 = vld [vmem:[%s9830_s0 + $0x88] sm:$0xff]  ;;  %v6799_v33 = vld [vmem:[#allocation2] sm:$0xff]  ;;  %v6825_v42 = vld [vmem:[%s9830_s0 + $0xd8] sm:$0xff] }
  0x1c   :  { %6486 = vset.pattern.permute.xlu0 %v6593_v4  ;;  %v6809_v36 = vrot.slane %v6799_v33, %v6797_v32  ;;  %v30_v37 = vld [vmem:[%s9832_s2] sm:$0xff]  ;;  %v6833_v44 = vrot.slane %v6799_v33, %v6816_v38  ;;  %v6841_v47 = vld [vmem:[%s9830_s0 + $0xf8] sm:$0xff]  ;;  %v6867_v55 = vld [vmem:[%s9830_s0 + $0xe8] sm:$0xff] }
  0x1d   :  { %6487 = vset.pattern.permute.xlu1 %v9837_v0  ;;  %304 = vperm.xlu0 %6486, %v35_v3   ;;  %v6828_v43 = vrot.slane %v30_v37, %v6797_v32  ;;  %v6856_v52 = vld [vmem:[%s9830_s0 + $0xe0] sm:$0xff]  ;;  %v9851_v32 = vmov 0  }
  0x1e   :  { %84 = vperm.xlu1 %6487, %v37_v5  }
  0x21   :  { %312 = vperm.xlu0 %6486, %v37_v5  }
  0x22   :  { %6488 = vset.pattern.permute.xlu1 %v6593_v4 }
  0x23   :  { %308 = vperm.xlu1 %6488, %v36_v1  }
  0x25   :  { %316 = vperm.xlu0 %6486, %v38_v6  }
  0x27   :  { %6489 = vset.pattern.permute.xlu1 %v9835_v8 }
  0x28   :  { %500 = vperm.xlu1 %6489, %v35_v3  }
  0x29   :  { %332 = vperm.xlu0 %6486, %v42_v7  }
  0x2c   :  { %6490 = vset.pattern.permute.xlu1 %v9837_v0 }
  0x2d   :  { %89 = vperm.xlu1 %6490, %v38_v6   ;;  %336 = vperm.xlu0 %6486, %v6660_v9  }
  0x31   :  { %6491 = vset.pattern.permute.xlu1 %v9835_v8  ;;  %352 = vperm.xlu0 %6486, %v6667_v10  }
  0x32   :  { %504 = vperm.xlu1 %6491, %v36_v1  }
  0x35   :  { %356 = vperm.xlu0 %6486, %v6674_v11  }
  0x36   :  { %6492 = vset.pattern.permute.xlu1 %v9837_v0 }
  0x37   :  { %94 = vperm.xlu1 %6492, %v39_v12  }
  0x39   :  { %372 = vperm.xlu0 %6486, %v6684_v13  }
  0x3b   :  { %6493 = vset.pattern.permute.xlu1 %v9835_v8 }
  0x3c   :  { %508 = vperm.xlu1 %6493, %v37_v5  }
  0x3d   :  { %376 = vperm.xlu0 %6486, %v6690_v14  }
  0x40   :  { %6494 = vset.pattern.permute.xlu1 %v6593_v4 }
  0x41   :  { %320 = vperm.xlu1 %6494, %v39_v12   ;;  %392 = vperm.xlu0 %6486, %v6697_v15  }
  0x45   :  { %6495 = vset.pattern.permute.xlu1 %v9835_v8  ;;  %396 = vperm.xlu0 %6486, %v6704_v16  }
  0x46   :  { %512 = vperm.xlu1 %6495, %v38_v6   ;;  %v6900_v6 = vsub.s32 2, %v6786_v30 }
  0x48   :  { %9850 = vst [vmem:[#allocation7_spill] sm:$0xff] %v6900_v6 }
  0x49   :  { %6529 = vset.pattern.permute.xlu0 %v9835_v8 }
  0x4a   :  { %6496 = vset.pattern.permute.xlu1 %v6593_v4  ;;  %496 = vperm.xlu0 %6529, %v34_v2  }
  0x4b   :  { %324 = vperm.xlu1 %6496, %v40_v17  }
  0x4e   :  { %516 = vperm.xlu0 %6529, %v39_v12   ;;  %v6912_v12 = vrot.slane %v6799_v33, %v6900_v6 }
  0x4f   :  { %6497 = vset.pattern.permute.xlu1 %v9837_v0 }
  0x50   :  { %109 = vperm.xlu1 %6497, %v42_v7  }
  0x52   :  { %520 = vperm.xlu0 %6529, %v40_v17  }
  0x54   :  { %6498 = vset.pattern.permute.xlu1 %v6593_v4 }
  0x55   :  { %328 = vperm.xlu1 %6498, %v41_v18  }
  0x56   :  { %536 = vperm.xlu0 %6529, %v44_v19  }
  0x59   :  { %6499 = vset.pattern.permute.xlu1 %v9837_v0 }
  0x5a   :  { %114 = vperm.xlu1 %6499, %v6660_v9   ;;  %540 = vperm.xlu0 %6529, %v45_v20  }
  0x5e   :  { %6500 = vset.pattern.permute.xlu1 %v9835_v8  ;;  %556 = vperm.xlu0 %6529, %v6729_v21  }
  0x5f   :  { %524 = vperm.xlu1 %6500, %v41_v18  }
  0x62   :  { %560 = vperm.xlu0 %6529, %v6736_v22  }
  0x63   :  { %6501 = vset.pattern.permute.xlu1 %v9837_v0 }
  0x64   :  { %119 = vperm.xlu1 %6501, %v44_v19  }
  0x66   :  { %576 = vperm.xlu0 %6529, %v6743_v23  }
  0x68   :  { %6502 = vset.pattern.permute.xlu1 %v9835_v8 }
  0x69   :  { %528 = vperm.xlu1 %6502, %v42_v7  }
  0x6a   :  { %580 = vperm.xlu0 %6529, %v6749_v24  }
  0x6d   :  { %6503 = vset.pattern.permute.xlu1 %v6593_v4 }
  0x6e   :  { %340 = vperm.xlu1 %6503, %v44_v19   ;;  %596 = vperm.xlu0 %6529, %v6756_v25  }
  0x72   :  { %6504 = vset.pattern.permute.xlu1 %v9835_v8  ;;  %600 = vperm.xlu0 %6529, %v6763_v26  }
  0x73   :  { %532 = vperm.xlu1 %6504, %v6660_v9  }
  0x76   :  { %6536 = vset.pattern.permute.xlu0 %v9837_v0 }
  0x77   :  { %6505 = vset.pattern.permute.xlu1 %v6593_v4  ;;  %99 = vperm.xlu0 %6536, %v40_v17  }
  0x78   :  { %344 = vperm.xlu1 %6505, %v45_v20  }
  0x7b   :  { %104 = vperm.xlu0 %6536, %v41_v18  }
  0x7c   :  { %6506 = vset.pattern.permute.xlu1 %v9837_v0 }
  0x7d   :  { %134 = vperm.xlu1 %6506, %v6667_v10  }
  0x7f   :  { %124 = vperm.xlu0 %6536, %v45_v20  }
  0x81   :  { %6507 = vset.pattern.permute.xlu1 %v6593_v4 }
  0x82   :  { %348 = vperm.xlu1 %6507, %v46_v27  }
  0x83   :  { %129 = vperm.xlu0 %6536, %v46_v27  }
  0x86   :  { %6508 = vset.pattern.permute.xlu1 %v9837_v0 }
  0x87   :  { %139 = vperm.xlu1 %6508, %v6674_v11   ;;  %149 = vperm.xlu0 %6536, %v6736_v22  }
  0x8b   :  { %6509 = vset.pattern.permute.xlu1 %v9835_v8  ;;  %154 = vperm.xlu0 %6536, %v6782_v28  }
  0x8c   :  { %544 = vperm.xlu1 %6509, %v46_v27  }
  0x8f   :  { %174 = vperm.xlu0 %6536, %v6749_v24  }
  0x90   :  { %6510 = vset.pattern.permute.xlu1 %v9837_v0 }
  0x91   :  { %144 = vperm.xlu1 %6510, %v6729_v21  }
  0x93   :  { %v6801_v34 = vpop.permute.xlu1 %79  ;;  %v6803_v35 = vpop.permute.xlu0 %69  ;;  %179 = vperm.xlu0 %6536, %v6793_v31  }
  0x95   :  { %6511 = vset.pattern.permute.xlu1 %v9835_v8 }
  0x96   :  { %548 = vperm.xlu1 %6511, %v6667_v10  }
  0x97   :  { %v75_v39 = vpop.permute.xlu0 %74  ;;  %199 = vperm.xlu0 %6536, %v6763_v26  }
  0x98   :  { %v6819_v40 = vpop.permute.xlu1 %300  ;;  %v232_v41 = vmul.f32 %v6809_v36, %v75_v39 }
  0x9a   :  { %6512 = vset.pattern.permute.xlu1 %v6593_v4  ;;  %v268_v45 = vadd.f32 %v6828_v43, %v232_v41 }
  0x9b   :  { %360 = vperm.xlu1 %6512, %v6729_v21   ;;  %204 = vperm.xlu0 %6536, %v6825_v42  }
  0x9c   :  { %v305_v46 = vpop.permute.xlu0 %304 }
  0x9d   :  { %v432_v48 = vmul.f32 %v6833_v44, %v305_v46  ;;  %v6844_v49 = vpop.permute.xlu1 %84 }
  0x9f   :  { %v6846_v50 = vadd.f32 %v432_v48, %v268_v45  ;;  %6513 = vset.pattern.permute.xlu1 %v9835_v8  ;;  %224 = vperm.xlu0 %6536, %v6841_v47  }
  0xa0   :  { %552 = vperm.xlu1 %6513, %v6674_v11   ;;  %v6851_v51 = vpop.permute.xlu0 %312 }
  0xa2   :  { %v6858_v53 = vpop.permute.xlu1 %308 }
  0xa3   :  { %6541 = vset.pattern.permute.xlu0 %v6593_v4 }
  0xa4   :  { %6514 = vset.pattern.permute.xlu1 %v6593_v4  ;;  %v317_v54 = vpop.permute.xlu0 %316  ;;  %412 = vperm.xlu0 %6541, %v6856_v52  }
  0xa5   :  { %364 = vperm.xlu1 %6514, %v6736_v22   ;;  %v435_v10 = vmul.f32 %v6833_v44, %v317_v54 }
  0xa7   :  { %v6869_v56 = vpop.permute.xlu1 %500 }
  0xa8   :  { %v333_v57 = vpop.permute.xlu0 %332  ;;  %416 = vperm.xlu0 %6541, %v6867_v55  }
  0xa9   :  { %6515 = vset.pattern.permute.xlu1 %v9837_v0  ;;  %v439_v29 = vmul.f32 %v6833_v44, %v333_v57 }
  0xaa   :  { %159 = vperm.xlu1 %6515, %v6684_v13  }
  0xac   :  { %v90_v58 = vpop.permute.xlu1 %89  ;;  %v337_v59 = vpop.permute.xlu0 %336  ;;  %424 = vperm.xlu0 %6541, %v6841_v47  }
  0xad   :  { %v235_v5 = vmul.f32 %v6809_v36, %v90_v58  ;;  %v440_v48 = vmul.f32 %v6833_v44, %v337_v59 }
  0xae   :  { %6516 = vset.pattern.permute.xlu1 %v6593_v4 }
  0xaf   :  { %368 = vperm.xlu1 %6516, %v6782_v28   ;;  %v271_v11 = vadd.f32 %v6828_v43, %v235_v5 }
  0xb0   :  { %v6877_v60 = vpop.permute.xlu0 %352  ;;  %6544 = vset.pattern.permute.xlu0 %v9835_v8 }
  0xb1   :  { %v6880_v61 = vpop.permute.xlu1 %504  ;;  %v467_v19 = vadd.f32 %v435_v10, %v271_v11 }
  0xb3   :  { %6517 = vset.pattern.permute.xlu1 %v9837_v0 }
  0xb4   :  { %164 = vperm.xlu1 %6517, %v6690_v14   ;;  %v6884_v62 = vpop.permute.xlu0 %356 }
  0xb6   :  { %v6886_v63 = vpop.permute.xlu1 %94 }
  0xb8   :  { %6518 = vset.pattern.permute.xlu1 %v9835_v8  ;;  %v6889_v1 = vpop.permute.xlu0 %372 }
  0xb9   :  { %564 = vperm.xlu1 %6518, %v6782_v28  }
  0xbb   :  { %v6892_v2 = vpop.permute.xlu1 %508 }
  0xbc   :  { %v6894_v3 = vpop.permute.xlu0 %376 }
  0xbd   :  { %6519 = vset.pattern.permute.xlu1 %v9837_v0 }
  0xbe   :  { %169 = vperm.xlu1 %6519, %v6743_v23  }
  0xc0   :  { %v6902_v7 = vpop.permute.xlu1 %320  ;;  %v6904_v9 = vpop.permute.xlu0 %392 }
  0xc2   :  { %6520 = vset.pattern.permute.xlu1 %v9835_v8 }
  0xc3   :  { %568 = vperm.xlu1 %6520, %v6684_v13  }
  0xc4   :  { %v6914_v17 = vpop.permute.xlu0 %396 }
  0xc5   :  { %v513_v18 = vpop.permute.xlu1 %512 }
  0xc6   :  { %v631_v20 = vmul.f32 %v6912_v12, %v513_v18 }
  0xc7   :  { %6521 = vset.pattern.permute.xlu1 %v6593_v4 }
  0xc8   :  { %v6918_v21 = vadd.f32 %v631_v20, %v467_v19  ;;  %380 = vperm.xlu1 %6521, %v6743_v23  }
  0xc9   :  { %v6921_v22 = vpop.permute.xlu0 %496 }
  0xca   :  { %v6923_v27 = vpop.permute.xlu1 %324 }
  0xcc   :  { %6522 = vset.pattern.permute.xlu1 %v9835_v8 }
  0xcd   :  { %572 = vperm.xlu1 %6522, %v6690_v14   ;;  %v6927_v13 = vpop.permute.xlu0 %516 }
  0xcf   :  { %v110_v28 = vpop.permute.xlu1 %109 }
  0xd0   :  { %v239_v33 = vmul.f32 %v6809_v36, %v110_v28 }
  0xd1   :  { %6523 = vset.pattern.permute.xlu1 %v6593_v4  ;;  %v6932_v37 = vpop.permute.xlu0 %520 }
  0xd2   :  { %v275_v23 = vadd.f32 %v6828_v43, %v239_v33  ;;  %384 = vperm.xlu1 %6523, %v6749_v24  }
  0xd4   :  { %v329_v39 = vpop.permute.xlu1 %328  ;;  %v471_v41 = vadd.f32 %v439_v29, %v275_v23 }
  0xd5   :  { %v6936_v45 = vpop.permute.xlu0 %536 }
  0xd6   :  { %6524 = vset.pattern.permute.xlu1 %v9837_v0 }
  0xd7   :  { %184 = vperm.xlu1 %6524, %v6697_v15  }
  0xd9   :  { %v115_v14 = vpop.permute.xlu1 %114  ;;  %v6940_v46 = vpop.permute.xlu0 %540 }
  0xda   :  { %v240_v54 = vmul.f32 %v6809_v36, %v115_v14 }
  0xdb   :  { %6525 = vset.pattern.permute.xlu1 %v6593_v4 }
  0xdc   :  { %v276_v57 = vadd.f32 %v6828_v43, %v240_v54  ;;  %388 = vperm.xlu1 %6525, %v6793_v31  }
  0xdd   :  { %v6947_v24 = vpop.permute.xlu0 %556 }
  0xde   :  { %v525_v58 = vpop.permute.xlu1 %524  ;;  %v472_v5 = vadd.f32 %v440_v48, %v276_v57 }
  0xe0   :  { %6526 = vset.pattern.permute.xlu1 %v9837_v0 }
  0xe1   :  { %189 = vperm.xlu1 %6526, %v6704_v16   ;;  %v6951_v10 = vpop.permute.xlu0 %560 }
  0xe3   :  { %v120_v11 = vpop.permute.xlu1 %119 }
  0xe4   :  { %v241_v28 = vmul.f32 %v6809_v36, %v120_v11 }
  0xe5   :  { %6527 = vset.pattern.permute.xlu1 %v9835_v8  ;;  %v6954_v59 = vpop.permute.xlu0 %576 }
  0xe6   :  { %584 = vperm.xlu1 %6527, %v6793_v31   ;;  %v277_v14 = vadd.f32 %v6828_v43, %v241_v28 }
  0xe8   :  { %v529_v18 = vpop.permute.xlu1 %528 }
  0xe9   :  { %v635_v19 = vmul.f32 %v6912_v12, %v529_v18  ;;  %v6958_v20 = vpop.permute.xlu0 %580 }
  0xea   :  { %6528 = vset.pattern.permute.xlu1 %v9837_v0 }
  0xeb   :  { %v6962_v29 = vadd.f32 %v635_v19, %v471_v41  ;;  %194 = vperm.xlu1 %6528, %v6756_v25  }
  0xed   :  { %v341_v33 = vpop.permute.xlu1 %340  ;;  %v6965_v23 = vpop.permute.xlu0 %596 }
  0xee   :  { %v441_v31 = vmul.f32 %v6833_v44, %v341_v33 }
  0xef   :  { %6530 = vset.pattern.permute.xlu1 %v9835_v8 }
  0xf0   :  { %v6970_v48 = vadd.f32 %v441_v31, %v277_v14  ;;  %588 = vperm.xlu1 %6530, %v6697_v15   ;;  %v444_v14 = vmul.f32 %v6833_v44, %v6877_v60 }
  0xf1   :  { %v6973_v54 = vpop.permute.xlu0 %600 }
  0xf2   :  { %v533_v57 = vpop.permute.xlu1 %532 }
  0xf3   :  { %v636_v41 = vmul.f32 %v6912_v12, %v533_v57 }
  0xf4   :  { %6531 = vset.pattern.permute.xlu1 %v6593_v4 }
  0xf5   :  { %v6977_v11 = vadd.f32 %v636_v41, %v472_v5  ;;  %400 = vperm.xlu1 %6531, %v6756_v25   ;;  %v438_v5 = vmul.f32 %v6833_v44, %v329_v39  ;;  %v634_v41 = vmul.f32 %v6912_v12, %v525_v58  ;;  %v445_v58 = vmul.f32 %v6833_v44, %v6884_v62 }
  0xf6   :  { %v6980_v18 = vpop.permute.xlu0 %99 }
  0xf7   :  { %v6982_v19 = vpop.permute.xlu1 %344 }
  0xf9   :  { %6532 = vset.pattern.permute.xlu1 %v9835_v8 }
  0xfa   :  { %592 = vperm.xlu1 %6532, %v6704_v16   ;;  %v105_v15 = vpop.permute.xlu0 %104 }
  0xfb   :  { %v238_v28 = vmul.f32 %v6809_v36, %v105_v15 }
  0xfc   :  { %v135_v33 = vpop.permute.xlu1 %134 }
  0xfd   :  { %v274_v31 = vadd.f32 %v6828_v43, %v238_v28  ;;  %v244_v25 = vmul.f32 %v6809_v36, %v135_v33 }
  0xfe   :  { %6533 = vset.pattern.permute.xlu1 %v6593_v4  ;;  %v6993_v57 = vpop.permute.xlu0 %124 }
  0xff   :  { %v470_v16 = vadd.f32 %v438_v5, %v274_v31  ;;  %v280_v8 = vadd.f32 %v6828_v43, %v244_v25  ;;  %404 = vperm.xlu1 %6533, %v6763_v26  }
 0x101   :  { %v6998_v15 = vadd.f32 %v634_v41, %v470_v16  ;;  %v349_v60 = vpop.permute.xlu1 %348  ;;  %v476_v0 = vadd.f32 %v444_v14, %v280_v8 }
 0x102   :  { %v130_v39 = vpop.permute.xlu0 %129  ;;  %v443_v8 = vmul.f32 %v6833_v44, %v349_v60  ;;  %v64_v60 = vld [vmem:[%s9830_s0 + $0xf0] sm:$0xff] }
 0x103   :  { %6534 = vset.pattern.permute.xlu1 %v9851_v32  ;;  %v243_v28 = vmul.f32 %v6809_v36, %v130_v39 }
 0x104   :  { %209 = vperm.xlu1 %6534, %v6856_v52  }
 0x105   :  { %v279_v31 = vadd.f32 %v6828_v43, %v243_v28  ;;  %v9852_v28 = vmov 2  }
 0x106   :  { %v140_v33 = vpop.permute.xlu1 %139 }
 0x107   :  { %v245_v5 = vmul.f32 %v6809_v36, %v140_v33  ;;  %v475_v41 = vadd.f32 %v443_v8, %v279_v31 }
 0x108   :  { %6535 = vset.pattern.permute.xlu1 %v6593_v4 }
 0x109   :  { %v281_v26 = vadd.f32 %v6828_v43, %v245_v5  ;;  %408 = vperm.xlu1 %6535, %v6825_v42  }
 0x10b   :  { %v545_v14 = vpop.permute.xlu1 %544  ;;  %v477_v25 = vadd.f32 %v445_v58, %v281_v26 }
 0x10c   :  { %v639_v16 = vmul.f32 %v6912_v12, %v545_v14 }
 0x10d   :  { %6537 = vset.pattern.permute.xlu1 %v9851_v32 }
 0x10e   :  { %v7013_v62 = vadd.f32 %v639_v16, %v475_v41  ;;  %214 = vperm.xlu1 %6537, %v6867_v55  }
 0x110   :  { %v145_v39 = vpop.permute.xlu1 %144 }
 0x111   :  { %v246_v5 = vmul.f32 %v6809_v36, %v145_v39 }
 0x112   :  { %6538 = vset.pattern.permute.xlu1 %v9852_v28 }
 0x113   :  { %604 = vperm.xlu1 %6538, %v6825_v42   ;;  %v282_v8 = vadd.f32 %v6828_v43, %v246_v5 }
 0x115   :  { %v549_v33 = vpop.permute.xlu1 %548 }
 0x116   :  { %v640_v58 = vmul.f32 %v6912_v12, %v549_v33  ;;  %v7040_v33 = vpop.permute.xlu0 %149 }
 0x117   :  { %6539 = vset.pattern.permute.xlu1 %v9851_v32 }
 0x118   :  { %v7024_v31 = vadd.f32 %v640_v58, %v476_v0  ;;  %219 = vperm.xlu1 %6539, %v64_v60  }
 0x11a   :  { %v361_v26 = vpop.permute.xlu1 %360 }
 0x11b   :  { %v446_v14 = vmul.f32 %v6833_v44, %v361_v26 }
 0x11c   :  { %6540 = vset.pattern.permute.xlu1 %v9852_v28 }
 0x11d   :  { %v7029_v42 = vadd.f32 %v446_v14, %v282_v8  ;;  %608 = vperm.xlu1 %6540, %v6856_v52   ;;  %v449_v52 = vmul.f32 %v6833_v44, %v6889_v1  ;;  %v450_v1 = vmul.f32 %v6833_v44, %v6894_v3  ;;  %v231_v3 = vmul.f32 %v6809_v36, %v6803_v35  ;;  %v953_v35 = vld [vmem:[#allocation2 + $0xa8] sm:$0xff] }
 0x11f   :  { %v553_v41 = vpop.permute.xlu1 %552 }
 0x120   :  { %v641_v16 = vmul.f32 %v6912_v12, %v553_v41 }
 0x121   :  { %6542 = vset.pattern.permute.xlu1 %v6593_v4 }
 0x122   :  { %v7034_v32 = vadd.f32 %v641_v16, %v477_v25  ;;  %420 = vperm.xlu1 %6542, %v64_v60   ;;  %v155_v25 = vpop.permute.xlu0 %154 }
 0x124   :  { %v7036_v0 = vpop.permute.xlu1 %364 }
 0x126   :  { %6543 = vset.pattern.permute.xlu1 %v9852_v28  ;;  %v248_v28 = vmul.f32 %v6809_v36, %v155_v25 }
 0x127   :  { %612 = vperm.xlu1 %6543, %v6867_v55  }
 0x128   :  { %v284_v14 = vadd.f32 %v6828_v43, %v248_v28  ;;  %v948_v28 = vld [vmem:[#allocation2 + $0x80] sm:$0xff] }
 0x129   :  { %v160_v39 = vpop.permute.xlu1 %159 }
 0x12a   :  { %v249_v58 = vmul.f32 %v6809_v36, %v160_v39 }
 0x12b   :  { %616 = vperm.xlu1 %6543, %v64_v60  }
 0x12c   :  { %v285_v4 = vadd.f32 %v6828_v43, %v249_v58 }
 0x12e   :  { %v369_v5 = vpop.permute.xlu1 %368  ;;  %v7046_v26 = vadd.f32 %v449_v52, %v285_v4 }
 0x12f   :  { %620 = vperm.xlu1 %6543, %v6841_v47   ;;  %v448_v60 = vmul.f32 %v6833_v44, %v369_v5 }
 0x131   :  { %v480_v58 = vadd.f32 %v448_v60, %v284_v14  ;;  %v951_v14 = vld [vmem:[#allocation2 + $0x98] sm:$0xff] }
 0x133   :  { %v165_v55 = vpop.permute.xlu1 %164 }
 0x134   :  { %v250_v8 = vmul.f32 %v6809_v36, %v165_v55  ;;  %v949_v55 = vld [vmem:[#allocation2 + $0x88] sm:$0xff] }
 0x135   :  { %v6173_v5 = vpack.c.bf16 %v949_v55, %v948_v28  ;;  %v233_v55 = vmul.f32 %v6809_v36, %v6801_v34 }
 0x136   :  { %v286_v41 = vadd.f32 %v6828_v43, %v250_v8  ;;  %v950_v8 = vld [vmem:[#allocation2 + $0x90] sm:$0xff] }
 0x137   :  { %6174 = vmatprep.subr.bf16.mxu0 %v6173_v5  ;;  %6461 = vmatprep.subr.bf16.mxu1 %v6173_v5  ;;  %v6177_v60 = vpack.c.bf16 %v951_v14, %v950_v8  ;;  %v954_v14 = vld [vmem:[#allocation2 + $0xb0] sm:$0xff] }
 0x138   :  { %v565_v16 = vpop.permute.xlu1 %564  ;;  %v7056_v39 = vadd.f32 %v450_v1, %v286_v41  ;;  %6176 = vmatpush3.bf16.msra.mxu0 %v6173_v5  ;;  %6469 = vmatpush3.bf16.msra.mxu1 %v6173_v5  ;;  %v267_v1 = vadd.f32 %v6828_v43, %v231_v3  ;;  %v431_v41 = vmul.f32 %v6833_v44, %v6819_v40 }
 0x139   :  { %v644_v47 = vmul.f32 %v6912_v12, %v565_v16  ;;  %6178 = vmatprep.subr.bf16.mxu0 %v6177_v60  ;;  %6462 = vmatprep.subr.bf16.mxu1 %v6177_v60  ;;  %v628_v5 = vmul.f32 %v6912_v12, %v6869_v56  ;;  %v433_v40 = vmul.f32 %v6833_v44, %v6858_v53 }
 0x13a   :  { %v463_v3 = vadd.f32 %v431_v41, %v267_v1  ;;  %v629_v1 = vmul.f32 %v6912_v12, %v6880_v61  ;;  %v956_v41 = vld [vmem:[#allocation2 + $0xc0] sm:$0xff]  ;;  %v630_v61 = vmul.f32 %v6912_v12, %v6892_v2 }
 0x13b   :  { %v7059_v52 = vadd.f32 %v644_v47, %v480_v58  ;;  %v952_v58 = vld [vmem:[#allocation2 + $0xa0] sm:$0xff]  ;;  %v627_v47 = vmul.f32 %v6912_v12, %v6921_v22  ;;  %v234_v22 = vmul.f32 %v6809_v36, %v6844_v49  ;;  %v660_v56 = vadd.f32 %v628_v5, %v6846_v50 }
 0x13c   :  { %6180 = vmatpush3.bf16.msra.mxu0 %v6177_v60  ;;  %6470 = vmatpush3.bf16.msra.mxu1 %v6177_v60  ;;  %v6181_v28 = vpack.c.bf16 %v953_v35, %v952_v58  ;;  %v955_v60 = vld [vmem:[#allocation2 + $0xb8] sm:$0xff]  ;;  %v269_v35 = vadd.f32 %v6828_v43, %v233_v55  ;;  %v434_v49 = vmul.f32 %v6833_v44, %v6851_v51 }
 0x13d   :  { %v7061_v4 = vpop.permute.xlu1 %169  ;;  %v659_v58 = vadd.f32 %v627_v47, %v463_v3  ;;  %v6185_v34 = vpack.c.bf16 %v955_v60, %v954_v14  ;;  %v270_v6 = vadd.f32 %v6828_v43, %v234_v22  ;;  %v692_v50 = vmul.f32 0.2, %v660_v56  ;;  %v958_v14 = vld [vmem:[#allocation2 + $0xd0] sm:$0xff]  ;;  %v959_v60 = vld [vmem:[#allocation2 + $0xd8] sm:$0xff] }
 0x13e   :  { %6182 = vmatprep.subr.bf16.mxu0 %v6181_v28  ;;  %6463 = vmatprep.subr.bf16.mxu1 %v6181_v28  ;;  %v465_v53 = vadd.f32 %v433_v40, %v269_v35  ;;  %v237_v40 = vmul.f32 %v6809_v36, %v6980_v18 }
 0x13f   :  { %v691_v47 = vmul.f32 0.2, %v659_v58  ;;  %v466_v22 = vadd.f32 %v434_v49, %v270_v6  ;;  %v7101_v35 = vmax.f32 %v660_v56, %v692_v50  ;;  %v961_v6 = vld [vmem:[#allocation2 + $0xe8] sm:$0xff] }
 0x140   :  { %6184 = vmatpush3.bf16.msra.mxu0 %v6181_v28  ;;  %6471 = vmatpush3.bf16.msra.mxu1 %v6181_v28  ;;  %v957_v28 = vld [vmem:[#allocation2 + $0xc8] sm:$0xff]  ;;  %v661_v5 = vadd.f32 %v629_v1, %v465_v53  ;;  %v236_v1 = vmul.f32 %v6809_v36, %v6886_v63  ;;  %v273_v18 = vadd.f32 %v6828_v43, %v237_v40 }
 0x141   :  { %6186 = vmatprep.subr.bf16.mxu0 %v6185_v34  ;;  %6464 = vmatprep.subr.bf16.mxu1 %v6185_v34  ;;  %v6189_v55 = vpack.c.bf16 %v957_v28, %v956_v41  ;;  %v7099_v51 = vmax.f32 %v659_v58, %v691_v47  ;;  %v662_v53 = vadd.f32 %v630_v61, %v466_v22  ;;  %v960_v28 = vld [vmem:[#allocation2 + $0xe0] sm:$0xff]  ;;  %v963_v22 = vld [vmem:[#allocation2 + $0xf8] sm:$0xff] }
 0x142   :  { %v7063_v25 = vpop.permute.xlu1 %568  ;;  %v693_v41 = vmul.f32 0.2, %v661_v5  ;;  %v436_v58 = vmul.f32 %v6833_v44, %v6902_v7  ;;  %v437_v63 = vmul.f32 %v6833_v44, %v6923_v27  ;;  %v6197_v49 = vpack.c.bf16 %v961_v6, %v960_v28  ;;  %v962_v27 = vld [vmem:[#allocation2 + $0xf0] sm:$0xff] }
 0x143   :  { %v794_v56 = vmul.f32 %v7099_v51, %v7099_v51  ;;  %v795_v47 = vmul.f32 %v7101_v35, %v7101_v35  ;;  %v272_v50 = vadd.f32 %v6828_v43, %v236_v1  ;;  %v694_v61 = vmul.f32 0.2, %v662_v53 }
 0x144   :  { %6188 = vmatpush3.bf16.msra.mxu0 %v6185_v34  ;;  %6472 = vmatpush3.bf16.msra.mxu1 %v6185_v34  ;;  %v6193_v34 = vpack.c.bf16 %v959_v60, %v958_v14  ;;  %v632_v40 = vmul.f32 %v6912_v12, %v6927_v13  ;;  %v633_v7 = vmul.f32 %v6912_v12, %v6932_v37  ;;  %v695_v37 = vmul.f32 0.2, %v6918_v21 }
 0x145   :  { %6190 = vmatprep.subr.bf16.mxu0 %v6189_v55  ;;  %6465 = vmatprep.subr.bf16.mxu1 %v6189_v55  ;;  %v469_v14 = vadd.f32 %v437_v63, %v273_v18  ;;  %v6201_v1 = vpack.c.bf16 %v963_v22, %v962_v27  ;;  %v7129_v28 = vmax.f32 %v662_v53, %v694_v61 }
 0x147   :  { %v7065_v30 = vpop.permute.xlu1 %380  ;;  %v665_v6 = vadd.f32 %v633_v7, %v469_v14  ;;  %v698_v7 = vmul.f32 0.2, %v6998_v15 }
 0x148   :  { %6192 = vmatpush3.bf16.msra.mxu0 %v6189_v55  ;;  %6473 = vmatpush3.bf16.msra.mxu1 %v6189_v55  ;;  %v7116_v55 = vmax.f32 %v661_v5, %v693_v41  ;;  %v468_v5 = vadd.f32 %v436_v58, %v272_v50  ;;  %v826_v41 = vadd.f32 %v795_v47, %v794_v56 }
 0x149   :  { %6194 = vmatprep.subr.bf16.mxu0 %v6193_v34  ;;  %6466 = vmatprep.subr.bf16.mxu1 %v6193_v34  ;;  %v797_v56 = vmul.f32 %v7129_v28, %v7129_v28  ;;  %v7138_v47 = vmax.f32 %v6918_v21, %v695_v37  ;;  %v697_v50 = vmul.f32 0.2, %v665_v6  ;;  %v242_v21 = vmul.f32 %v6809_v36, %v6993_v57 }
 0x14a   :  { %v796_v13 = vmul.f32 %v7116_v55, %v7116_v55  ;;  %v664_v18 = vadd.f32 %v632_v40, %v468_v5  ;;  %v699_v37 = vmul.f32 0.2, %v6962_v29 }
 0x14b   :  { %v798_v27 = vmul.f32 %v7138_v47, %v7138_v47  ;;  %v7148_v5 = vmax.f32 %v665_v6, %v697_v50  ;;  %v278_v57 = vadd.f32 %v6828_v43, %v242_v21 }
 0x14c   :  { %v7072_v16 = vpop.permute.xlu1 %572  ;;  %6196 = vmatpush3.bf16.msra.mxu0 %v6193_v34  ;;  %6474 = vmatpush3.bf16.msra.mxu1 %v6193_v34  ;;  %v755_v34 = vadd.f32 %v7101_v35, %v7099_v51  ;;  %v696_v53 = vmul.f32 0.2, %v664_v18  ;;  %v7174_v50 = vmax.f32 %v6962_v29, %v699_v37 }
 0x14d   :  { %6198 = vmatprep.subr.bf16.mxu0 %v6197_v49  ;;  %6467 = vmatprep.subr.bf16.mxu1 %v6197_v49  ;;  %v800_v6 = vmul.f32 %v7148_v5, %v7148_v5 }
 0x14e   :  { %v756_v58 = vadd.f32 %v755_v34, %v7116_v55  ;;  %v7146_v22 = vmax.f32 %v664_v18, %v696_v53  ;;  %v638_v53 = vmul.f32 %v6912_v12, %v6940_v46  ;;  %v802_v46 = vmul.f32 %v7174_v50, %v7174_v50 }
 0x150   :  { %6200 = vmatpush3.bf16.msra.mxu0 %v6197_v49  ;;  %6475 = vmatpush3.bf16.msra.mxu1 %v6197_v49  ;;  %v827_v49 = vadd.f32 %v826_v41, %v796_v13  ;;  %v757_v61 = vadd.f32 %v756_v58, %v7129_v28  ;;  %v637_v13 = vmul.f32 %v6912_v12, %v6936_v45 }
 0x151   :  { %v7082_v8 = vpop.permute.xlu1 %384  ;;  %6202 = vmatprep.subr.bf16.mxu0 %v6201_v1  ;;  %6468 = vmatprep.subr.bf16.mxu1 %v6201_v1  ;;  %v799_v18 = vmul.f32 %v7146_v22, %v7146_v22 }
 0x152   :  { %v828_v40 = vadd.f32 %v827_v49, %v797_v56  ;;  %v758_v34 = vadd.f32 %v757_v61, %v7138_v47  ;;  %v669_v61 = vadd.f32 %v637_v13, %v6970_v48 }
 0x154   :  { %6204 = vmatpush3.bf16.msra.mxu0 %v6201_v1  ;;  %6476 = vmatpush3.bf16.msra.mxu1 %v6201_v1  ;;  %v829_v41 = vadd.f32 %v828_v40, %v798_v27  ;;  %v7154_v1 = vmax.f32 %v6998_v15, %v698_v7  ;;  %v759_v49 = vadd.f32 %v758_v34, %v7146_v22  ;;  %v700_v40 = vmul.f32 0.2, %v6977_v11 }
 0x155   :  { %v442_v15 = vmul.f32 %v6833_v44, %v6982_v19  ;;  %v701_v29 = vmul.f32 0.2, %v669_v61 }
 0x156   :  { %v7093_v3 = vpop.permute.xlu1 %184  ;;  %v830_v56 = vadd.f32 %v829_v41, %v799_v18  ;;  %v801_v45 = vmul.f32 %v7154_v1, %v7154_v1  ;;  %v760_v7 = vadd.f32 %v759_v49, %v7148_v5  ;;  %v247_v18 = vmul.f32 %v6809_v36, %v7040_v33 }
 0x157   :  { %v474_v21 = vadd.f32 %v442_v15, %v278_v57  ;;  %v7187_v48 = vmax.f32 %v6977_v11, %v700_v40  ;;  %v7195_v15 = vmax.f32 %v669_v61, %v701_v29  ;;  %v703_v11 = vmul.f32 0.2, %v7013_v62 }
 0x158   :  { %v831_v27 = vadd.f32 %v830_v56, %v800_v6  ;;  %v761_v19 = vadd.f32 %v760_v7, %v7154_v1  ;;  %v283_v49 = vadd.f32 %v6828_v43, %v247_v18  ;;  %v447_v56 = vmul.f32 %v6833_v44, %v7036_v0 }
 0x159   :  { %v670_v13 = vadd.f32 %v638_v53, %v474_v21  ;;  %v803_v33 = vmul.f32 %v7187_v48, %v7187_v48  ;;  %v642_v53 = vmul.f32 %v6912_v12, %v6947_v24  ;;  %v643_v0 = vmul.f32 %v6912_v12, %v6951_v10 }
 0x15a   :  { %v832_v41 = vadd.f32 %v831_v27, %v801_v45  ;;  %v762_v6 = vadd.f32 %v761_v19, %v7174_v50  ;;  %v704_v27 = vmul.f32 0.2, %v7024_v31  ;;  %v479_v61 = vadd.f32 %v447_v56, %v283_v49 }
 0x15b   :  { %v7105_v2 = vpop.permute.xlu1 %388  ;;  %v702_v45 = vmul.f32 0.2, %v670_v13  ;;  %v804_v19 = vmul.f32 %v7195_v15, %v7195_v15  ;;  %v7213_v18 = vmax.f32 %v7013_v62, %v703_v11  ;;  %v705_v24 = vmul.f32 0.2, %v7034_v32 }
 0x15c   :  { %v833_v57 = vadd.f32 %v832_v41, %v802_v46  ;;  %v763_v40 = vadd.f32 %v762_v6, %v7187_v48  ;;  %v175_v46 = vpop.permute.xlu0 %174  ;;  %v674_v10 = vadd.f32 %v642_v53, %v7029_v42  ;;  %v675_v49 = vadd.f32 %v643_v0, %v479_v61 }
 0x15d   :  { %v7210_v41 = vmax.f32 %v670_v13, %v702_v45  ;;  %9854 = vst [vmem:[#allocation9_spill] sm:$0xff] %v7213_v18  ;;  %v645_v56 = vmul.f32 %v6912_v12, %v7063_v25  ;;  %v252_v45 = vmul.f32 %v6809_v36, %v175_v46  ;;  %v7231_v11 = vmax.f32 %v7034_v32, %v705_v24 }
 0x15e   :  { %v834_v7 = vadd.f32 %v833_v57, %v803_v33  ;;  %v764_v29 = vadd.f32 %v763_v40, %v7195_v15  ;;  %v7218_v57 = vmax.f32 %v7024_v31, %v704_v27  ;;  %v806_v33 = vmul.f32 %v7213_v18, %v7213_v18 }
 0x15f   :  { %9853 = vst [vmem:[#allocation8_spill] sm:$0xff] %v7210_v41  ;;  %v805_v62 = vmul.f32 %v7210_v41, %v7210_v41  ;;  %v706_v40 = vmul.f32 0.2, %v674_v10  ;;  %v251_v27 = vmul.f32 %v6809_v36, %v7061_v4  ;;  %v677_v0 = vadd.f32 %v645_v56, %v7046_v26 }
 0x160   :  { %v7123_v60 = vpop.permute.xlu1 %189  ;;  %v835_v6 = vadd.f32 %v834_v7, %v804_v19  ;;  %v180_v31 = vpop.permute.xlu0 %179  ;;  %v765_v42 = vadd.f32 %v764_v29, %v7210_v41  ;;  %v807_v25 = vmul.f32 %v7218_v57, %v7218_v57  ;;  %v707_v7 = vmul.f32 0.2, %v675_v49 }
 0x161   :  { %v646_v61 = vmul.f32 %v6912_v12, %v7072_v16  ;;  %v288_v24 = vadd.f32 %v6828_v43, %v252_v45  ;;  %v808_v29 = vmul.f32 %v7231_v11, %v7231_v11  ;;  %v451_v4 = vmul.f32 %v6833_v44, %v7065_v30 }
 0x162   :  { %v836_v53 = vadd.f32 %v835_v6, %v805_v62  ;;  %v766_v32 = vadd.f32 %v765_v42, %v7213_v18  ;;  %v708_v6 = vmul.f32 0.2, %v7059_v52  ;;  %v452_v26 = vmul.f32 %v6833_v44, %v7082_v8 }
 0x163   :  { %v253_v45 = vmul.f32 %v6809_v36, %v180_v31  ;;  %v7256_v42 = vmax.f32 %v675_v49, %v707_v7  ;;  %v709_v18 = vmul.f32 0.2, %v677_v0  ;;  %v678_v41 = vadd.f32 %v646_v61, %v7056_v39 }
 0x164   :  { %v837_v19 = vadd.f32 %v836_v53, %v806_v33  ;;  %v200_v56 = vpop.permute.xlu0 %199  ;;  %v767_v16 = vadd.f32 %v766_v32, %v7218_v57  ;;  %v7253_v33 = vmax.f32 %v674_v10, %v706_v40  ;;  %v287_v53 = vadd.f32 %v6828_v43, %v251_v27 }
 0x165   :  { %v7132_v63 = vpop.permute.xlu1 %584  ;;  %v454_v30 = vmul.f32 %v6833_v44, %v6904_v9  ;;  %v647_v8 = vmul.f32 %v6912_v12, %v6954_v59  ;;  %v254_v10 = vmul.f32 %v6809_v36, %v7093_v3  ;;  %v7268_v49 = vmax.f32 %v7059_v52, %v708_v6 }
 0x166   :  { %v838_v62 = vadd.f32 %v837_v19, %v807_v25  ;;  %v768_v32 = vadd.f32 %v767_v16, %v7231_v11  ;;  %v483_v31 = vadd.f32 %v451_v4, %v287_v53  ;;  %v484_v40 = vadd.f32 %v452_v26, %v288_v24 }
 0x167   :  { %v648_v39 = vmul.f32 %v6912_v12, %v6958_v20  ;;  %v289_v9 = vadd.f32 %v6828_v43, %v253_v45  ;;  %v453_v59 = vmul.f32 %v6833_v44, %v7105_v2  ;;  %v255_v27 = vmul.f32 %v6809_v36, %v7123_v60 }
 0x168   :  { %v839_v25 = vadd.f32 %v838_v62, %v808_v29  ;;  %v809_v3 = vmul.f32 %v7253_v33, %v7253_v33  ;;  %v810_v52 = vmul.f32 %v7256_v42, %v7256_v42  ;;  %v7283_v61 = vmax.f32 %v677_v0, %v709_v18  ;;  %v205_v24 = vpop.permute.xlu0 %204 }
 0x169   :  { %v710_v19 = vmul.f32 0.2, %v678_v41  ;;  %v455_v20 = vmul.f32 %v6833_v44, %v6914_v17  ;;  %v769_v29 = vadd.f32 %v768_v32, %v7253_v33  ;;  %v290_v2 = vadd.f32 %v6828_v43, %v254_v10 }
 0x16a   :  { %v7142_v14 = vpop.permute.xlu1 %194  ;;  %v649_v60 = vmul.f32 %v6912_v12, %v7132_v63  ;;  %v840_v6 = vadd.f32 %v839_v25, %v809_v3  ;;  %v811_v4 = vmul.f32 %v7268_v49, %v7268_v49  ;;  %v679_v26 = vadd.f32 %v647_v8, %v483_v31 }
 0x16b   :  { %v680_v16 = vadd.f32 %v648_v39, %v484_v40  ;;  %v485_v18 = vadd.f32 %v453_v59, %v289_v9  ;;  %v291_v0 = vadd.f32 %v6828_v43, %v255_v27  ;;  %v257_v62 = vmul.f32 %v6809_v36, %v200_v56 }
 0x16c   :  { %v770_v53 = vadd.f32 %v769_v29, %v7256_v42  ;;  %v841_v32 = vadd.f32 %v840_v6, %v810_v52  ;;  %v812_v63 = vmul.f32 %v7283_v61, %v7283_v61  ;;  %v7300_v10 = vmax.f32 %v678_v41, %v710_v19  ;;  %v225_v59 = vpop.permute.xlu0 %224 }
 0x16d   :  { %v681_v25 = vadd.f32 %v649_v60, %v485_v18  ;;  %v256_v8 = vmul.f32 %v6809_v36, %v7142_v14  ;;  %v486_v31 = vadd.f32 %v454_v30, %v290_v2  ;;  %v711_v39 = vmul.f32 0.2, %v679_v26 }
 0x16e   :  { %v771_v40 = vadd.f32 %v770_v53, %v7268_v49  ;;  %v712_v9 = vmul.f32 0.2, %v680_v16  ;;  %v487_v41 = vadd.f32 %v455_v20, %v291_v0  ;;  %v813_v30 = vmul.f32 %v7300_v10, %v7300_v10 }
 0x16f   :  { %v7159_v58 = vpop.permute.xlu1 %588  ;;  %v258_v19 = vmul.f32 %v6809_v36, %v205_v24  ;;  %v713_v60 = vmul.f32 0.2, %v681_v25  ;;  %v292_v6 = vadd.f32 %v6828_v43, %v256_v8  ;;  %v652_v53 = vmul.f32 %v6912_v12, %v6965_v23 }
 0x170   :  { %v650_v17 = vmul.f32 %v6912_v12, %v7159_v58  ;;  %v842_v58 = vadd.f32 %v841_v32, %v811_v4  ;;  %v772_v14 = vadd.f32 %v771_v40, %v7283_v61 }
 0x171   :  { %v7331_v8 = vmax.f32 %v681_v25, %v713_v60 }
 0x172   :  { %v682_v27 = vadd.f32 %v650_v17, %v486_v31  ;;  %v843_v2 = vadd.f32 %v842_v58, %v812_v63  ;;  %v773_v20 = vadd.f32 %v772_v14, %v7300_v10  ;;  %v294_v63 = vadd.f32 %v6828_v43, %v258_v19 }
 0x174   :  { %v7179_v34 = vpop.permute.xlu1 %400  ;;  %v714_v0 = vmul.f32 0.2, %v682_v27  ;;  %v844_v32 = vadd.f32 %v843_v2, %v813_v30  ;;  %v816_v30 = vmul.f32 %v7331_v8, %v7331_v8 }
 0x175   :  { %v456_v3 = vmul.f32 %v6833_v44, %v7179_v34  ;;  %v7317_v34 = vmax.f32 %v679_v26, %v711_v39  ;;  %v653_v26 = vmul.f32 %v6912_v12, %v6973_v54 }
 0x176   :  { %v7341_v39 = vmax.f32 %v682_v27, %v714_v0 }
 0x177   :  { %v488_v17 = vadd.f32 %v456_v3, %v292_v6  ;;  %v774_v23 = vadd.f32 %v773_v20, %v7317_v34 }
 0x179   :  { %v7189_v37 = vpop.permute.xlu1 %592  ;;  %v684_v25 = vadd.f32 %v652_v53, %v488_v17 }
 0x17a   :  { %v651_v56 = vmul.f32 %v6912_v12, %v7189_v37  ;;  %v293_v37 = vadd.f32 %v6828_v43, %v257_v62 }
 0x17c   :  { %v683_v4 = vadd.f32 %v651_v56, %v487_v41 }
 0x17e   :  { %v7204_v21 = vpop.permute.xlu1 %404  ;;  %v715_v31 = vmul.f32 0.2, %v683_v4 }
 0x17f   :  { %v457_v52 = vmul.f32 %v6833_v44, %v7204_v21  ;;  %v7320_v21 = vmax.f32 %v680_v16, %v712_v9  ;;  %v413_v16 = vpop.permute.xlu0 %412 }
 0x181   :  { %v489_v62 = vadd.f32 %v457_v52, %v293_v37  ;;  %v815_v54 = vmul.f32 %v7320_v21, %v7320_v21  ;;  %v775_v14 = vadd.f32 %v774_v23, %v7320_v21  ;;  %v7349_v37 = vmax.f32 %v683_v4, %v715_v31 }
 0x183   :  { %v7223_v13 = vpop.permute.xlu1 %209  ;;  %v685_v9 = vadd.f32 %v653_v26, %v489_v62  ;;  %v417_v27 = vpop.permute.xlu0 %416  ;;  %v776_v20 = vadd.f32 %v775_v14, %v7331_v8  ;;  %v818_v26 = vmul.f32 %v7349_v37, %v7349_v37 }
 0x184   :  { %v259_v18 = vmul.f32 %v6809_v36, %v7223_v13  ;;  %v459_v13 = vmul.f32 %v6833_v44, %v413_v16  ;;  %v460_v17 = vmul.f32 %v6833_v44, %v417_v27 }
 0x185   :  { %v717_v0 = vmul.f32 0.2, %v685_v9  ;;  %v777_v4 = vadd.f32 %v776_v20, %v7341_v39 }
 0x186   :  { %v295_v58 = vadd.f32 %v6828_v43, %v259_v18  ;;  %v817_v18 = vmul.f32 %v7341_v39, %v7341_v39 }
 0x187   :  { %v425_v23 = vpop.permute.xlu0 %424 }
 0x188   :  { %v7243_v46 = vpop.permute.xlu1 %408  ;;  %v491_v60 = vadd.f32 %v459_v13, %v295_v58 }
 0x189   :  { %v458_v24 = vmul.f32 %v6833_v44, %v7243_v46  ;;  %v814_v46 = vmul.f32 %v7317_v34, %v7317_v34 }
 0x18b   :  { %v490_v3 = vadd.f32 %v458_v24, %v294_v63  ;;  %v845_v41 = vadd.f32 %v844_v32, %v814_v46  ;;  %v262_v63 = vmul.f32 %v6809_v36, %v225_v59 }
 0x18d   :  { %v7270_v7 = vpop.permute.xlu1 %214  ;;  %v846_v2 = vadd.f32 %v845_v41, %v815_v54 }
 0x18f   :  { %v847_v53 = vadd.f32 %v846_v2, %v816_v30 }
 0x191   :  { %v848_v13 = vadd.f32 %v847_v53, %v817_v18 }
 0x192   :  { %v605_v45 = vpop.permute.xlu1 %604 }
 0x193   :  { %v654_v56 = vmul.f32 %v6912_v12, %v605_v45  ;;  %v260_v45 = vmul.f32 %v6809_v36, %v7270_v7  ;;  %v716_v7 = vmul.f32 0.2, %v684_v25 }
 0x195   :  { %v686_v19 = vadd.f32 %v654_v56, %v490_v3  ;;  %v296_v62 = vadd.f32 %v6828_v43, %v260_v45  ;;  %v7361_v31 = vmax.f32 %v684_v25, %v716_v7  ;;  %v778_v56 = vadd.f32 %v777_v4, %v7349_v37 }
 0x196   :  { %v849_v45 = vadd.f32 %v848_v13, %v818_v26 }
 0x197   :  { %v220_v29 = vpop.permute.xlu1 %219  ;;  %v718_v32 = vmul.f32 0.2, %v686_v19  ;;  %v492_v3 = vadd.f32 %v460_v17, %v296_v62  ;;  %v819_v25 = vmul.f32 %v7361_v31, %v7361_v31  ;;  %v779_v14 = vadd.f32 %v778_v56, %v7361_v31 }
 0x198   :  { %v261_v16 = vmul.f32 %v6809_v36, %v220_v29  ;;  %v298_v36 = vadd.f32 %v6828_v43, %v262_v63 }
 0x199   :  { %v850_v20 = vadd.f32 %v849_v45, %v819_v25 }
 0x19a   :  { %v297_v59 = vadd.f32 %v6828_v43, %v261_v16 }
 0x19c   :  { %v609_v40 = vpop.permute.xlu1 %608 }
 0x19d   :  { %v655_v52 = vmul.f32 %v6912_v12, %v609_v40  ;;  %v7364_v40 = vmax.f32 %v685_v9, %v717_v0  ;;  %v462_v9 = vmul.f32 %v6833_v44, %v425_v23 }
 0x19f   :  { %v687_v24 = vadd.f32 %v655_v52, %v491_v60  ;;  %v7368_v52 = vmax.f32 %v686_v19, %v718_v32  ;;  %v820_v30 = vmul.f32 %v7364_v40, %v7364_v40  ;;  %v780_v18 = vadd.f32 %v779_v14, %v7364_v40 }
 0x1a0   :  { %v494_v0 = vadd.f32 %v462_v9, %v298_v36 }
 0x1a1   :  { %v421_v6 = vpop.permute.xlu1 %420  ;;  %v719_v54 = vmul.f32 0.2, %v687_v24  ;;  %v821_v43 = vmul.f32 %v7368_v52, %v7368_v52  ;;  %v851_v17 = vadd.f32 %v850_v20, %v820_v30  ;;  %v781_v53 = vadd.f32 %v780_v18, %v7368_v52 }
 0x1a2   :  { %v461_v58 = vmul.f32 %v6833_v44, %v421_v6 }
 0x1a3   :  { %v7378_v27 = vmax.f32 %v687_v24, %v719_v54  ;;  %v852_v32 = vadd.f32 %v851_v17, %v821_v43 }
 0x1a4   :  { %v493_v19 = vadd.f32 %v461_v58, %v297_v59 }
 0x1a5   :  { %v822_v24 = vmul.f32 %v7378_v27, %v7378_v27  ;;  %v782_v63 = vadd.f32 %v781_v53, %v7378_v27 }
 0x1a6   :  { %v613_v46 = vpop.permute.xlu1 %612 }
 0x1a7   :  { %v656_v41 = vmul.f32 %v6912_v12, %v613_v46  ;;  %v853_v46 = vadd.f32 %v852_v32, %v822_v24  ;;  %v7407_v32 = vld [vmem:[%s9832_s2] sm:$0xff] }
 0x1a9   :  { %v688_v29 = vadd.f32 %v656_v41, %v492_v3 }
 0x1aa   :  { %v617_v2 = vpop.permute.xlu1 %616 }
 0x1ab   :  { %v720_v60 = vmul.f32 0.2, %v688_v29  ;;  %v657_v6 = vmul.f32 %v6912_v12, %v617_v2 }
 0x1ad   :  { %v7384_v7 = vmax.f32 %v688_v29, %v720_v60  ;;  %v689_v44 = vadd.f32 %v657_v6, %v493_v19 }
 0x1ae   :  { %v621_v62 = vpop.permute.xlu1 %620 }
 0x1af   :  { %v721_v4 = vmul.f32 0.2, %v689_v44  ;;  %v658_v26 = vmul.f32 %v6912_v12, %v621_v62  ;;  %v823_v16 = vmul.f32 %v7384_v7, %v7384_v7  ;;  %v783_v23 = vadd.f32 %v782_v63, %v7384_v7 }
 0x1b1   :  { %v7393_v13 = vmax.f32 %v689_v44, %v721_v4  ;;  %v690_v56 = vadd.f32 %v658_v26, %v494_v0  ;;  %v854_v3 = vadd.f32 %v853_v46, %v823_v16 }
 0x1b3   :  { %v824_v54 = vmul.f32 %v7393_v13, %v7393_v13  ;;  %v722_v58 = vmul.f32 0.2, %v690_v56  ;;  %v784_v41 = vadd.f32 %v783_v23, %v7393_v13 }
 0x1b5   :  { %v7399_v12 = vmax.f32 %v690_v56, %v722_v58  ;;  %v855_v45 = vadd.f32 %v854_v3, %v824_v54  ;;  %v9855_v58 = vld [vmem:[#allocation7_spill] sm:$0xff] }
 0x1b7   :  { %v785_v36 = vadd.f32 %v784_v41, %v7399_v12  ;;  %v825_v59 = vmul.f32 %v7399_v12, %v7399_v12 }
 0x1b9   :  { %v786_v29 = vrot.slane %v785_v36, 4  ;;  %v856_v25 = vadd.f32 %v855_v45, %v825_v59 }
 0x1bb   :  { %v787_v9 = vadd.f32 %v786_v29, %v785_v36  ;;  %v857_v14 = vrot.slane %v856_v25, 4 }
 0x1bd   :  { %v788_v30 = vrot.slane %v787_v9, 2  ;;  %v858_v2 = vadd.f32 %v857_v14, %v856_v25 }
 0x1bf   :  { %v789_v19 = vadd.f32 %v788_v30, %v787_v9  ;;  %v859_v60 = vrot.slane %v858_v2, 2 }
 0x1c1   :  { %v790_v6 = vrot.slane %v789_v19, 1  ;;  %v860_v20 = vadd.f32 %v859_v60, %v858_v2 }
 0x1c3   :  { %v791_v43 = vadd.f32 %v790_v6, %v789_v19  ;;  %v861_v18 = vrot.slane %v860_v20, 1 }
 0x1c5   :  { %v793_v44 = vmul.f32 0.00390625, %v791_v43  ;;  %v862_v0 = vadd.f32 %v861_v18, %v860_v20 }
 0x1c7   :  { %v863_v17 = vmul.f32 0.00390625, %v862_v0  ;;  %v864_v62 = vmul.f32 %v793_v44, %v793_v44 }
 0x1c9   :  { %v865_v53 = vsub.f32 %v863_v17, %v864_v62 }
 0x1cb   :  { %v866_v24 = vmax.f32 %v865_v53, 0.0 }
 0x1cd   :  { %v867_v4 = vadd.f32 1e-05, %v866_v24 }
 0x1cf   :  { %6545 = vrsqrt.f32 %v867_v4 }
 0x1d9   :  { %v6546_v26 = vpop.eup %6545 }
 0x1da   :  { %v869_v63 = vmul.f32 %v7407_v32, %v6546_v26 }
 0x1dc   :  { %v870_v16 = vmul.f32 %v869_v63, %v793_v44  ;;  %v7411_v56 = vrot.slane %v869_v63, %v6816_v38 }
 0x1de   :  { %v872_v46 = vrot.slane %v870_v16, 7  ;;  %v879_v54 = vmul.f32 %v7411_v56, %v7099_v51  ;;  %v895_v41 = vmul.f32 %v7411_v56, %v7256_v42  ;;  %v880_v45 = vmul.f32 %v7411_v56, %v7101_v35 }
 0x1df   :  { %v896_v36 = vmul.f32 %v7411_v56, %v7268_v49  ;;  %v881_v59 = vmul.f32 %v7411_v56, %v7116_v55  ;;  %v897_v29 = vmul.f32 %v7411_v56, %v7283_v61  ;;  %v882_v55 = vmul.f32 %v7411_v56, %v7129_v28 }
 0x1e0   :  { %v874_v23 = vsub.f32 %v7407_v32, %v872_v46  ;;  %v898_v61 = vmul.f32 %v7411_v56, %v7300_v10  ;;  %v883_v14 = vmul.f32 %v7411_v56, %v7138_v47  ;;  %v899_v30 = vmul.f32 %v7411_v56, %v7317_v34 }
 0x1e1   :  { %v884_v28 = vmul.f32 %v7411_v56, %v7146_v22  ;;  %v900_v10 = vmul.f32 %v7411_v56, %v7320_v21  ;;  %v885_v47 = vmul.f32 %v7411_v56, %v7148_v5  ;;  %v901_v34 = vmul.f32 %v7411_v56, %v7331_v8 }
 0x1e2   :  { %v7417_v3 = vrot.slane %v874_v23, %v9855_v58  ;;  %v886_v22 = vmul.f32 %v7411_v56, %v7154_v1  ;;  %v902_v21 = vmul.f32 %v7411_v56, %v7341_v39  ;;  %v887_v5 = vmul.f32 %v7411_v56, %v7174_v50 }
 0x1e3   :  { %v903_v8 = vmul.f32 %v7411_v56, %v7349_v37  ;;  %v888_v1 = vmul.f32 %v7411_v56, %v7187_v48  ;;  %v904_v39 = vmul.f32 %v7411_v56, %v7361_v31  ;;  %v889_v50 = vmul.f32 %v7411_v56, %v7195_v15  ;;  %v9856_v48 = vld [vmem:[#allocation8_spill] sm:$0xff]  ;;  %v9857_v15 = vld [vmem:[#allocation9_spill] sm:$0xff] }
 0x1e4   :  { %v915_v51 = vadd.f32 %v7417_v3, %v879_v54  ;;  %v931_v25 = vadd.f32 %v7417_v3, %v895_v41  ;;  %v916_v9 = vadd.f32 %v7417_v3, %v880_v45  ;;  %v932_v42 = vadd.f32 %v7417_v3, %v896_v36 }
 0x1e5   :  { %v917_v35 = vadd.f32 %v7417_v3, %v881_v59  ;;  %v933_v49 = vadd.f32 %v7417_v3, %v897_v29  ;;  %v918_v2 = vadd.f32 %v7417_v3, %v882_v55  ;;  %v934_v19 = vadd.f32 %v7417_v3, %v898_v61  ;;  %v1451_v55 = vld [vmem:[#allocation2 + $0x110] sm:$0xff]  ;;  %v1452_v61 = vld [vmem:[#allocation2 + $0x118] sm:$0xff] }
 0x1e6   :  { %5485 = vmatprep.mubr.f32.mxu0 %v915_v51  ;;  %5509 = vmatprep.mubr.f32.mxu1 %v931_v25  ;;  %v919_v60 = vadd.f32 %v7417_v3, %v883_v14  ;;  %v935_v6 = vadd.f32 %v7417_v3, %v899_v30  ;;  %v920_v20 = vadd.f32 %v7417_v3, %v884_v28  ;;  %v1455_v30 = vld [vmem:[#allocation2 + $0x130] sm:$0xff] }
 0x1e7   :  { %5486 = vmatmul.mubr.f32.vlgmr.msra.gmra.mrb[0].mxu0 %v916_v9  ;;  %5510 = vmatmul.mubr.f32.vlgmr.msra.gmra.mrb[0].mxu1 %v932_v42  ;;  %v936_v43 = vadd.f32 %v7417_v3, %v900_v10  ;;  %v921_v18 = vadd.f32 %v7417_v3, %v885_v47  ;;  %v937_v44 = vadd.f32 %v7417_v3, %v901_v34  ;;  %v1449_v42 = vld [vmem:[#allocation2 + $0x100] sm:$0xff]  ;;  %v1459_v28 = vld [vmem:[#allocation2 + $0x150] sm:$0xff]  ;;  %v1460_v10 = vld [vmem:[#allocation2 + $0x158] sm:$0xff] }
 0x1e8   :  { %5488 = vmatprep.mubr.f32.mxu0 %v917_v35  ;;  %5512 = vmatprep.mubr.f32.mxu1 %v933_v49  ;;  %v922_v0 = vadd.f32 %v7417_v3, %v886_v22  ;;  %v938_v17 = vadd.f32 %v7417_v3, %v902_v21  ;;  %v923_v62 = vadd.f32 %v7417_v3, %v887_v5  ;;  %v1450_v35 = vld [vmem:[#allocation2 + $0x108] sm:$0xff]  ;;  %v9858_v34 = vld [vmem:[#allocation5_spill] sm:$0xff]  ;;  %v1464_v21 = vld [vmem:[#allocation2 + $0x178] sm:$0xff] }
 0x1e9   :  { %v939_v53 = vadd.f32 %v7417_v3, %v903_v8  ;;  %v905_v37 = vmul.f32 %v7411_v56, %v7364_v40  ;;  %v924_v24 = vadd.f32 %v7417_v3, %v888_v1  ;;  %v940_v4 = vadd.f32 %v7417_v3, %v904_v39 }
 0x1ea   :  { %v925_v26 = vadd.f32 %v7417_v3, %v889_v50  ;;  %v890_v31 = vmul.f32 %v7411_v56, %v9856_v48  ;;  %v906_v16 = vmul.f32 %v7411_v56, %v7368_v52  ;;  %v891_v40 = vmul.f32 %v7411_v56, %v9857_v15 }
 0x1eb   :  { %5489 = vmatmul.mubr.f32.gmra.mrb[2].mxu0 %v918_v2  ;;  %5513 = vmatmul.mubr.f32.gmra.mrb[2].mxu1 %v934_v19  ;;  %v941_v63 = vadd.f32 %v7417_v3, %v905_v37  ;;  %v907_v46 = vmul.f32 %v7411_v56, %v7378_v27  ;;  %v892_v52 = vmul.f32 %v7411_v56, %v7218_v57  ;;  %v1456_v2 = vld [vmem:[#allocation2 + $0x138] sm:$0xff]  ;;  %v1457_v19 = vld [vmem:[#allocation2 + $0x140] sm:$0xff] }
 0x1ec   :  { %5491 = vmatprep.mubr.f32.mxu0 %v919_v60  ;;  %5515 = vmatprep.mubr.f32.mxu1 %v935_v6  ;;  %v926_v23 = vadd.f32 %v7417_v3, %v890_v31  ;;  %v942_v54 = vadd.f32 %v7417_v3, %v906_v16  ;;  %v927_v41 = vadd.f32 %v7417_v3, %v891_v40  ;;  %v1458_v60 = vld [vmem:[#allocation2 + $0x148] sm:$0xff] }
 0x1ed   :  { %v943_v45 = vadd.f32 %v7417_v3, %v907_v46  ;;  %v908_v36 = vmul.f32 %v7411_v56, %v7384_v7  ;;  %v893_v27 = vmul.f32 %v7411_v56, %v7231_v11  ;;  %v909_v59 = vmul.f32 %v7411_v56, %v7393_v13 }
 0x1ee   :  { %v928_v29 = vadd.f32 %v7417_v3, %v892_v52  ;;  %v894_v57 = vmul.f32 %v7411_v56, %v7253_v33  ;;  %v910_v7 = vmul.f32 %v7411_v56, %v7399_v12  ;;  %v6205_v49 = vpack.c.bf16 %v1450_v35, %v1449_v42  ;;  %v1453_v33 = vld [vmem:[#allocation2 + $0x120] sm:$0xff]  ;;  %v1454_v12 = vld [vmem:[#allocation2 + $0x128] sm:$0xff] }
 0x1ef   :  { %5492 = vmatmul.mubr.f32.gmra.mrb[4].mxu0 %v920_v20  ;;  %5516 = vmatmul.mubr.f32.gmra.mrb[4].mxu1 %v936_v43  ;;  %v944_v51 = vadd.f32 %v7417_v3, %v908_v36  ;;  %v929_v25 = vadd.f32 %v7417_v3, %v893_v27  ;;  %v945_v9 = vadd.f32 %v7417_v3, %v909_v59  ;;  %v7514_v20 = vsub.s32 3, %v9858_v34  ;;  %v1461_v43 = vld [vmem:[#allocation2 + $0x160] sm:$0xff] }
 0x1f0   :  { %5494 = vmatprep.mubr.f32.mxu0 %v921_v18  ;;  %5518 = vmatprep.mubr.f32.mxu1 %v937_v44  ;;  %v930_v11 = vadd.f32 %v7417_v3, %v894_v57  ;;  %v946_v13 = vadd.f32 %v7417_v3, %v910_v7  ;;  %v6209_v14 = vpack.c.bf16 %v1452_v61, %v1451_v55  ;;  %v1462_v18 = vld [vmem:[#allocation2 + $0x168] sm:$0xff]  ;;  %v1463_v44 = vld [vmem:[#allocation2 + $0x170] sm:$0xff] }
 0x1f1   :  { %6206 = vmatprep.subr.bf16.mxu1 %v6205_v49  ;;  %v6213_v56 = vpack.c.bf16 %v1454_v12, %v1453_v33  ;;  %v6217_v3 = vpack.c.bf16 %v1456_v2, %v1455_v30  ;;  %v6221_v6 = vpack.c.bf16 %v1458_v60, %v1457_v19  ;;  %v6225_v47 = vpack.c.bf16 %v1460_v10, %v1459_v28 }
 0x1f2   :  { %6208 = vmatpush3.bf16.msra.mxu1 %v6205_v49  ;;  %v6229_v22 = vpack.c.bf16 %v1462_v18, %v1461_v43  ;;  %v6233_v5 = vpack.c.bf16 %v1464_v21, %v1463_v44  ;;  %v7518_v8 = vrot.slane %v7407_v32, %v7514_v20 }
 0x1f3   :  { %5495 = vmatmul.mubr.f32.gmra.mrb[6].mxu0 %v922_v0  ;;  %5519 = vmatmul.mubr.f32.gmra.mrb[6].mxu1 %v938_v17 }
 0x1f4   :  { %5497 = vmatprep.mubr.f32.mxu0 %v923_v62  ;;  %5521 = vmatprep.mubr.f32.mxu1 %v939_v53 }
 0x1f5   :  { %6210 = vmatprep.subr.bf16.mxu1 %v6209_v14 }
 0x1f6   :  { %6212 = vmatpush3.bf16.msra.mxu1 %v6209_v14 }
 0x1f7   :  { %5498 = vmatmul.mubr.f32.gmra.mrb[8].mxu0 %v924_v24  ;;  %5522 = vmatmul.mubr.f32.gmra.mrb[8].mxu1 %v940_v4 }
 0x1f8   :  { %5500 = vmatprep.mubr.f32.mxu0 %v925_v26  ;;  %5524 = vmatprep.mubr.f32.mxu1 %v941_v63 }
 0x1f9   :  { %6214 = vmatprep.subr.bf16.mxu1 %v6213_v56 }
 0x1fa   :  { %6216 = vmatpush3.bf16.msra.mxu1 %v6213_v56 }
 0x1fb   :  { %5501 = vmatmul.mubr.f32.gmra.mrb[10].mxu0 %v926_v23  ;;  %5525 = vmatmul.mubr.f32.gmra.mrb[10].mxu1 %v942_v54 }
 0x1fc   :  { %5503 = vmatprep.mubr.f32.mxu0 %v927_v41  ;;  %5527 = vmatprep.mubr.f32.mxu1 %v943_v45 }
 0x1fd   :  { %6218 = vmatprep.subr.bf16.mxu1 %v6217_v3 }
 0x1fe   :  { %6220 = vmatpush3.bf16.msra.mxu1 %v6217_v3 }
 0x1ff   :  { %5504 = vmatmul.mubr.f32.gmra.mrb[12].mxu0 %v928_v29  ;;  %5528 = vmatmul.mubr.f32.gmra.mrb[12].mxu1 %v944_v51 }
 0x200   :  { %5506 = vmatprep.mubr.f32.mxu0 %v929_v25  ;;  %5530 = vmatprep.mubr.f32.mxu1 %v945_v9 }
 0x201   :  { %6222 = vmatprep.subr.bf16.mxu1 %v6221_v6 }
 0x202   :  { %6224 = vmatpush3.bf16.msra.mxu1 %v6221_v6 }
 0x203   :  { %5507 = vmatmul.mubr.f32.gmra.mrb[14].mxu0 %v930_v11  ;;  %5531 = vmatmul.mubr.f32.gmra.mrb[14].mxu1 %v946_v13 }
 0x204   :  { %6226 = vmatprep.subr.bf16.mxu1 %v6225_v47 }
 0x206   :  { %6228 = vmatpush3.bf16.msra.mxu1 %v6225_v47 }
 0x207   :  { %6230 = vmatprep.subr.bf16.mxu1 %v6229_v22 }
 0x20a   :  { %6232 = vmatpush3.bf16.msra.mxu1 %v6229_v22 }
 0x20b   :  { %6234 = vmatprep.subr.bf16.mxu1 %v6233_v5 }
 0x20e   :  { %6236 = vmatpush3.bf16.msra.mxu1 %v6233_v5 }
 0x2ba   :  { %v5487_v0 = vpop.f32.mrb[0].mxu0  ;;  %v7520_v17 = vpop.f32.mrb[0].mxu1 }
 0x2bb   :  { %v1040_v62 = vadd.f32 %v5487_v0, %v7518_v8  ;;  %v1034_v53 = vpop.f32.mrb[1].mxu0  ;;  %v7523_v1 = vpop.f32.mrb[1].mxu1 }
 0x2bc   :  { %v1035_v39 = vadd.f32 %v1034_v53, %v7518_v8 }
 0x2bd   :  { %v1194_v50 = vmul.f32 0.2, %v1040_v62 }
 0x2be   :  { %v1193_v37 = vmul.f32 0.2, %v1035_v39  ;;  %v5490_v24 = vpop.f32.mrb[2].mxu0  ;;  %v7526_v4 = vpop.f32.mrb[2].mxu1 }
 0x2bf   :  { %v7528_v26 = vmax.f32 %v1040_v62, %v1194_v50  ;;  %v1050_v63 = vadd.f32 %v5490_v24, %v7518_v8  ;;  %v1044_v48 = vpop.f32.mrb[3].mxu0  ;;  %v7531_v31 = vpop.f32.mrb[3].mxu1 }
 0x2c0   :  { %v7533_v16 = vmax.f32 %v1035_v39, %v1193_v37  ;;  %v1045_v15 = vadd.f32 %v1044_v48, %v7518_v8 }
 0x2c1   :  { %v1196_v40 = vmul.f32 0.2, %v1050_v63  ;;  %v1296_v46 = vmul.f32 %v7528_v26, %v7528_v26 }
 0x2c2   :  { %v1295_v23 = vmul.f32 %v7533_v16, %v7533_v16  ;;  %v1195_v54 = vmul.f32 0.2, %v1045_v15  ;;  %v5493_v41 = vpop.f32.mrb[4].mxu0  ;;  %v7540_v45 = vpop.f32.mrb[4].mxu1  ;;  %v1257_v59 = vadd.f32 %v7528_v26, %v7533_v16 }
 0x2c3   :  { %v1060_v52 = vadd.f32 %v5493_v41, %v7518_v8  ;;  %v1054_v36 = vpop.f32.mrb[5].mxu0  ;;  %v7543_v27 = vpop.f32.mrb[5].mxu1  ;;  %v7547_v29 = vmax.f32 %v1050_v63, %v1196_v40 }
 0x2c4   :  { %v7549_v51 = vmax.f32 %v1045_v15, %v1195_v54  ;;  %v1055_v25 = vadd.f32 %v1054_v36, %v7518_v8  ;;  %v1327_v57 = vadd.f32 %v1296_v46, %v1295_v23 }
 0x2c5   :  { %v1198_v9 = vmul.f32 0.2, %v1060_v52  ;;  %v1298_v14 = vmul.f32 %v7547_v29, %v7547_v29 }
 0x2c6   :  { %v1258_v7 = vadd.f32 %v1257_v59, %v7549_v51  ;;  %v1297_v11 = vmul.f32 %v7549_v51, %v7549_v51  ;;  %v1197_v13 = vmul.f32 0.2, %v1055_v25  ;;  %v5496_v42 = vpop.f32.mrb[6].mxu0  ;;  %v7555_v35 = vpop.f32.mrb[6].mxu1 }
 0x2c7   :  { %v1070_v49 = vadd.f32 %v5496_v42, %v7518_v8  ;;  %v1064_v55 = vpop.f32.mrb[7].mxu0  ;;  %v7558_v61 = vpop.f32.mrb[7].mxu1  ;;  %v7565_v30 = vmax.f32 %v1060_v52, %v1198_v9 }
 0x2c8   :  { %v1328_v33 = vadd.f32 %v1327_v57, %v1297_v11  ;;  %v7562_v12 = vmax.f32 %v1055_v25, %v1197_v13  ;;  %v1259_v56 = vadd.f32 %v1258_v7, %v7547_v29  ;;  %v1065_v10 = vadd.f32 %v1064_v55, %v7518_v8 }
 0x2c9   :  { %v1200_v60 = vmul.f32 0.2, %v1070_v49  ;;  %v1300_v22 = vmul.f32 %v7565_v30, %v7565_v30 }
 0x2ca   :  { %v1260_v2 = vadd.f32 %v1259_v56, %v7562_v12  ;;  %v1299_v3 = vmul.f32 %v7562_v12, %v7562_v12  ;;  %v1329_v19 = vadd.f32 %v1328_v33, %v1298_v14  ;;  %v5499_v6 = vpop.f32.mrb[8].mxu0  ;;  %v7570_v28 = vpop.f32.mrb[8].mxu1  ;;  %v1199_v21 = vmul.f32 0.2, %v1065_v10 }
 0x2cb   :  { %v1074_v47 = vpop.f32.mrb[9].mxu0  ;;  %v7573_v43 = vpop.f32.mrb[9].mxu1  ;;  %v1080_v44 = vadd.f32 %v5499_v6, %v7518_v8  ;;  %v7579_v0 = vmax.f32 %v1070_v49, %v1200_v60 }
 0x2cc   :  { %v1330_v18 = vadd.f32 %v1329_v19, %v1299_v3  ;;  %v1261_v5 = vadd.f32 %v1260_v2, %v7565_v30  ;;  %v7583_v39 = vmax.f32 %v1065_v10, %v1199_v21  ;;  %v1075_v24 = vadd.f32 %v1074_v47, %v7518_v8 }
 0x2cd   :  { %v1202_v37 = vmul.f32 0.2, %v1080_v44  ;;  %v1302_v54 = vmul.f32 %v7579_v0, %v7579_v0 }
 0x2ce   :  { %v5502_v62 = vpop.f32.mrb[10].mxu0  ;;  %v7581_v53 = vpop.f32.mrb[10].mxu1  ;;  %v1331_v50 = vadd.f32 %v1330_v18, %v1300_v22  ;;  %v1262_v40 = vadd.f32 %v1261_v5, %v7583_v39  ;;  %v1301_v46 = vmul.f32 %v7583_v39, %v7583_v39  ;;  %v1201_v23 = vmul.f32 0.2, %v1075_v24 }
 0x2cf   :  { %v1084_v63 = vpop.f32.mrb[11].mxu0  ;;  %v7586_v48 = vpop.f32.mrb[11].mxu1  ;;  %v1090_v15 = vadd.f32 %v5502_v62, %v7518_v8  ;;  %v7596_v59 = vmax.f32 %v1080_v44, %v1202_v37  ;;  %v1115_v37 = vadd.f32 %v7523_v1, %v7518_v8  ;;  %v1125_v1 = vadd.f32 %v7531_v31, %v7518_v8 }
 0x2d0   :  { %v1332_v36 = vadd.f32 %v1331_v50, %v1301_v46  ;;  %v7598_v25 = vmax.f32 %v1075_v24, %v1201_v23  ;;  %v1263_v9 = vadd.f32 %v1262_v40, %v7579_v0  ;;  %v1085_v13 = vadd.f32 %v1084_v63, %v7518_v8 }
 0x2d1   :  { %v1204_v11 = vmul.f32 0.2, %v1090_v15  ;;  %v1304_v2 = vmul.f32 %v7596_v59, %v7596_v59  ;;  %v1120_v50 = vadd.f32 %v7520_v17, %v7518_v8 }
 0x2d2   :  { %v5505_v41 = vpop.f32.mrb[12].mxu0  ;;  %v7594_v52 = vpop.f32.mrb[12].mxu1  ;;  %v1264_v42 = vadd.f32 %v1263_v9, %v7598_v25  ;;  %v1303_v49 = vmul.f32 %v7598_v25, %v7598_v25  ;;  %v1333_v55 = vadd.f32 %v1332_v36, %v1302_v54  ;;  %v1203_v14 = vmul.f32 0.2, %v1085_v13 }
 0x2d3   :  { %v1094_v57 = vpop.f32.mrb[13].mxu0  ;;  %v7601_v7 = vpop.f32.mrb[13].mxu1  ;;  %v1100_v60 = vadd.f32 %v5505_v41, %v7518_v8  ;;  %v7615_v47 = vmax.f32 %v1090_v15, %v1204_v11  ;;  %v1209_v9 = vmul.f32 0.2, %v1115_v37 }
 0x2d4   :  { %v1334_v3 = vadd.f32 %v1333_v55, %v1303_v49  ;;  %v1265_v19 = vadd.f32 %v1264_v42, %v7596_v59  ;;  %v7617_v18 = vmax.f32 %v1085_v13, %v1203_v14  ;;  %v1095_v44 = vadd.f32 %v1094_v57, %v7518_v8 }
 0x2d5   :  { %v1206_v21 = vmul.f32 0.2, %v1100_v60  ;;  %v1306_v63 = vmul.f32 %v7615_v47, %v7615_v47  ;;  %v1210_v13 = vmul.f32 0.2, %v1120_v50  ;;  %v1130_v49 = vadd.f32 %v7526_v4, %v7518_v8 }
 0x2d6   :  { %v5508_v33 = vpop.f32.mrb[14].mxu0  ;;  %v7607_v56 = vpop.f32.mrb[14].mxu1  ;;  %v1335_v22 = vadd.f32 %v1334_v3, %v1304_v2  ;;  %v1266_v5 = vadd.f32 %v1265_v19, %v7617_v18  ;;  %v1305_v62 = vmul.f32 %v7617_v18, %v7617_v18  ;;  %v1205_v24 = vmul.f32 0.2, %v1095_v44 }
 0x2d7   :  { %v1104_v6 = vpop.f32.mrb[15].mxu0  ;;  %v7613_v10 = vpop.f32.mrb[15].mxu1  ;;  %v1110_v46 = vadd.f32 %v5508_v33, %v7518_v8  ;;  %v7631_v23 = vmax.f32 %v1100_v60, %v1206_v21  ;;  %v7650_v31 = vmax.f32 %v1115_v37, %v1209_v9  ;;  %v1211_v19 = vmul.f32 0.2, %v1125_v1 }
 0x2d8   :  { %v1336_v15 = vadd.f32 %v1335_v22, %v1305_v62  ;;  %v1267_v40 = vadd.f32 %v1266_v5, %v7615_v47  ;;  %v7633_v54 = vmax.f32 %v1095_v44, %v1205_v24  ;;  %v1105_v17 = vadd.f32 %v1104_v6, %v7518_v8 }
 0x2d9   :  { %v1208_v36 = vmul.f32 0.2, %v1110_v46  ;;  %v1308_v55 = vmul.f32 %v7631_v23, %v7631_v23  ;;  %v1135_v6 = vadd.f32 %v7543_v27, %v7518_v8  ;;  %v7657_v22 = vmax.f32 %v1120_v50, %v1210_v13 }
 0x2da   :  { %v1337_v41 = vadd.f32 %v1336_v15, %v1306_v63  ;;  %v1268_v57 = vadd.f32 %v1267_v40, %v7633_v54  ;;  %v1307_v11 = vmul.f32 %v7633_v54, %v7633_v54  ;;  %v1207_v42 = vmul.f32 0.2, %v1105_v17 }
 0x2db   :  { %v7646_v2 = vmax.f32 %v1110_v46, %v1208_v36  ;;  %v1212_v21 = vmul.f32 0.2, %v1130_v49  ;;  %v1140_v5 = vadd.f32 %v7540_v45, %v7518_v8  ;;  %v1311_v27 = vmul.f32 %v7650_v31, %v7650_v31 }
 0x2dc   :  { %v1338_v14 = vadd.f32 %v1337_v41, %v1307_v11  ;;  %v1269_v33 = vadd.f32 %v1268_v57, %v7631_v23  ;;  %v7648_v3 = vmax.f32 %v1105_v17, %v1207_v42  ;;  %v7666_v63 = vmax.f32 %v1125_v1, %v1211_v19 }
 0x2dd   :  { %v1310_v62 = vmul.f32 %v7646_v2, %v7646_v2  ;;  %v1213_v15 = vmul.f32 0.2, %v1135_v6  ;;  %v1145_v50 = vadd.f32 %v7558_v61, %v7518_v8  ;;  %v1312_v45 = vmul.f32 %v7657_v22, %v7657_v22 }
 0x2de   :  { %v1339_v60 = vadd.f32 %v1338_v14, %v1308_v55  ;;  %v1270_v44 = vadd.f32 %v1269_v33, %v7648_v3  ;;  %v1309_v4 = vmul.f32 %v7648_v3, %v7648_v3  ;;  %v7673_v41 = vmax.f32 %v1130_v49, %v1212_v21 }
 0x2df   :  { %v1214_v36 = vmul.f32 0.2, %v1140_v5  ;;  %v1150_v17 = vadd.f32 %v7555_v35, %v7518_v8  ;;  %v1313_v57 = vmul.f32 %v7666_v63, %v7666_v63  ;;  %v1155_v61 = vadd.f32 %v7573_v43, %v7518_v8 }
 0x2e0   :  { %v1271_v37 = vadd.f32 %v1270_v44, %v7646_v2  ;;  %v1340_v24 = vadd.f32 %v1339_v60, %v1309_v4  ;;  %v7682_v11 = vmax.f32 %v1135_v6, %v1213_v15  ;;  %v1215_v13 = vmul.f32 0.2, %v1145_v50 }
 0x2e1   :  { %v1314_v55 = vmul.f32 %v7673_v41, %v7673_v41  ;;  %v1160_v35 = vadd.f32 %v7570_v28, %v7518_v8  ;;  %v7689_v14 = vmax.f32 %v1140_v5, %v1214_v36  ;;  %v1216_v33 = vmul.f32 0.2, %v1150_v17 }
 0x2e2   :  { %v1272_v40 = vadd.f32 %v1271_v37, %v7650_v31  ;;  %v1341_v46 = vadd.f32 %v1340_v24, %v1310_v62  ;;  %v1217_v44 = vmul.f32 0.2, %v1155_v61  ;;  %v1165_v43 = vadd.f32 %v7586_v48, %v7518_v8 }
 0x2e3   :  { %v1315_v6 = vmul.f32 %v7682_v11, %v7682_v11  ;;  %v7696_v4 = vmax.f32 %v1145_v50, %v1215_v13  ;;  %v1218_v37 = vmul.f32 0.2, %v1160_v35  ;;  %v1170_v28 = vadd.f32 %v7581_v53, %v7518_v8 }
 0x2e4   :  { %v1273_v9 = vadd.f32 %v1272_v40, %v7657_v22  ;;  %v1342_v1 = vadd.f32 %v1341_v46, %v1311_v27  ;;  %v1316_v5 = vmul.f32 %v7689_v14, %v7689_v14  ;;  %v7703_v24 = vmax.f32 %v1150_v17, %v1216_v33 }
 0x2e5   :  { %v7706_v15 = vmax.f32 %v1155_v61, %v1217_v44  ;;  %v1219_v40 = vmul.f32 0.2, %v1165_v43  ;;  %v1317_v50 = vmul.f32 %v7696_v4, %v7696_v4  ;;  %v1175_v46 = vadd.f32 %v7601_v7, %v7518_v8 }
 0x2e6   :  { %v1274_v42 = vadd.f32 %v1273_v9, %v7666_v63  ;;  %v1343_v49 = vadd.f32 %v1342_v1, %v1312_v45  ;;  %v7713_v36 = vmax.f32 %v1160_v35, %v1218_v37  ;;  %v1220_v9 = vmul.f32 0.2, %v1170_v28 }
 0x2e7   :  { %v1318_v17 = vmul.f32 %v7703_v24, %v7703_v24  ;;  %v1180_v1 = vadd.f32 %v7594_v52, %v7518_v8  ;;  %v1319_v13 = vmul.f32 %v7706_v15, %v7706_v15  ;;  %v1221_v7 = vmul.f32 0.2, %v1175_v46 }
 0x2e8   :  { %v1275_v19 = vadd.f32 %v1274_v42, %v7673_v41  ;;  %v1344_v60 = vadd.f32 %v1343_v49, %v1313_v57  ;;  %v7722_v42 = vmax.f32 %v1165_v43, %v1219_v40  ;;  %v1185_v49 = vadd.f32 %v7613_v10, %v7518_v8 }
 0x2e9   :  { %v1320_v33 = vmul.f32 %v7713_v36, %v7713_v36  ;;  %v1222_v52 = vmul.f32 0.2, %v1180_v1 }
 0x2ea   :  { %v1276_v21 = vadd.f32 %v1275_v19, %v7682_v11  ;;  %v1345_v62 = vadd.f32 %v1344_v60, %v1314_v55  ;;  %v7729_v19 = vmax.f32 %v1170_v28, %v1220_v9  ;;  %v1190_v60 = vadd.f32 %v7607_v56, %v7518_v8 }
 0x2eb   :  { %v1223_v10 = vmul.f32 0.2, %v1185_v49 }
 0x2ec   :  { %v1277_v27 = vadd.f32 %v1276_v21, %v7689_v14  ;;  %v1346_v48 = vadd.f32 %v1345_v62, %v1315_v6  ;;  %v1321_v6 = vmul.f32 %v7722_v42, %v7722_v42  ;;  %v7736_v21 = vmax.f32 %v1175_v46, %v1221_v7 }
 0x2ed   :  { %v1322_v28 = vmul.f32 %v7729_v19, %v7729_v19  ;;  %v7746_v40 = vmax.f32 %v1185_v49, %v1223_v10 }
 0x2ee   :  { %v1347_v45 = vadd.f32 %v1346_v48, %v1316_v5  ;;  %v1278_v53 = vadd.f32 %v1277_v27, %v7696_v4  ;;  %v7741_v5 = vmax.f32 %v1180_v1, %v1222_v52  ;;  %v1224_v27 = vmul.f32 0.2, %v1190_v60 }
 0x2ef   :  { %v1323_v48 = vmul.f32 %v7736_v21, %v7736_v21 }
 0x2f0   :  { %v1279_v57 = vadd.f32 %v1278_v53, %v7703_v24  ;;  %v1348_v61 = vadd.f32 %v1347_v45, %v1317_v50  ;;  %v1324_v45 = vmul.f32 %v7741_v5, %v7741_v5  ;;  %v7751_v53 = vmax.f32 %v1190_v60, %v1224_v27 }
 0x2f2   :  { %v1280_v55 = vadd.f32 %v1279_v57, %v7706_v15  ;;  %v1349_v35 = vadd.f32 %v1348_v61, %v1318_v17  ;;  %v1325_v57 = vmul.f32 %v7746_v40, %v7746_v40 }
 0x2f4   :  { %v1281_v44 = vadd.f32 %v1280_v55, %v7713_v36  ;;  %v1350_v43 = vadd.f32 %v1349_v35, %v1319_v13  ;;  %v1326_v13 = vmul.f32 %v7751_v53, %v7751_v53 }
 0x2f6   :  { %v1282_v62 = vadd.f32 %v1281_v44, %v7722_v42  ;;  %v1351_v37 = vadd.f32 %v1350_v43, %v1320_v33 }
 0x2f8   :  { %v1283_v8 = vadd.f32 %v1282_v62, %v7729_v19  ;;  %v1352_v56 = vadd.f32 %v1351_v37, %v1321_v6 }
 0x2fa   :  { %v1284_v50 = vadd.f32 %v1283_v8, %v7736_v21  ;;  %v1353_v46 = vadd.f32 %v1352_v56, %v1322_v28 }
 0x2fc   :  { %v1285_v9 = vadd.f32 %v1284_v50, %v7741_v5  ;;  %v1354_v17 = vadd.f32 %v1353_v46, %v1323_v48 }
 0x2fe   :  { %v1286_v1 = vadd.f32 %v1285_v9, %v7746_v40  ;;  %v1355_v61 = vadd.f32 %v1354_v17, %v1324_v45 }
 0x300   :  { %v1287_v7 = vadd.f32 %v1286_v1, %v7751_v53  ;;  %v1356_v49 = vadd.f32 %v1355_v61, %v1325_v57  ;;  %v7762_v1 = vsub.s32 4, %v9858_v34 }
 0x302   :  { %v1288_v55 = vrot.slane %v1287_v7, 4  ;;  %v1357_v35 = vadd.f32 %v1356_v49, %v1326_v13 }
 0x304   :  { %v1289_v33 = vadd.f32 %v1288_v55, %v1287_v7  ;;  %v1358_v52 = vrot.slane %v1357_v35, 4  ;;  %v7768_v7 = vsub.s32 5, %v9858_v34 }
 0x306   :  { %v1290_v60 = vrot.slane %v1289_v33, 2  ;;  %v1359_v44 = vadd.f32 %v1358_v52, %v1357_v35  ;;  %9859 = vst [vmem:[#allocation7_spill] sm:$0xff] %v7768_v7 }
 0x308   :  { %v1291_v43 = vadd.f32 %v1290_v60, %v1289_v33  ;;  %v1360_v6 = vrot.slane %v1359_v44, 2 }
 0x30a   :  { %v1292_v10 = vrot.slane %v1291_v43, 1  ;;  %v1361_v62 = vadd.f32 %v1360_v6, %v1359_v44 }
 0x30c   :  { %v1293_v37 = vadd.f32 %v1292_v10, %v1291_v43  ;;  %v1362_v28 = vrot.slane %v1361_v62, 1 }
 0x30e   :  { %v1294_v27 = vmul.f32 0.00390625, %v1293_v37  ;;  %v1363_v8 = vadd.f32 %v1362_v28, %v1361_v62 }
 0x310   :  { %v1364_v56 = vmul.f32 0.00390625, %v1363_v8  ;;  %v1365_v48 = vmul.f32 %v1294_v27, %v1294_v27 }
 0x312   :  { %v1366_v50 = vsub.f32 %v1364_v56, %v1365_v48 }
 0x314   :  { %v1367_v46 = vmax.f32 %v1366_v50, 0.0 }
 0x316   :  { %v1368_v45 = vadd.f32 1e-05, %v1367_v46 }
 0x318   :  { %6547 = vrsqrt.f32 %v1368_v45 }
 0x322   :  { %v6548_v9 = vpop.eup %6547 }
 0x323   :  { %v1370_v17 = vmul.f32 %v7407_v32, %v6548_v9 }
 0x325   :  { %v1371_v57 = vmul.f32 %v1370_v17, %v1294_v27  ;;  %v7765_v13 = vrot.slane %v1370_v17, %v7762_v1 }
 0x327   :  { %v1373_v61 = vrot.slane %v1371_v57, 7  ;;  %v1381_v35 = vmul.f32 %v7765_v13, %v7528_v26  ;;  %v1380_v33 = vmul.f32 %v7765_v13, %v7533_v16  ;;  %v1382_v44 = vmul.f32 %v7765_v13, %v7549_v51 }
 0x328   :  { %v1384_v26 = vmul.f32 %v7765_v13, %v7562_v12  ;;  %v1385_v10 = vmul.f32 %v7765_v13, %v7565_v30  ;;  %v1386_v51 = vmul.f32 %v7765_v13, %v7583_v39  ;;  %v1387_v12 = vmul.f32 %v7765_v13, %v7579_v0 }
 0x329   :  { %v1375_v49 = vsub.f32 %v7407_v32, %v1373_v61  ;;  %v1383_v32 = vmul.f32 %v7765_v13, %v7547_v29  ;;  %v1388_v37 = vmul.f32 %v7765_v13, %v7598_v25  ;;  %v1389_v39 = vmul.f32 %v7765_v13, %v7596_v59 }
 0x32a   :  { %v1390_v27 = vmul.f32 %v7765_v13, %v7617_v18  ;;  %v1391_v25 = vmul.f32 %v7765_v13, %v7615_v47  ;;  %v1392_v56 = vmul.f32 %v7765_v13, %v7633_v54  ;;  %v1393_v18 = vmul.f32 %v7765_v13, %v7631_v23 }
 0x32b   :  { %v7772_v55 = vrot.slane %v1375_v49, %v7768_v7  ;;  %v1394_v50 = vmul.f32 %v7765_v13, %v7648_v3  ;;  %v1395_v54 = vmul.f32 %v7765_v13, %v7646_v2  ;;  %v1396_v45 = vmul.f32 %v7765_v13, %v7650_v31 }
 0x32c   :  { %v1397_v3 = vmul.f32 %v7765_v13, %v7657_v22  ;;  %v1398_v17 = vmul.f32 %v7765_v13, %v7666_v63  ;;  %v1399_v31 = vmul.f32 %v7765_v13, %v7673_v41  ;;  %v1400_v61 = vmul.f32 %v7765_v13, %v7682_v11 }
 0x32d   :  { %v1417_v52 = vadd.f32 %v7772_v55, %v1381_v35  ;;  %v1416_v60 = vadd.f32 %v7772_v55, %v1380_v33  ;;  %v1418_v43 = vadd.f32 %v7772_v55, %v1382_v44  ;;  %v1419_v16 = vadd.f32 %v7772_v55, %v1383_v32 }
 0x32e   :  { %v1420_v6 = vadd.f32 %v7772_v55, %v1384_v26  ;;  %v1421_v62 = vadd.f32 %v7772_v55, %v1385_v10  ;;  %v1422_v29 = vadd.f32 %v7772_v55, %v1386_v51  ;;  %v1423_v28 = vadd.f32 %v7772_v55, %v1387_v12  ;;  %v1950_v51 = vld [vmem:[#allocation2 + $0x180] sm:$0xff]  ;;  %v1953_v12 = vld [vmem:[#allocation2 + $0x198] sm:$0xff] }
 0x32f   :  { %5565 = vmatprep.mubr.f32.mxu1 %v1416_v60  ;;  %v1424_v30 = vadd.f32 %v7772_v55, %v1388_v37  ;;  %v1425_v8 = vadd.f32 %v7772_v55, %v1389_v39  ;;  %v1426_v0 = vadd.f32 %v7772_v55, %v1390_v27  ;;  %v1427_v48 = vadd.f32 %v7772_v55, %v1391_v25  ;;  %v1954_v37 = vld [vmem:[#allocation2 + $0x1a0] sm:$0xff]  ;;  %v1959_v27 = vld [vmem:[#allocation2 + $0x1c8] sm:$0xff]  ;;  %v1961_v25 = vld [vmem:[#allocation2 + $0x1d8] sm:$0xff] }
 0x330   :  { %5566 = vmatmul.mubr.f32.vlgmr.msra.gmra.mrb[16].mxu1 %v1417_v52  ;;  %v1428_v59 = vadd.f32 %v7772_v55, %v1392_v56  ;;  %v1429_v46 = vadd.f32 %v7772_v55, %v1393_v18  ;;  %v1430_v47 = vadd.f32 %v7772_v55, %v1394_v50  ;;  %v1431_v9 = vadd.f32 %v7772_v55, %v1395_v54  ;;  %v1964_v50 = vld [vmem:[#allocation2 + $0x1f0] sm:$0xff] }
 0x331   :  { %5568 = vmatprep.mubr.f32.mxu1 %v1418_v43  ;;  %v1432_v23 = vadd.f32 %v7772_v55, %v1396_v45  ;;  %v1433_v57 = vadd.f32 %v7772_v55, %v1397_v3  ;;  %v1434_v2 = vadd.f32 %v7772_v55, %v1398_v17  ;;  %v1435_v49 = vadd.f32 %v7772_v55, %v1399_v31  ;;  %v7876_v45 = vld [vmem:[%s9832_s2] sm:$0xff] }
 0x332   :  { %v1436_v22 = vadd.f32 %v7772_v55, %v1400_v61  ;;  %v1401_v63 = vmul.f32 %v7765_v13, %v7689_v14  ;;  %v1402_v35 = vmul.f32 %v7765_v13, %v7696_v4  ;;  %v1403_v11 = vmul.f32 %v7765_v13, %v7703_v24 }
 0x333   :  { %v1404_v52 = vmul.f32 %v7765_v13, %v7706_v15  ;;  %v1405_v4 = vmul.f32 %v7765_v13, %v7713_v36  ;;  %v1406_v44 = vmul.f32 %v7765_v13, %v7722_v42  ;;  %v1407_v15 = vmul.f32 %v7765_v13, %v7729_v19 }
 0x334   :  { %5569 = vmatmul.mubr.f32.gmra.mrb[18].mxu1 %v1419_v16  ;;  %v1437_v33 = vadd.f32 %v7772_v55, %v1401_v63  ;;  %v1438_v41 = vadd.f32 %v7772_v55, %v1402_v35  ;;  %v1439_v60 = vadd.f32 %v7772_v55, %v1403_v11  ;;  %v1408_v32 = vmul.f32 %v7765_v13, %v7736_v21 }
 0x335   :  { %5571 = vmatprep.mubr.f32.mxu1 %v1420_v6  ;;  %v1440_v14 = vadd.f32 %v7772_v55, %v1404_v52  ;;  %v1441_v43 = vadd.f32 %v7772_v55, %v1405_v4  ;;  %v1442_v24 = vadd.f32 %v7772_v55, %v1406_v44  ;;  %v1443_v26 = vadd.f32 %v7772_v55, %v1407_v15 }
 0x336   :  { %v1444_v36 = vadd.f32 %v7772_v55, %v1408_v32  ;;  %v1409_v42 = vmul.f32 %v7765_v13, %v7741_v5  ;;  %v1410_v16 = vmul.f32 %v7765_v13, %v7746_v40  ;;  %v1411_v21 = vmul.f32 %v7765_v13, %v7751_v53  ;;  %v1952_v5 = vld [vmem:[#allocation2 + $0x190] sm:$0xff]  ;;  %v1957_v13 = vld [vmem:[#allocation2 + $0x1b8] sm:$0xff] }
 0x337   :  { %v6241_v40 = vpack.c.bf16 %v1953_v12, %v1952_v5  ;;  %v1956_v53 = vld [vmem:[#allocation2 + $0x1b0] sm:$0xff] }
 0x338   :  { %5572 = vmatmul.mubr.f32.gmra.mrb[20].mxu1 %v1421_v62  ;;  %v1445_v6 = vadd.f32 %v7772_v55, %v1409_v42  ;;  %v1446_v19 = vadd.f32 %v7772_v55, %v1410_v16  ;;  %v1447_v10 = vadd.f32 %v7772_v55, %v1411_v21  ;;  %v1951_v62 = vld [vmem:[#allocation2 + $0x188] sm:$0xff]  ;;  %v6249_v39 = vpack.c.bf16 %v1957_v13, %v1956_v53  ;;  %v1958_v55 = vld [vmem:[#allocation2 + $0x1c0] sm:$0xff] }
 0x339   :  { %5574 = vmatprep.mubr.f32.mxu1 %v1422_v29  ;;  %v6237_v29 = vpack.c.bf16 %v1951_v62, %v1950_v51 }
 0x33b   :  { %6238 = vmatprep.subr.bf16.mxu0 %v6237_v29 }
 0x33c   :  { %5575 = vmatmul.mubr.f32.gmra.mrb[22].mxu1 %v1423_v28  ;;  %6240 = vmatpush3.bf16.msra.mxu0 %v6237_v29  ;;  %v1955_v28 = vld [vmem:[#allocation2 + $0x1a8] sm:$0xff] }
 0x33d   :  { %5577 = vmatprep.mubr.f32.mxu1 %v1424_v30  ;;  %6242 = vmatprep.subr.bf16.mxu0 %v6241_v40  ;;  %v6245_v30 = vpack.c.bf16 %v1955_v28, %v1954_v37 }
 0x340   :  { %5578 = vmatmul.mubr.f32.gmra.mrb[24].mxu1 %v1425_v8  ;;  %6244 = vmatpush3.bf16.msra.mxu0 %v6241_v40  ;;  %v6253_v8 = vpack.c.bf16 %v1959_v27, %v1958_v55 }
 0x341   :  { %5580 = vmatprep.mubr.f32.mxu1 %v1426_v0  ;;  %6246 = vmatprep.subr.bf16.mxu0 %v6245_v30  ;;  %v1960_v0 = vld [vmem:[#allocation2 + $0x1d0] sm:$0xff] }
 0x342   :  { %v6257_v56 = vpack.c.bf16 %v1961_v25, %v1960_v0 }
 0x344   :  { %5581 = vmatmul.mubr.f32.gmra.mrb[26].mxu1 %v1427_v48  ;;  %6248 = vmatpush3.bf16.msra.mxu0 %v6245_v30  ;;  %v1962_v48 = vld [vmem:[#allocation2 + $0x1e0] sm:$0xff] }
 0x345   :  { %5583 = vmatprep.mubr.f32.mxu1 %v1428_v59  ;;  %6250 = vmatprep.subr.bf16.mxu0 %v6249_v39  ;;  %v1963_v59 = vld [vmem:[#allocation2 + $0x1e8] sm:$0xff] }
 0x346   :  { %v6261_v18 = vpack.c.bf16 %v1963_v59, %v1962_v48 }
 0x348   :  { %5584 = vmatmul.mubr.f32.gmra.mrb[28].mxu1 %v1429_v46  ;;  %6252 = vmatpush3.bf16.msra.mxu0 %v6249_v39  ;;  %v1965_v46 = vld [vmem:[#allocation2 + $0x1f8] sm:$0xff] }
 0x349   :  { %5586 = vmatprep.mubr.f32.mxu1 %v1430_v47  ;;  %6254 = vmatprep.subr.bf16.mxu0 %v6253_v8  ;;  %v7871_v47 = vsub.s32 6, %v9858_v34  ;;  %v6265_v54 = vpack.c.bf16 %v1965_v46, %v1964_v50 }
 0x34c   :  { %5587 = vmatmul.mubr.f32.gmra.mrb[30].mxu1 %v1431_v9  ;;  %6256 = vmatpush3.bf16.msra.mxu0 %v6253_v8  ;;  %v7880_v9 = vrot.slane %v7876_v45, %v7871_v47 }
 0x34d   :  { %5589 = vmatprep.mubr.f32.mxu1 %v1432_v23  ;;  %6258 = vmatprep.subr.bf16.mxu0 %v6257_v56 }
 0x350   :  { %5590 = vmatmul.mubr.f32.gmra.mrb[32].mxu1 %v1433_v57  ;;  %6260 = vmatpush3.bf16.msra.mxu0 %v6257_v56 }
 0x351   :  { %5592 = vmatprep.mubr.f32.mxu1 %v1434_v2  ;;  %6262 = vmatprep.subr.bf16.mxu0 %v6261_v18 }
 0x354   :  { %5593 = vmatmul.mubr.f32.gmra.mrb[34].mxu1 %v1435_v49  ;;  %6264 = vmatpush3.bf16.msra.mxu0 %v6261_v18 }
 0x355   :  { %5595 = vmatprep.mubr.f32.mxu1 %v1436_v22  ;;  %6266 = vmatprep.subr.bf16.mxu0 %v6265_v54 }
 0x358   :  { %5596 = vmatmul.mubr.f32.gmra.mrb[36].mxu1 %v1437_v33  ;;  %6268 = vmatpush3.bf16.msra.mxu0 %v6265_v54 }
 0x359   :  { %5598 = vmatprep.mubr.f32.mxu1 %v1438_v41 }
 0x35c   :  { %5599 = vmatmul.mubr.f32.gmra.mrb[38].mxu1 %v1439_v60 }
 0x35d   :  { %5601 = vmatprep.mubr.f32.mxu1 %v1440_v14 }
 0x360   :  { %5602 = vmatmul.mubr.f32.gmra.mrb[40].mxu1 %v1441_v43 }
 0x361   :  { %5604 = vmatprep.mubr.f32.mxu1 %v1442_v24 }
 0x364   :  { %5605 = vmatmul.mubr.f32.gmra.mrb[42].mxu1 %v1443_v26 }
 0x365   :  { %5607 = vmatprep.mubr.f32.mxu1 %v1444_v36 }
 0x368   :  { %5608 = vmatmul.mubr.f32.gmra.mrb[44].mxu1 %v1445_v6 }
 0x369   :  { %5610 = vmatprep.mubr.f32.mxu1 %v1446_v19 }
 0x36c   :  { %5611 = vmatmul.mubr.f32.gmra.mrb[46].mxu1 %v1447_v10 }
 0x403   :  { %v5567_v23 = vpop.f32.mrb[16].mxu1 }
 0x404   :  { %v1541_v3 = vadd.f32 %v5567_v23, %v7880_v9  ;;  %v1535_v17 = vpop.f32.mrb[17].mxu1 }
 0x405   :  { %v1536_v57 = vadd.f32 %v1535_v17, %v7880_v9 }
 0x406   :  { %v1695_v2 = vmul.f32 0.2, %v1541_v3 }
 0x407   :  { %v1694_v31 = vmul.f32 0.2, %v1536_v57  ;;  %v5570_v61 = vpop.f32.mrb[18].mxu1 }
 0x408   :  { %v7884_v49 = vmax.f32 %v1541_v3, %v1695_v2  ;;  %v1551_v22 = vadd.f32 %v5570_v61, %v7880_v9  ;;  %v1545_v63 = vpop.f32.mrb[19].mxu1 }
 0x409   :  { %v7887_v35 = vmax.f32 %v1536_v57, %v1694_v31  ;;  %v1546_v33 = vadd.f32 %v1545_v63, %v7880_v9 }
 0x40a   :  { %v1697_v41 = vmul.f32 0.2, %v1551_v22  ;;  %v1797_v11 = vmul.f32 %v7884_v49, %v7884_v49 }
 0x40b   :  { %v1796_v52 = vmul.f32 %v7887_v35, %v7887_v35  ;;  %v1696_v60 = vmul.f32 0.2, %v1546_v33  ;;  %v5573_v14 = vpop.f32.mrb[20].mxu1  ;;  %v1758_v24 = vadd.f32 %v7884_v49, %v7887_v35 }
 0x40c   :  { %v7894_v4 = vmax.f32 %v1551_v22, %v1697_v41  ;;  %v1561_v44 = vadd.f32 %v5573_v14, %v7880_v9  ;;  %v1555_v43 = vpop.f32.mrb[21].mxu1 }
 0x40d   :  { %v7899_v15 = vmax.f32 %v1546_v33, %v1696_v60  ;;  %v1556_v32 = vadd.f32 %v1555_v43, %v7880_v9  ;;  %v1828_v36 = vadd.f32 %v1797_v11, %v1796_v52 }
 0x40e   :  { %v1699_v26 = vmul.f32 0.2, %v1561_v44  ;;  %v1799_v21 = vmul.f32 %v7894_v4, %v7894_v4 }
 0x40f   :  { %v1759_v42 = vadd.f32 %v1758_v24, %v7899_v15  ;;  %v1798_v16 = vmul.f32 %v7899_v15, %v7899_v15  ;;  %v1698_v6 = vmul.f32 0.2, %v1556_v32  ;;  %v5576_v19 = vpop.f32.mrb[22].mxu1 }
 0x410   :  { %v7907_v10 = vmax.f32 %v1561_v44, %v1699_v26  ;;  %v1571_v51 = vadd.f32 %v5576_v19, %v7880_v9  ;;  %v1565_v62 = vpop.f32.mrb[23].mxu1 }
 0x411   :  { %v1829_v29 = vadd.f32 %v1828_v36, %v1798_v16  ;;  %v7910_v5 = vmax.f32 %v1556_v32, %v1698_v6  ;;  %v1760_v12 = vadd.f32 %v1759_v42, %v7894_v4  ;;  %v1566_v40 = vadd.f32 %v1565_v62, %v7880_v9 }
 0x412   :  { %v1701_v37 = vmul.f32 0.2, %v1571_v51  ;;  %v1801_v55 = vmul.f32 %v7907_v10, %v7907_v10 }
 0x413   :  { %v1761_v28 = vadd.f32 %v1760_v12, %v7910_v5  ;;  %v1800_v30 = vmul.f32 %v7910_v5, %v7910_v5  ;;  %v1830_v53 = vadd.f32 %v1829_v29, %v1799_v21  ;;  %v1700_v13 = vmul.f32 0.2, %v1566_v40  ;;  %v5579_v39 = vpop.f32.mrb[24].mxu1 }
 0x414   :  { %v7919_v27 = vmax.f32 %v1571_v51, %v1701_v37  ;;  %v1581_v8 = vadd.f32 %v5579_v39, %v7880_v9  ;;  %v1575_v0 = vpop.f32.mrb[25].mxu1 }
 0x415   :  { %v1831_v25 = vadd.f32 %v1830_v53, %v1800_v30  ;;  %v7922_v56 = vmax.f32 %v1566_v40, %v1700_v13  ;;  %v1762_v48 = vadd.f32 %v1761_v28, %v7907_v10  ;;  %v1576_v59 = vadd.f32 %v1575_v0, %v7880_v9 }
 0x416   :  { %v1703_v18 = vmul.f32 0.2, %v1581_v8  ;;  %v1803_v17 = vmul.f32 %v7919_v27, %v7919_v27 }
 0x417   :  { %v1763_v50 = vadd.f32 %v1762_v48, %v7922_v56  ;;  %v1802_v46 = vmul.f32 %v7922_v56, %v7922_v56  ;;  %v1832_v54 = vadd.f32 %v1831_v25, %v1801_v55  ;;  %v1702_v23 = vmul.f32 0.2, %v1576_v59  ;;  %v5582_v3 = vpop.f32.mrb[26].mxu1 }
 0x418   :  { %v7931_v57 = vmax.f32 %v1581_v8, %v1703_v18  ;;  %v1591_v2 = vadd.f32 %v5582_v3, %v7880_v9  ;;  %v1585_v31 = vpop.f32.mrb[27].mxu1 }
 0x419   :  { %v1833_v61 = vadd.f32 %v1832_v54, %v1802_v46  ;;  %v7934_v22 = vmax.f32 %v1576_v59, %v1702_v23  ;;  %v1764_v63 = vadd.f32 %v1763_v50, %v7919_v27  ;;  %v1586_v33 = vadd.f32 %v1585_v31, %v7880_v9 }
 0x41a   :  { %v1705_v41 = vmul.f32 0.2, %v1591_v2  ;;  %v1805_v43 = vmul.f32 %v7931_v57, %v7931_v57 }
 0x41b   :  { %v1765_v11 = vadd.f32 %v1764_v63, %v7934_v22  ;;  %v1804_v52 = vmul.f32 %v7934_v22, %v7934_v22  ;;  %v1834_v60 = vadd.f32 %v1833_v61, %v1803_v17  ;;  %v1704_v14 = vmul.f32 0.2, %v1586_v33  ;;  %v5585_v44 = vpop.f32.mrb[28].mxu1 }
 0x41c   :  { %v7943_v24 = vmax.f32 %v1591_v2, %v1705_v41  ;;  %v1601_v32 = vadd.f32 %v5585_v44, %v7880_v9  ;;  %v1595_v26 = vpop.f32.mrb[29].mxu1 }
 0x41d   :  { %v1835_v36 = vadd.f32 %v1834_v60, %v1804_v52  ;;  %v7946_v42 = vmax.f32 %v1586_v33, %v1704_v14  ;;  %v1766_v16 = vadd.f32 %v1765_v11, %v7931_v57  ;;  %v1596_v6 = vadd.f32 %v1595_v26, %v7880_v9 }
 0x41e   :  { %v1707_v19 = vmul.f32 0.2, %v1601_v32  ;;  %v1807_v40 = vmul.f32 %v7943_v24, %v7943_v24 }
 0x41f   :  { %v1767_v21 = vadd.f32 %v1766_v16, %v7946_v42  ;;  %v1806_v51 = vmul.f32 %v7946_v42, %v7946_v42  ;;  %v1836_v62 = vadd.f32 %v1835_v36, %v1805_v43  ;;  %v1706_v29 = vmul.f32 0.2, %v1596_v6  ;;  %v5588_v12 = vpop.f32.mrb[30].mxu1 }
 0x420   :  { %v7955_v37 = vmax.f32 %v1601_v32, %v1707_v19  ;;  %v1611_v28 = vadd.f32 %v5588_v12, %v7880_v9  ;;  %v1605_v30 = vpop.f32.mrb[31].mxu1 }
 0x421   :  { %v1837_v53 = vadd.f32 %v1836_v62, %v1806_v51  ;;  %v7958_v13 = vmax.f32 %v1596_v6, %v1706_v29  ;;  %v1768_v39 = vadd.f32 %v1767_v21, %v7943_v24  ;;  %v1606_v55 = vadd.f32 %v1605_v30, %v7880_v9 }
 0x422   :  { %v1709_v8 = vmul.f32 0.2, %v1611_v28  ;;  %v1809_v50 = vmul.f32 %v7955_v37, %v7955_v37 }
 0x423   :  { %v1769_v0 = vadd.f32 %v1768_v39, %v7958_v13  ;;  %v1808_v25 = vmul.f32 %v7958_v13, %v7958_v13  ;;  %v1838_v48 = vadd.f32 %v1837_v53, %v1807_v40  ;;  %v1708_v59 = vmul.f32 0.2, %v1606_v55  ;;  %v5591_v18 = vpop.f32.mrb[32].mxu1 }
 0x424   :  { %v7967_v46 = vmax.f32 %v1611_v28, %v1709_v8  ;;  %v1621_v54 = vadd.f32 %v5591_v18, %v7880_v9  ;;  %v1615_v23 = vpop.f32.mrb[33].mxu1 }
 0x425   :  { %v1839_v3 = vadd.f32 %v1838_v48, %v1808_v25  ;;  %v7970_v17 = vmax.f32 %v1606_v55, %v1708_v59  ;;  %v1770_v2 = vadd.f32 %v1769_v0, %v7955_v37  ;;  %v1616_v31 = vadd.f32 %v1615_v23, %v7880_v9 }
 0x426   :  { %v1711_v61 = vmul.f32 0.2, %v1621_v54  ;;  %v1811_v60 = vmul.f32 %v7967_v46, %v7967_v46 }
 0x427   :  { %v1771_v63 = vadd.f32 %v1770_v2, %v7970_v17  ;;  %v1810_v33 = vmul.f32 %v7970_v17, %v7970_v17  ;;  %v1840_v41 = vadd.f32 %v1839_v3, %v1809_v50  ;;  %v1710_v11 = vmul.f32 0.2, %v1616_v31  ;;  %v5594_v52 = vpop.f32.mrb[34].mxu1 }
 0x428   :  { %v7979_v14 = vmax.f32 %v1621_v54, %v1711_v61  ;;  %v1631_v44 = vadd.f32 %v5594_v52, %v7880_v9  ;;  %v1625_v43 = vpop.f32.mrb[35].mxu1 }
 0x429   :  { %v1841_v32 = vadd.f32 %v1840_v41, %v1810_v33  ;;  %v7982_v26 = vmax.f32 %v1616_v31, %v1710_v11  ;;  %v1772_v36 = vadd.f32 %v1771_v63, %v7967_v46  ;;  %v1626_v16 = vadd.f32 %v1625_v43, %v7880_v9 }
 0x42a   :  { %v1713_v6 = vmul.f32 0.2, %v1631_v44  ;;  %v1813_v12 = vmul.f32 %v7979_v14, %v7979_v14 }
 0x42b   :  { %v1773_v19 = vadd.f32 %v1772_v36, %v7982_v26  ;;  %v1812_v21 = vmul.f32 %v7982_v26, %v7982_v26  ;;  %v1842_v51 = vadd.f32 %v1841_v32, %v1811_v60  ;;  %v1712_v62 = vmul.f32 0.2, %v1626_v16  ;;  %v5597_v29 = vpop.f32.mrb[36].mxu1 }
 0x42c   :  { %v7991_v40 = vmax.f32 %v1631_v44, %v1713_v6  ;;  %v1641_v28 = vadd.f32 %v5597_v29, %v7880_v9  ;;  %v1635_v30 = vpop.f32.mrb[37].mxu1 }
 0x42d   :  { %v1843_v53 = vadd.f32 %v1842_v51, %v1812_v21  ;;  %v7994_v39 = vmax.f32 %v1626_v16, %v1712_v62  ;;  %v1774_v55 = vadd.f32 %v1773_v19, %v7979_v14  ;;  %v1636_v8 = vadd.f32 %v1635_v30, %v7880_v9 }
 0x42e   :  { %v1715_v0 = vmul.f32 0.2, %v1641_v28  ;;  %v1815_v54 = vmul.f32 %v7991_v40, %v7991_v40 }
 0x42f   :  { %v1775_v25 = vadd.f32 %v1774_v55, %v7994_v39  ;;  %v1814_v48 = vmul.f32 %v7994_v39, %v7994_v39  ;;  %v1844_v59 = vadd.f32 %v1843_v53, %v1813_v12  ;;  %v1714_v18 = vmul.f32 0.2, %v1636_v8  ;;  %v5600_v50 = vpop.f32.mrb[38].mxu1 }
 0x430   :  { %v8003_v23 = vmax.f32 %v1641_v28, %v1715_v0  ;;  %v1651_v3 = vadd.f32 %v5600_v50, %v7880_v9  ;;  %v1645_v2 = vpop.f32.mrb[39].mxu1 }
 0x431   :  { %v1845_v31 = vadd.f32 %v1844_v59, %v1814_v48  ;;  %v8006_v61 = vmax.f32 %v1636_v8, %v1714_v18  ;;  %v1776_v63 = vadd.f32 %v1775_v25, %v7991_v40  ;;  %v1646_v33 = vadd.f32 %v1645_v2, %v7880_v9 }
 0x432   :  { %v1717_v41 = vmul.f32 0.2, %v1651_v3  ;;  %v1817_v32 = vmul.f32 %v8003_v23, %v8003_v23 }
 0x433   :  { %v1777_v11 = vadd.f32 %v1776_v63, %v8006_v61  ;;  %v1816_v52 = vmul.f32 %v8006_v61, %v8006_v61  ;;  %v1846_v60 = vadd.f32 %v1845_v31, %v1815_v54  ;;  %v1716_v44 = vmul.f32 0.2, %v1646_v33  ;;  %v5603_v43 = vpop.f32.mrb[40].mxu1 }
 0x434   :  { %v8015_v36 = vmax.f32 %v1651_v3, %v1717_v41  ;;  %v1661_v16 = vadd.f32 %v5603_v43, %v7880_v9  ;;  %v1655_v6 = vpop.f32.mrb[41].mxu1 }
 0x435   :  { %v1847_v19 = vadd.f32 %v1846_v60, %v1816_v52  ;;  %v8018_v21 = vmax.f32 %v1646_v33, %v1716_v44  ;;  %v1778_v51 = vadd.f32 %v1777_v11, %v8003_v23  ;;  %v1656_v62 = vadd.f32 %v1655_v6, %v7880_v9 }
 0x436   :  { %v1719_v29 = vmul.f32 0.2, %v1661_v16  ;;  %v1819_v8 = vmul.f32 %v8015_v36, %v8015_v36 }
 0x437   :  { %v1779_v12 = vadd.f32 %v1778_v51, %v8018_v21  ;;  %v1818_v28 = vmul.f32 %v8018_v21, %v8018_v21  ;;  %v1848_v30 = vadd.f32 %v1847_v19, %v1817_v32  ;;  %v1718_v53 = vmul.f32 0.2, %v1656_v62  ;;  %v5606_v55 = vpop.f32.mrb[42].mxu1 }
 0x438   :  { %v8027_v0 = vmax.f32 %v1661_v16, %v1719_v29  ;;  %v1671_v25 = vadd.f32 %v5606_v55, %v7880_v9  ;;  %v1665_v48 = vpop.f32.mrb[43].mxu1 }
 0x439   :  { %v1849_v59 = vadd.f32 %v1848_v30, %v1818_v28  ;;  %v8030_v18 = vmax.f32 %v1656_v62, %v1718_v53  ;;  %v1780_v50 = vadd.f32 %v1779_v12, %v8015_v36  ;;  %v1666_v54 = vadd.f32 %v1665_v48, %v7880_v9 }
 0x43a   :  { %v1721_v3 = vmul.f32 0.2, %v1671_v25  ;;  %v1821_v11 = vmul.f32 %v8027_v0, %v8027_v0 }
 0x43b   :  { %v1781_v2 = vadd.f32 %v1780_v50, %v8030_v18  ;;  %v1820_v31 = vmul.f32 %v8030_v18, %v8030_v18  ;;  %v1850_v63 = vadd.f32 %v1849_v59, %v1819_v8  ;;  %v1720_v33 = vmul.f32 0.2, %v1666_v54  ;;  %v5609_v41 = vpop.f32.mrb[44].mxu1 }
 0x43c   :  { %v8039_v52 = vmax.f32 %v1671_v25, %v1721_v3  ;;  %v1681_v60 = vadd.f32 %v5609_v41, %v7880_v9  ;;  %v1675_v44 = vpop.f32.mrb[45].mxu1 }
 0x43d   :  { %v1851_v43 = vadd.f32 %v1850_v63, %v1820_v31  ;;  %v8042_v32 = vmax.f32 %v1666_v54, %v1720_v33  ;;  %v1782_v16 = vadd.f32 %v1781_v2, %v8027_v0  ;;  %v1676_v6 = vadd.f32 %v1675_v44, %v7880_v9 }
 0x43e   :  { %v1723_v19 = vmul.f32 0.2, %v1681_v60  ;;  %v1823_v30 = vmul.f32 %v8039_v52, %v8039_v52 }
 0x43f   :  { %v1783_v51 = vadd.f32 %v1782_v16, %v8042_v32  ;;  %v1822_v62 = vmul.f32 %v8042_v32, %v8042_v32  ;;  %v1852_v29 = vadd.f32 %v1851_v43, %v1821_v11  ;;  %v1722_v12 = vmul.f32 0.2, %v1676_v6  ;;  %v5612_v28 = vpop.f32.mrb[46].mxu1 }
 0x440   :  { %v8051_v53 = vmax.f32 %v1681_v60, %v1723_v19  ;;  %v1691_v55 = vadd.f32 %v5612_v28, %v7880_v9  ;;  %v1685_v8 = vpop.f32.mrb[47].mxu1 }
 0x441   :  { %v1853_v25 = vadd.f32 %v1852_v29, %v1822_v62  ;;  %v8054_v48 = vmax.f32 %v1676_v6, %v1722_v12  ;;  %v1784_v59 = vadd.f32 %v1783_v51, %v8039_v52  ;;  %v1686_v50 = vadd.f32 %v1685_v8, %v7880_v9 }
 0x442   :  { %v1725_v54 = vmul.f32 0.2, %v1691_v55  ;;  %v1825_v33 = vmul.f32 %v8051_v53, %v8051_v53 }
 0x443   :  { %v1785_v3 = vadd.f32 %v1784_v59, %v8054_v48  ;;  %v1824_v2 = vmul.f32 %v8054_v48, %v8054_v48  ;;  %v1854_v31 = vadd.f32 %v1853_v25, %v1823_v30  ;;  %v1724_v63 = vmul.f32 0.2, %v1686_v50 }
 0x444   :  { %v8063_v11 = vmax.f32 %v1691_v55, %v1725_v54 }
 0x445   :  { %v1855_v41 = vadd.f32 %v1854_v31, %v1824_v2  ;;  %v8065_v60 = vmax.f32 %v1686_v50, %v1724_v63  ;;  %v1786_v44 = vadd.f32 %v1785_v3, %v8051_v53 }
 0x446   :  { %v1827_v6 = vmul.f32 %v8063_v11, %v8063_v11 }
 0x447   :  { %v1787_v9 = vadd.f32 %v1786_v44, %v8065_v60  ;;  %v1826_v43 = vmul.f32 %v8065_v60, %v8065_v60  ;;  %v1856_v16 = vadd.f32 %v1855_v41, %v1825_v33 }
 0x449   :  { %v1788_v19 = vadd.f32 %v1787_v9, %v8063_v11  ;;  %v1857_v51 = vadd.f32 %v1856_v16, %v1826_v43  ;;  %v8075_v43 = vsub.s32 7, %v9858_v34 }
 0x44b   :  { %v1789_v62 = vrot.slane %v1788_v19, 4  ;;  %v1858_v29 = vadd.f32 %v1857_v51, %v1827_v6 }
 0x44d   :  { %v1790_v12 = vadd.f32 %v1789_v62, %v1788_v19  ;;  %v1859_v28 = vrot.slane %v1858_v29, 4  ;;  %v8084_v62 = vld [vmem:[%s9832_s2 + $0x8] sm:$0xff] }
 0x44f   :  { %v1791_v30 = vrot.slane %v1790_v12, 2  ;;  %v1860_v55 = vadd.f32 %v1859_v28, %v1858_v29 }
 0x451   :  { %v1792_v8 = vadd.f32 %v1791_v30, %v1790_v12  ;;  %v1861_v25 = vrot.slane %v1860_v55, 2 }
 0x453   :  { %v1793_v59 = vrot.slane %v1792_v8, 1  ;;  %v1862_v50 = vadd.f32 %v1861_v25, %v1860_v55 }
 0x455   :  { %v1794_v54 = vadd.f32 %v1793_v59, %v1792_v8  ;;  %v1863_v3 = vrot.slane %v1862_v50, 1  ;;  %v9860_v59 = vld [vmem:[#allocation6_spill] sm:$0xff] }
 0x457   :  { %v1795_v2 = vmul.f32 0.00390625, %v1794_v54  ;;  %v1864_v31 = vadd.f32 %v1863_v3, %v1862_v50 }
 0x459   :  { %v1865_v63 = vmul.f32 0.00390625, %v1864_v31  ;;  %v1866_v33 = vmul.f32 %v1795_v2, %v1795_v2 }
 0x45b   :  { %v1867_v41 = vsub.f32 %v1865_v63, %v1866_v33 }
 0x45d   :  { %v1868_v44 = vmax.f32 %v1867_v41, 0.0 }
 0x45f   :  { %v1869_v9 = vadd.f32 1e-05, %v1868_v44 }
 0x461   :  { %6549 = vrsqrt.f32 %v1869_v9 }
 0x46b   :  { %v6550_v16 = vpop.eup %6549 }
 0x46c   :  { %v1871_v6 = vmul.f32 %v7876_v45, %v6550_v16 }
 0x46e   :  { %v1872_v19 = vmul.f32 %v1871_v6, %v1795_v2  ;;  %v8079_v51 = vrot.slane %v1871_v6, %v8075_v43 }
 0x470   :  { %v1874_v29 = vrot.slane %v1872_v19, 7  ;;  %v1882_v12 = vmul.f32 %v8079_v51, %v7884_v49  ;;  %v1881_v34 = vmul.f32 %v8079_v51, %v7887_v35  ;;  %v1883_v28 = vmul.f32 %v8079_v51, %v7899_v15 }
 0x471   :  { %v1884_v45 = vmul.f32 %v8079_v51, %v7894_v4  ;;  %v1885_v30 = vmul.f32 %v8079_v51, %v7910_v5  ;;  %v1886_v55 = vmul.f32 %v8079_v51, %v7907_v10  ;;  %v1887_v8 = vmul.f32 %v8079_v51, %v7922_v56 }
 0x472   :  { %v1876_v49 = vsub.f32 %v8084_v62, %v1874_v29  ;;  %v1888_v35 = vmul.f32 %v8079_v51, %v7919_v27  ;;  %v1889_v15 = vmul.f32 %v8079_v51, %v7934_v22  ;;  %v1890_v4 = vmul.f32 %v8079_v51, %v7931_v57 }
 0x473   :  { %v1891_v5 = vmul.f32 %v8079_v51, %v7946_v42  ;;  %v1892_v10 = vmul.f32 %v8079_v51, %v7943_v24  ;;  %v1893_v56 = vmul.f32 %v8079_v51, %v7958_v13  ;;  %v1894_v25 = vmul.f32 %v8079_v51, %v7955_v37 }
 0x474   :  { %v1916_v27 = vrot.slane %v1876_v49, %v9860_v59  ;;  %v1895_v22 = vmul.f32 %v8079_v51, %v7970_v17  ;;  %v1896_v57 = vmul.f32 %v8079_v51, %v7967_v46  ;;  %v1897_v42 = vmul.f32 %v8079_v51, %v7982_v26 }
 0x475   :  { %v1898_v24 = vmul.f32 %v8079_v51, %v7979_v14  ;;  %v1899_v13 = vmul.f32 %v8079_v51, %v7994_v39  ;;  %v1900_v37 = vmul.f32 %v8079_v51, %v7991_v40  ;;  %v1901_v50 = vmul.f32 %v8079_v51, %v8006_v61 }
 0x476   :  { %v1918_v54 = vadd.f32 %v1916_v27, %v1882_v12  ;;  %v1917_v17 = vadd.f32 %v1916_v27, %v1881_v34  ;;  %v1919_v3 = vadd.f32 %v1916_v27, %v1883_v28  ;;  %v1920_v2 = vadd.f32 %v1916_v27, %v1884_v45 }
 0x477   :  { %v1921_v46 = vadd.f32 %v1916_v27, %v1885_v30  ;;  %v1922_v31 = vadd.f32 %v1916_v27, %v1886_v55  ;;  %v1923_v63 = vadd.f32 %v1916_v27, %v1887_v8  ;;  %v1924_v26 = vadd.f32 %v1916_v27, %v1888_v35 }
 0x478   :  { %5645 = vmatprep.mubr.f32.mxu0 %v1917_v17  ;;  %v1925_v33 = vadd.f32 %v1916_v27, %v1889_v15  ;;  %v1926_v14 = vadd.f32 %v1916_v27, %v1890_v4  ;;  %v1927_v41 = vadd.f32 %v1916_v27, %v1891_v5  ;;  %v1928_v44 = vadd.f32 %v1916_v27, %v1892_v10  ;;  %v2460_v17 = vld [vmem:[#allocation2 + $0x248] sm:$0xff] }
 0x479   :  { %5646 = vmatmul.mubr.f32.vlgmr.msra.gmra.mrb[16].mxu0 %v1918_v54  ;;  %v1929_v39 = vadd.f32 %v1916_v27, %v1893_v56  ;;  %v1930_v9 = vadd.f32 %v1916_v27, %v1894_v25  ;;  %v1931_v40 = vadd.f32 %v1916_v27, %v1895_v22  ;;  %v1932_v16 = vadd.f32 %v1916_v27, %v1896_v57  ;;  %v2455_v57 = vld [vmem:[#allocation2 + $0x220] sm:$0xff] }
 0x47a   :  { %5648 = vmatprep.mubr.f32.mxu0 %v1919_v3  ;;  %v1933_v61 = vadd.f32 %v1916_v27, %v1897_v42  ;;  %v1934_v6 = vadd.f32 %v1916_v27, %v1898_v24  ;;  %v1935_v19 = vadd.f32 %v1916_v27, %v1899_v13  ;;  %v1936_v29 = vadd.f32 %v1916_v27, %v1900_v37  ;;  %v2456_v42 = vld [vmem:[#allocation2 + $0x228] sm:$0xff]  ;;  %v2457_v13 = vld [vmem:[#allocation2 + $0x230] sm:$0xff]  ;;  %v2458_v37 = vld [vmem:[#allocation2 + $0x238] sm:$0xff] }
 0x47b   :  { %v1937_v12 = vadd.f32 %v1916_v27, %v1901_v50  ;;  %v1902_v34 = vmul.f32 %v8079_v51, %v8003_v23  ;;  %v1903_v28 = vmul.f32 %v8079_v51, %v8018_v21  ;;  %v1904_v45 = vmul.f32 %v8079_v51, %v8015_v36  ;;  %v2459_v54 = vld [vmem:[#allocation2 + $0x240] sm:$0xff] }
 0x47c   :  { %v1905_v30 = vmul.f32 %v8079_v51, %v8030_v18  ;;  %v1906_v55 = vmul.f32 %v8079_v51, %v8027_v0  ;;  %v1907_v8 = vmul.f32 %v8079_v51, %v8042_v32  ;;  %v1908_v49 = vmul.f32 %v8079_v51, %v8039_v52 }
 0x47d   :  { %5649 = vmatmul.mubr.f32.gmra.mrb[18].mxu0 %v1920_v2  ;;  %v1938_v23 = vadd.f32 %v1916_v27, %v1902_v34  ;;  %v1939_v35 = vadd.f32 %v1916_v27, %v1903_v28  ;;  %v1940_v15 = vadd.f32 %v1916_v27, %v1904_v45  ;;  %v1909_v21 = vmul.f32 %v8079_v51, %v8054_v48  ;;  %v2452_v48 = vld [vmem:[#allocation2 + $0x208] sm:$0xff]  ;;  %v2461_v2 = vld [vmem:[#allocation2 + $0x250] sm:$0xff] }
 0x47e   :  { %5651 = vmatprep.mubr.f32.mxu0 %v1921_v46  ;;  %v1941_v36 = vadd.f32 %v1916_v27, %v1905_v30  ;;  %v1942_v4 = vadd.f32 %v1916_v27, %v1906_v55  ;;  %v1943_v18 = vadd.f32 %v1916_v27, %v1907_v8  ;;  %v1944_v5 = vadd.f32 %v1916_v27, %v1908_v49  ;;  %v2462_v46 = vld [vmem:[#allocation2 + $0x258] sm:$0xff] }
 0x47f   :  { %v1945_v10 = vadd.f32 %v1916_v27, %v1909_v21  ;;  %v1910_v0 = vmul.f32 %v8079_v51, %v8051_v53  ;;  %v1911_v32 = vmul.f32 %v8079_v51, %v8065_v60  ;;  %v1912_v52 = vmul.f32 %v8079_v51, %v8063_v11  ;;  %v2451_v53 = vld [vmem:[#allocation2 + $0x200] sm:$0xff]  ;;  %v2453_v60 = vld [vmem:[#allocation2 + $0x210] sm:$0xff]  ;;  %v2454_v51 = vld [vmem:[#allocation2 + $0x218] sm:$0xff] }
 0x480   :  { %v6269_v11 = vpack.c.bf16 %v2452_v48, %v2451_v53  ;;  %v6277_v24 = vpack.c.bf16 %v2456_v42, %v2455_v57  ;;  %v6281_v50 = vpack.c.bf16 %v2458_v37, %v2457_v13  ;;  %v6285_v3 = vpack.c.bf16 %v2460_v17, %v2459_v54 }
 0x481   :  { %5652 = vmatmul.mubr.f32.gmra.mrb[20].mxu0 %v1922_v31  ;;  %v1946_v56 = vadd.f32 %v1916_v27, %v1910_v0  ;;  %v1947_v25 = vadd.f32 %v1916_v27, %v1911_v32  ;;  %v1948_v22 = vadd.f32 %v1916_v27, %v1912_v52  ;;  %v6273_v27 = vpack.c.bf16 %v2454_v51, %v2453_v60 }
 0x482   :  { %5654 = vmatprep.mubr.f32.mxu0 %v1923_v63  ;;  %6270 = vmatprep.subr.bf16.mxu1 %v6269_v11  ;;  %v6289_v31 = vpack.c.bf16 %v2462_v46, %v2461_v2  ;;  %v2463_v63 = vld [vmem:[#allocation2 + $0x260] sm:$0xff] }
 0x483   :  { %6272 = vmatpush3.bf16.msra.mxu1 %v6269_v11 }
 0x484   :  { %6274 = vmatprep.subr.bf16.mxu1 %v6273_v27 }
 0x485   :  { %5655 = vmatmul.mubr.f32.gmra.mrb[22].mxu0 %v1924_v26  ;;  %v2464_v26 = vld [vmem:[#allocation2 + $0x268] sm:$0xff] }
 0x486   :  { %5657 = vmatprep.mubr.f32.mxu0 %v1925_v33  ;;  %v6293_v33 = vpack.c.bf16 %v2464_v26, %v2463_v63 }
 0x487   :  { %6276 = vmatpush3.bf16.msra.mxu1 %v6273_v27 }
 0x488   :  { %6278 = vmatprep.subr.bf16.mxu1 %v6277_v24 }
 0x489   :  { %5658 = vmatmul.mubr.f32.gmra.mrb[24].mxu0 %v1926_v14  ;;  %v2465_v14 = vld [vmem:[#allocation2 + $0x270] sm:$0xff] }
 0x48a   :  { %5660 = vmatprep.mubr.f32.mxu0 %v1927_v41  ;;  %v2466_v41 = vld [vmem:[#allocation2 + $0x278] sm:$0xff] }
 0x48b   :  { %6280 = vmatpush3.bf16.msra.mxu1 %v6277_v24 }
 0x48c   :  { %6282 = vmatprep.subr.bf16.mxu1 %v6281_v50 }
 0x48d   :  { %5661 = vmatmul.mubr.f32.gmra.mrb[26].mxu0 %v1928_v44  ;;  %v6297_v44 = vpack.c.bf16 %v2466_v41, %v2465_v14 }
 0x48e   :  { %5663 = vmatprep.mubr.f32.mxu0 %v1929_v39  ;;  %v8154_v39 = vrot.slane %v8084_v62, %v6816_v38 }
 0x48f   :  { %6284 = vmatpush3.bf16.msra.mxu1 %v6281_v50 }
 0x490   :  { %6286 = vmatprep.subr.bf16.mxu1 %v6285_v3 }
 0x491   :  { %5664 = vmatmul.mubr.f32.gmra.mrb[28].mxu0 %v1930_v9 }
 0x492   :  { %5666 = vmatprep.mubr.f32.mxu0 %v1931_v40 }
 0x493   :  { %6288 = vmatpush3.bf16.msra.mxu1 %v6285_v3 }
 0x494   :  { %6290 = vmatprep.subr.bf16.mxu1 %v6289_v31 }
 0x495   :  { %5667 = vmatmul.mubr.f32.gmra.mrb[30].mxu0 %v1932_v16 }
 0x496   :  { %5669 = vmatprep.mubr.f32.mxu0 %v1933_v61 }
 0x497   :  { %6292 = vmatpush3.bf16.msra.mxu1 %v6289_v31 }
 0x498   :  { %6294 = vmatprep.subr.bf16.mxu1 %v6293_v33 }
 0x499   :  { %5670 = vmatmul.mubr.f32.gmra.mrb[32].mxu0 %v1934_v6 }
 0x49a   :  { %5672 = vmatprep.mubr.f32.mxu0 %v1935_v19 }
 0x49b   :  { %6296 = vmatpush3.bf16.msra.mxu1 %v6293_v33 }
 0x49c   :  { %6298 = vmatprep.subr.bf16.mxu1 %v6297_v44 }
 0x49d   :  { %5673 = vmatmul.mubr.f32.gmra.mrb[34].mxu0 %v1936_v29 }
 0x49e   :  { %5675 = vmatprep.mubr.f32.mxu0 %v1937_v12 }
 0x49f   :  { %6300 = vmatpush3.bf16.msra.mxu1 %v6297_v44 }
 0x4a1   :  { %5676 = vmatmul.mubr.f32.gmra.mrb[36].mxu0 %v1938_v23 }
 0x4a2   :  { %5678 = vmatprep.mubr.f32.mxu0 %v1939_v35 }
 0x4a5   :  { %5679 = vmatmul.mubr.f32.gmra.mrb[38].mxu0 %v1940_v15 }
 0x4a6   :  { %5681 = vmatprep.mubr.f32.mxu0 %v1941_v36 }
 0x4a9   :  { %5682 = vmatmul.mubr.f32.gmra.mrb[40].mxu0 %v1942_v4 }
 0x4aa   :  { %5684 = vmatprep.mubr.f32.mxu0 %v1943_v18 }
 0x4ad   :  { %5685 = vmatmul.mubr.f32.gmra.mrb[42].mxu0 %v1944_v5 }
 0x4ae   :  { %5687 = vmatprep.mubr.f32.mxu0 %v1945_v10 }
 0x4b1   :  { %5688 = vmatmul.mubr.f32.gmra.mrb[44].mxu0 %v1946_v56 }
 0x4b2   :  { %5690 = vmatprep.mubr.f32.mxu0 %v1947_v25 }
 0x4b5   :  { %5691 = vmatmul.mubr.f32.gmra.mrb[46].mxu0 %v1948_v22 }
 0x54c   :  { %v5647_v9 = vpop.f32.mrb[16].mxu0 }
 0x54d   :  { %v2042_v40 = vadd.f32 %v5647_v9, %v8154_v39  ;;  %v2036_v16 = vpop.f32.mrb[17].mxu0 }
 0x54e   :  { %v2037_v61 = vadd.f32 %v2036_v16, %v8154_v39 }
 0x54f   :  { %v2196_v6 = vmul.f32 0.2, %v2042_v40 }
 0x550   :  { %v2195_v19 = vmul.f32 0.2, %v2037_v61  ;;  %v5650_v29 = vpop.f32.mrb[18].mxu0 }
 0x551   :  { %v8158_v12 = vmax.f32 %v2042_v40, %v2196_v6  ;;  %v2052_v34 = vadd.f32 %v5650_v29, %v8154_v39  ;;  %v2046_v28 = vpop.f32.mrb[19].mxu0 }
 0x552   :  { %v8161_v45 = vmax.f32 %v2037_v61, %v2195_v19  ;;  %v2047_v30 = vadd.f32 %v2046_v28, %v8154_v39 }
 0x553   :  { %v2198_v55 = vmul.f32 0.2, %v2052_v34  ;;  %v2298_v8 = vmul.f32 %v8158_v12, %v8158_v12 }
 0x554   :  { %v2297_v49 = vmul.f32 %v8161_v45, %v8161_v45  ;;  %v2197_v23 = vmul.f32 0.2, %v2047_v30  ;;  %v5653_v35 = vpop.f32.mrb[20].mxu0  ;;  %v2259_v4 = vadd.f32 %v8158_v12, %v8161_v45 }
 0x555   :  { %v8168_v15 = vmax.f32 %v2052_v34, %v2198_v55  ;;  %v2062_v21 = vadd.f32 %v5653_v35, %v8154_v39  ;;  %v2056_v36 = vpop.f32.mrb[21].mxu0 }
 0x556   :  { %v8173_v18 = vmax.f32 %v2047_v30, %v2197_v23  ;;  %v2057_v5 = vadd.f32 %v2056_v36, %v8154_v39  ;;  %v2329_v0 = vadd.f32 %v2298_v8, %v2297_v49 }
 0x557   :  { %v2200_v10 = vmul.f32 0.2, %v2062_v21  ;;  %v2300_v22 = vmul.f32 %v8168_v15, %v8168_v15 }
 0x558   :  { %v2260_v32 = vadd.f32 %v2259_v4, %v8173_v18  ;;  %v2299_v52 = vmul.f32 %v8173_v18, %v8173_v18  ;;  %v2199_v56 = vmul.f32 0.2, %v2057_v5  ;;  %v5656_v25 = vpop.f32.mrb[22].mxu0 }
 0x559   :  { %v8181_v53 = vmax.f32 %v2062_v21, %v2200_v10  ;;  %v2072_v48 = vadd.f32 %v5656_v25, %v8154_v39  ;;  %v2066_v11 = vpop.f32.mrb[23].mxu0 }
 0x55a   :  { %v2330_v60 = vadd.f32 %v2329_v0, %v2299_v52  ;;  %v8184_v51 = vmax.f32 %v2057_v5, %v2199_v56  ;;  %v2261_v27 = vadd.f32 %v2260_v32, %v8168_v15  ;;  %v2067_v57 = vadd.f32 %v2066_v11, %v8154_v39 }
 0x55b   :  { %v2202_v42 = vmul.f32 0.2, %v2072_v48  ;;  %v2302_v17 = vmul.f32 %v8181_v53, %v8181_v53 }
 0x55c   :  { %v2262_v24 = vadd.f32 %v2261_v27, %v8184_v51  ;;  %v2301_v13 = vmul.f32 %v8184_v51, %v8184_v51  ;;  %v2331_v37 = vadd.f32 %v2330_v60, %v2300_v22  ;;  %v2201_v50 = vmul.f32 0.2, %v2067_v57  ;;  %v5659_v54 = vpop.f32.mrb[24].mxu0 }
 0x55d   :  { %v8193_v3 = vmax.f32 %v2072_v48, %v2202_v42  ;;  %v2082_v2 = vadd.f32 %v5659_v54, %v8154_v39  ;;  %v2076_v46 = vpop.f32.mrb[25].mxu0 }
 0x55e   :  { %v2332_v31 = vadd.f32 %v2331_v37, %v2301_v13  ;;  %v8196_v63 = vmax.f32 %v2067_v57, %v2201_v50  ;;  %v2263_v26 = vadd.f32 %v2262_v24, %v8181_v53  ;;  %v2077_v33 = vadd.f32 %v2076_v46, %v8154_v39 }
 0x55f   :  { %v2204_v14 = vmul.f32 0.2, %v2082_v2  ;;  %v2304_v61 = vmul.f32 %v8193_v3, %v8193_v3 }
 0x560   :  { %v2264_v41 = vadd.f32 %v2263_v26, %v8196_v63  ;;  %v2303_v44 = vmul.f32 %v8196_v63, %v8196_v63  ;;  %v2333_v9 = vadd.f32 %v2332_v31, %v2302_v17  ;;  %v2203_v40 = vmul.f32 0.2, %v2077_v33  ;;  %v5662_v16 = vpop.f32.mrb[26].mxu0 }
 0x561   :  { %v8205_v6 = vmax.f32 %v2082_v2, %v2204_v14  ;;  %v2092_v19 = vadd.f32 %v5662_v16, %v8154_v39  ;;  %v2086_v29 = vpop.f32.mrb[27].mxu0 }
 0x562   :  { %v2334_v34 = vadd.f32 %v2333_v9, %v2303_v44  ;;  %v8208_v28 = vmax.f32 %v2077_v33, %v2203_v40  ;;  %v2265_v30 = vadd.f32 %v2264_v41, %v8193_v3  ;;  %v2087_v55 = vadd.f32 %v2086_v29, %v8154_v39 }
 0x563   :  { %v2206_v8 = vmul.f32 0.2, %v2092_v19  ;;  %v2306_v4 = vmul.f32 %v8205_v6, %v8205_v6 }
 0x564   :  { %v2266_v49 = vadd.f32 %v2265_v30, %v8208_v28  ;;  %v2305_v23 = vmul.f32 %v8208_v28, %v8208_v28  ;;  %v2335_v35 = vadd.f32 %v2334_v34, %v2304_v61  ;;  %v2205_v21 = vmul.f32 0.2, %v2087_v55  ;;  %v5665_v36 = vpop.f32.mrb[28].mxu0 }
 0x565   :  { %v8217_v5 = vmax.f32 %v2092_v19, %v2206_v8  ;;  %v2102_v10 = vadd.f32 %v5665_v36, %v8154_v39  ;;  %v2096_v0 = vpop.f32.mrb[29].mxu0 }
 0x566   :  { %v2336_v32 = vadd.f32 %v2335_v35, %v2305_v23  ;;  %v8220_v52 = vmax.f32 %v2087_v55, %v2205_v21  ;;  %v2267_v56 = vadd.f32 %v2266_v49, %v8205_v6  ;;  %v2097_v25 = vadd.f32 %v2096_v0, %v8154_v39 }
 0x567   :  { %v2208_v22 = vmul.f32 0.2, %v2102_v10  ;;  %v2308_v42 = vmul.f32 %v8217_v5, %v8217_v5 }
 0x568   :  { %v2268_v48 = vadd.f32 %v2267_v56, %v8220_v52  ;;  %v2307_v11 = vmul.f32 %v8220_v52, %v8220_v52  ;;  %v2337_v60 = vadd.f32 %v2336_v32, %v2306_v4  ;;  %v2207_v27 = vmul.f32 0.2, %v2097_v25  ;;  %v5668_v57 = vpop.f32.mrb[30].mxu0 }
 0x569   :  { %v8229_v24 = vmax.f32 %v2102_v10, %v2208_v22  ;;  %v2112_v13 = vadd.f32 %v5668_v57, %v8154_v39  ;;  %v2106_v37 = vpop.f32.mrb[31].mxu0 }
 0x56a   :  { %v2338_v50 = vadd.f32 %v2337_v60, %v2307_v11  ;;  %v8232_v54 = vmax.f32 %v2097_v25, %v2207_v27  ;;  %v2269_v17 = vadd.f32 %v2268_v48, %v8217_v5  ;;  %v2107_v2 = vadd.f32 %v2106_v37, %v8154_v39 }
 0x56b   :  { %v2210_v46 = vmul.f32 0.2, %v2112_v13  ;;  %v2310_v44 = vmul.f32 %v8229_v24, %v8229_v24 }
 0x56c   :  { %v2270_v31 = vadd.f32 %v2269_v17, %v8232_v54  ;;  %v2309_v26 = vmul.f32 %v8232_v54, %v8232_v54  ;;  %v2339_v33 = vadd.f32 %v2338_v50, %v2308_v42  ;;  %v2209_v14 = vmul.f32 0.2, %v2107_v2  ;;  %v5671_v41 = vpop.f32.mrb[32].mxu0 }
 0x56d   :  { %v8241_v9 = vmax.f32 %v2112_v13, %v2210_v46  ;;  %v2122_v40 = vadd.f32 %v5671_v41, %v8154_v39  ;;  %v2116_v16 = vpop.f32.mrb[33].mxu0 }
 0x56e   :  { %v2340_v61 = vadd.f32 %v2339_v33, %v2309_v26  ;;  %v8244_v19 = vmax.f32 %v2107_v2, %v2209_v14  ;;  %v2271_v29 = vadd.f32 %v2270_v31, %v8229_v24  ;;  %v2117_v34 = vadd.f32 %v2116_v16, %v8154_v39 }
 0x56f   :  { %v2212_v30 = vmul.f32 0.2, %v2122_v40  ;;  %v2312_v21 = vmul.f32 %v8241_v9, %v8241_v9 }
 0x570   :  { %v2272_v55 = vadd.f32 %v2271_v29, %v8244_v19  ;;  %v2311_v8 = vmul.f32 %v8244_v19, %v8244_v19  ;;  %v2341_v49 = vadd.f32 %v2340_v61, %v2310_v44  ;;  %v2211_v23 = vmul.f32 0.2, %v2117_v34  ;;  %v5674_v35 = vpop.f32.mrb[34].mxu0 }
 0x571   :  { %v8253_v36 = vmax.f32 %v2122_v40, %v2212_v30  ;;  %v2132_v4 = vadd.f32 %v5674_v35, %v8154_v39  ;;  %v2126_v10 = vpop.f32.mrb[35].mxu0 }
 0x572   :  { %v2342_v0 = vadd.f32 %v2341_v49, %v2311_v8  ;;  %v8256_v32 = vmax.f32 %v2117_v34, %v2211_v23  ;;  %v2273_v56 = vadd.f32 %v2272_v55, %v8241_v9  ;;  %v2127_v25 = vadd.f32 %v2126_v10, %v8154_v39 }
 0x573   :  { %v2214_v22 = vmul.f32 0.2, %v2132_v4  ;;  %v2314_v42 = vmul.f32 %v8253_v36, %v8253_v36 }
 0x574   :  { %v2274_v48 = vadd.f32 %v2273_v56, %v8256_v32  ;;  %v2313_v11 = vmul.f32 %v8256_v32, %v8256_v32  ;;  %v2343_v60 = vadd.f32 %v2342_v0, %v2312_v21  ;;  %v2213_v27 = vmul.f32 0.2, %v2127_v25  ;;  %v5677_v57 = vpop.f32.mrb[36].mxu0 }
 0x575   :  { %v8265_v13 = vmax.f32 %v2132_v4, %v2214_v22  ;;  %v2142_v37 = vadd.f32 %v5677_v57, %v8154_v39  ;;  %v2136_v50 = vpop.f32.mrb[37].mxu0 }
 0x576   :  { %v2344_v17 = vadd.f32 %v2343_v60, %v2313_v11  ;;  %v8268_v2 = vmax.f32 %v2127_v25, %v2213_v27  ;;  %v2275_v46 = vadd.f32 %v2274_v48, %v8253_v36  ;;  %v2137_v31 = vadd.f32 %v2136_v50, %v8154_v39  ;;  %v2732_v50 = vld [vmem:[#allocation2 + $0x290] sm:$0xff] }
 0x577   :  { %v2216_v26 = vmul.f32 0.2, %v2142_v37  ;;  %v2316_v16 = vmul.f32 %v8265_v13, %v8265_v13 }
 0x578   :  { %v2276_v33 = vadd.f32 %v2275_v46, %v8268_v2  ;;  %v2315_v14 = vmul.f32 %v8268_v2, %v8268_v2  ;;  %v2345_v41 = vadd.f32 %v2344_v17, %v2314_v42  ;;  %v2215_v44 = vmul.f32 0.2, %v2137_v31  ;;  %v5680_v40 = vpop.f32.mrb[38].mxu0  ;;  %v2730_v42 = vld [vmem:[#allocation2 + $0x280] sm:$0xff] }
 0x579   :  { %v8277_v61 = vmax.f32 %v2142_v37, %v2216_v26  ;;  %v2152_v29 = vadd.f32 %v5680_v40, %v8154_v39  ;;  %v2146_v34 = vpop.f32.mrb[39].mxu0  ;;  %v2731_v37 = vld [vmem:[#allocation2 + $0x288] sm:$0xff]  ;;  %v2734_v40 = vld [vmem:[#allocation2 + $0x2a0] sm:$0xff] }
 0x57a   :  { %v2346_v30 = vadd.f32 %v2345_v41, %v2315_v14  ;;  %v8280_v55 = vmax.f32 %v2137_v31, %v2215_v44  ;;  %v2277_v8 = vadd.f32 %v2276_v33, %v8265_v13  ;;  %v2147_v49 = vadd.f32 %v2146_v34, %v8154_v39  ;;  %v2733_v31 = vld [vmem:[#allocation2 + $0x298] sm:$0xff] }
 0x57b   :  { %v2218_v23 = vmul.f32 0.2, %v2152_v29  ;;  %v2318_v56 = vmul.f32 %v8277_v61, %v8277_v61  ;;  %v6301_v46 = vpack.c.bf16 %v2731_v37, %v2730_v42  ;;  %v2736_v42 = vld [vmem:[#allocation2 + $0x2b0] sm:$0xff]  ;;  %v2737_v37 = vld [vmem:[#allocation2 + $0x2b8] sm:$0xff] }
 0x57c   :  { %v2278_v35 = vadd.f32 %v2277_v8, %v8280_v55  ;;  %v2317_v21 = vmul.f32 %v8280_v55, %v8280_v55  ;;  %v2347_v4 = vadd.f32 %v2346_v30, %v2316_v16  ;;  %v2217_v10 = vmul.f32 0.2, %v2147_v49  ;;  %v5683_v0 = vpop.f32.mrb[40].mxu0  ;;  %v2735_v16 = vld [vmem:[#allocation2 + $0x2a8] sm:$0xff] }
 0x57d   :  { %v8289_v25 = vmax.f32 %v2152_v29, %v2218_v23  ;;  %v2162_v22 = vadd.f32 %v5683_v0, %v8154_v39  ;;  %v2156_v48 = vpop.f32.mrb[41].mxu0  ;;  %6302 = vmatprep.subr.bf16.mxu0 %v6301_v46  ;;  %v6309_v0 = vpack.c.bf16 %v2735_v16, %v2734_v40 }
 0x57e   :  { %v2348_v11 = vadd.f32 %v2347_v4, %v2317_v21  ;;  %v8292_v60 = vmax.f32 %v2147_v49, %v2217_v10  ;;  %v2279_v27 = vadd.f32 %v2278_v35, %v8277_v61  ;;  %v2157_v57 = vadd.f32 %v2156_v48, %v8154_v39  ;;  %6304 = vmatpush3.bf16.msra.mxu0 %v6301_v46 }
 0x57f   :  { %v2220_v17 = vmul.f32 0.2, %v2162_v22  ;;  %v2320_v29 = vmul.f32 %v8289_v25, %v8289_v25  ;;  %v6305_v49 = vpack.c.bf16 %v2733_v31, %v2732_v50 }
 0x580   :  { %v2280_v26 = vadd.f32 %v2279_v27, %v8292_v60  ;;  %v2319_v33 = vmul.f32 %v8292_v60, %v8292_v60  ;;  %v2349_v14 = vadd.f32 %v2348_v11, %v2318_v56  ;;  %v2219_v41 = vmul.f32 0.2, %v2157_v57  ;;  %v5686_v44 = vpop.f32.mrb[42].mxu0 }
 0x581   :  { %v8301_v34 = vmax.f32 %v2162_v22, %v2220_v17  ;;  %v2172_v30 = vadd.f32 %v5686_v44, %v8154_v39  ;;  %v2166_v8 = vpop.f32.mrb[43].mxu0  ;;  %6306 = vmatprep.subr.bf16.mxu0 %v6305_v49  ;;  %v6313_v44 = vpack.c.bf16 %v2737_v37, %v2736_v42 }
 0x582   :  { %v2350_v23 = vadd.f32 %v2349_v14, %v2319_v33  ;;  %v8304_v35 = vmax.f32 %v2157_v57, %v2219_v41  ;;  %v2281_v21 = vadd.f32 %v2280_v26, %v8289_v25  ;;  %v2167_v4 = vadd.f32 %v2166_v8, %v8154_v39  ;;  %6308 = vmatpush3.bf16.msra.mxu0 %v6305_v49 }
 0x583   :  { %v2222_v10 = vmul.f32 0.2, %v2172_v30  ;;  %v2322_v57 = vmul.f32 %v8301_v34, %v8301_v34  ;;  %6310 = vmatprep.subr.bf16.mxu0 %v6309_v0 }
 0x584   :  { %v2282_v56 = vadd.f32 %v2281_v21, %v8304_v35  ;;  %v2321_v22 = vmul.f32 %v8304_v35, %v8304_v35  ;;  %v2351_v48 = vadd.f32 %v2350_v23, %v2320_v29  ;;  %v2221_v11 = vmul.f32 0.2, %v2167_v4  ;;  %v5689_v27 = vpop.f32.mrb[44].mxu0  ;;  %v2738_v23 = vld [vmem:[#allocation2 + $0x2c0] sm:$0xff]  ;;  %v2739_v21 = vld [vmem:[#allocation2 + $0x2c8] sm:$0xff] }
 0x585   :  { %v8313_v50 = vmax.f32 %v2172_v30, %v2222_v10  ;;  %v2182_v17 = vadd.f32 %v5689_v27, %v8154_v39  ;;  %v2176_v46 = vpop.f32.mrb[45].mxu0  ;;  %v6317_v37 = vpack.c.bf16 %v2739_v21, %v2738_v23  ;;  %v2742_v21 = vld [vmem:[#allocation2 + $0x2e0] sm:$0xff] }
 0x586   :  { %v2352_v31 = vadd.f32 %v2351_v48, %v2321_v22  ;;  %v8316_v26 = vmax.f32 %v2167_v4, %v2221_v11  ;;  %v2283_v33 = vadd.f32 %v2282_v56, %v8301_v34  ;;  %v2177_v14 = vadd.f32 %v2176_v46, %v8154_v39  ;;  %6312 = vmatpush3.bf16.msra.mxu0 %v6309_v0 }
 0x587   :  { %v2224_v41 = vmul.f32 0.2, %v2182_v17  ;;  %v2324_v4 = vmul.f32 %v8313_v50, %v8313_v50  ;;  %6314 = vmatprep.subr.bf16.mxu0 %v6313_v44 }
 0x588   :  { %v2284_v40 = vadd.f32 %v2283_v33, %v8316_v26  ;;  %v2323_v16 = vmul.f32 %v8316_v26, %v8316_v26  ;;  %v2353_v29 = vadd.f32 %v2352_v31, %v2322_v57  ;;  %v2223_v30 = vmul.f32 0.2, %v2177_v14  ;;  %v5692_v8 = vpop.f32.mrb[46].mxu0  ;;  %v2740_v33 = vld [vmem:[#allocation2 + $0x2d0] sm:$0xff] }
 0x589   :  { %v8325_v10 = vmax.f32 %v2182_v17, %v2224_v41  ;;  %v2192_v49 = vadd.f32 %v5692_v8, %v8154_v39  ;;  %v2186_v56 = vpop.f32.mrb[47].mxu0  ;;  %v2741_v41 = vld [vmem:[#allocation2 + $0x2d8] sm:$0xff] }
 0x58a   :  { %v2354_v22 = vadd.f32 %v2353_v29, %v2323_v16  ;;  %v8328_v48 = vmax.f32 %v2177_v14, %v2223_v30  ;;  %v2285_v11 = vadd.f32 %v2284_v40, %v8313_v50  ;;  %v2187_v27 = vadd.f32 %v2186_v56, %v8154_v39  ;;  %6316 = vmatpush3.bf16.msra.mxu0 %v6313_v44 }
 0x58b   :  { %v2226_v42 = vmul.f32 0.2, %v2192_v49  ;;  %v2326_v14 = vmul.f32 %v8325_v10, %v8325_v10  ;;  %6318 = vmatprep.subr.bf16.mxu0 %v6317_v37  ;;  %v6321_v29 = vpack.c.bf16 %v2741_v41, %v2740_v33 }
 0x58c   :  { %v2286_v57 = vadd.f32 %v2285_v11, %v8328_v48  ;;  %v2325_v17 = vmul.f32 %v8328_v48, %v8328_v48  ;;  %v2355_v46 = vadd.f32 %v2354_v22, %v2324_v4  ;;  %v2225_v31 = vmul.f32 0.2, %v2187_v27  ;;  %v2743_v4 = vld [vmem:[#allocation2 + $0x2e8] sm:$0xff] }
 0x58d   :  { %v8337_v40 = vmax.f32 %v2192_v49, %v2226_v42  ;;  %v6325_v11 = vpack.c.bf16 %v2743_v4, %v2742_v21  ;;  %v2744_v42 = vld [vmem:[#allocation2 + $0x2f0] sm:$0xff] }
 0x58e   :  { %v2356_v16 = vadd.f32 %v2355_v46, %v2325_v17  ;;  %v8339_v39 = vmax.f32 %v2187_v27, %v2225_v31  ;;  %v2287_v0 = vadd.f32 %v2286_v57, %v8325_v10  ;;  %6320 = vmatpush3.bf16.msra.mxu0 %v6317_v37  ;;  %v2745_v57 = vld [vmem:[#allocation2 + $0x2f8] sm:$0xff] }
 0x58f   :  { %v2328_v56 = vmul.f32 %v8337_v40, %v8337_v40  ;;  %6322 = vmatprep.subr.bf16.mxu0 %v6321_v29  ;;  %v6329_v31 = vpack.c.bf16 %v2745_v57, %v2744_v42 }
 0x590   :  { %v2288_v30 = vadd.f32 %v2287_v0, %v8339_v39  ;;  %v2327_v8 = vmul.f32 %v8339_v39, %v8339_v39  ;;  %v2357_v23 = vadd.f32 %v2356_v16, %v2326_v14 }
 0x592   :  { %v2289_v49 = vadd.f32 %v2288_v30, %v8337_v40  ;;  %v2358_v22 = vadd.f32 %v2357_v23, %v2327_v8  ;;  %6324 = vmatpush3.bf16.msra.mxu0 %v6321_v29 }
 0x593   :  { %6326 = vmatprep.subr.bf16.mxu0 %v6325_v11 }
 0x594   :  { %v2290_v44 = vrot.slane %v2289_v49, 4  ;;  %v2359_v27 = vadd.f32 %v2358_v22, %v2328_v56 }
 0x596   :  { %v2291_v17 = vadd.f32 %v2290_v44, %v2289_v49  ;;  %v2360_v46 = vrot.slane %v2359_v27, 4  ;;  %6328 = vmatpush3.bf16.msra.mxu0 %v6325_v11 }
 0x597   :  { %6330 = vmatprep.subr.bf16.mxu0 %v6329_v31 }
 0x598   :  { %v2292_v33 = vrot.slane %v2291_v17, 2  ;;  %v2361_v41 = vadd.f32 %v2360_v46, %v2359_v27 }
 0x59a   :  { %v2293_v14 = vadd.f32 %v2292_v33, %v2291_v17  ;;  %v2362_v16 = vrot.slane %v2361_v41, 2  ;;  %6332 = vmatpush3.bf16.msra.mxu0 %v6329_v31 }
 0x59c   :  { %v2294_v0 = vrot.slane %v2293_v14, 1  ;;  %v2363_v30 = vadd.f32 %v2362_v16, %v2361_v41 }
 0x59e   :  { %v2295_v37 = vadd.f32 %v2294_v0, %v2293_v14  ;;  %v2364_v8 = vrot.slane %v2363_v30, 1 }
 0x5a0   :  { %v2296_v23 = vmul.f32 0.00390625, %v2295_v37  ;;  %v2365_v21 = vadd.f32 %v2364_v8, %v2363_v30 }
 0x5a2   :  { %v2366_v4 = vmul.f32 0.00390625, %v2365_v21  ;;  %v2367_v56 = vmul.f32 %v2296_v23, %v2296_v23 }
 0x5a4   :  { %v2368_v49 = vsub.f32 %v2366_v4, %v2367_v56 }
 0x5a6   :  { %v2369_v22 = vmax.f32 %v2368_v49, 0.0 }
 0x5a8   :  { %v2370_v29 = vadd.f32 1e-05, %v2369_v22 }
 0x5aa   :  { %6551 = vrsqrt.f32 %v2370_v29 }
 0x5b4   :  { %v6552_v44 = vpop.eup %6551 }
 0x5b5   :  { %v2372_v27 = vmul.f32 %v6552_v44, %v8084_v62 }
 0x5b7   :  { %v2373_v42 = vmul.f32 %v2372_v27, %v2296_v23  ;;  %v8350_v11 = vrot.slane %v2372_v27, %v9855_v58 }
 0x5b9   :  { %v2375_v57 = vrot.slane %v2373_v42, 7  ;;  %v2383_v17 = vmul.f32 %v8350_v11, %v8158_v12  ;;  %v2382_v46 = vmul.f32 %v8350_v11, %v8161_v45  ;;  %v2384_v31 = vmul.f32 %v8350_v11, %v8173_v18 }
 0x5ba   :  { %v2385_v33 = vmul.f32 %v8350_v11, %v8168_v15  ;;  %v2386_v41 = vmul.f32 %v8350_v11, %v8184_v51  ;;  %v2387_v14 = vmul.f32 %v8350_v11, %v8181_v53  ;;  %v2388_v16 = vmul.f32 %v8350_v11, %v8196_v63 }
 0x5bb   :  { %v2377_v12 = vsub.f32 %v8084_v62, %v2375_v57  ;;  %v2389_v45 = vmul.f32 %v8350_v11, %v8193_v3  ;;  %v2390_v18 = vmul.f32 %v8350_v11, %v8208_v28  ;;  %v2391_v15 = vmul.f32 %v8350_v11, %v8205_v6 }
 0x5bc   :  { %v2392_v51 = vmul.f32 %v8350_v11, %v8220_v52  ;;  %v2393_v53 = vmul.f32 %v8350_v11, %v8217_v5  ;;  %v2394_v63 = vmul.f32 %v8350_v11, %v8232_v54  ;;  %v2395_v62 = vmul.f32 %v8350_v11, %v8229_v24 }
 0x5bd   :  { %v2417_v3 = vrot.slane %v2377_v12, %v7514_v20  ;;  %v2396_v28 = vmul.f32 %v8350_v11, %v8244_v19  ;;  %v2397_v6 = vmul.f32 %v8350_v11, %v8241_v9  ;;  %v2398_v52 = vmul.f32 %v8350_v11, %v8256_v32 }
 0x5be   :  { %v2399_v5 = vmul.f32 %v8350_v11, %v8253_v36  ;;  %v2400_v54 = vmul.f32 %v8350_v11, %v8268_v2  ;;  %v2401_v24 = vmul.f32 %v8350_v11, %v8265_v13  ;;  %v2402_v0 = vmul.f32 %v8350_v11, %v8280_v55 }
 0x5bf   :  { %v2419_v30 = vadd.f32 %v2417_v3, %v2383_v17  ;;  %v2418_v19 = vadd.f32 %v2417_v3, %v2382_v46  ;;  %v2420_v37 = vadd.f32 %v2417_v3, %v2384_v31  ;;  %v2421_v8 = vadd.f32 %v2417_v3, %v2385_v33 }
 0x5c0   :  { %v2422_v9 = vadd.f32 %v2417_v3, %v2386_v41  ;;  %v2423_v23 = vadd.f32 %v2417_v3, %v2387_v14  ;;  %v2424_v21 = vadd.f32 %v2417_v3, %v2388_v16  ;;  %v2425_v32 = vadd.f32 %v2417_v3, %v2389_v45 }
 0x5c1   :  { %5725 = vmatprep.mubr.f32.mxu1 %v2418_v19  ;;  %v2426_v4 = vadd.f32 %v2417_v3, %v2390_v18  ;;  %v2427_v36 = vadd.f32 %v2417_v3, %v2391_v15  ;;  %v2428_v56 = vadd.f32 %v2417_v3, %v2392_v51  ;;  %v2429_v49 = vadd.f32 %v2417_v3, %v2393_v53 }
 0x5c2   :  { %5726 = vmatmul.mubr.f32.vlgmr.msra.gmra.mrb[48].mxu1 %v2419_v30  ;;  %v2430_v2 = vadd.f32 %v2417_v3, %v2394_v63  ;;  %v2431_v22 = vadd.f32 %v2417_v3, %v2395_v62  ;;  %v2432_v13 = vadd.f32 %v2417_v3, %v2396_v28  ;;  %v2433_v29 = vadd.f32 %v2417_v3, %v2397_v6 }
 0x5c3   :  { %5728 = vmatprep.mubr.f32.mxu1 %v2420_v37  ;;  %v2434_v55 = vadd.f32 %v2417_v3, %v2398_v52  ;;  %v2435_v44 = vadd.f32 %v2417_v3, %v2399_v5  ;;  %v2436_v27 = vadd.f32 %v2417_v3, %v2400_v54  ;;  %v2437_v42 = vadd.f32 %v2417_v3, %v2401_v24 }
 0x5c4   :  { %v2438_v57 = vadd.f32 %v2417_v3, %v2402_v0  ;;  %v2403_v17 = vmul.f32 %v8350_v11, %v8277_v61  ;;  %v2404_v46 = vmul.f32 %v8350_v11, %v8292_v60  ;;  %v2405_v31 = vmul.f32 %v8350_v11, %v8289_v25 }
 0x5c5   :  { %v2406_v33 = vmul.f32 %v8350_v11, %v8304_v35  ;;  %v2407_v41 = vmul.f32 %v8350_v11, %v8301_v34  ;;  %v2408_v14 = vmul.f32 %v8350_v11, %v8316_v26  ;;  %v2409_v16 = vmul.f32 %v8350_v11, %v8313_v50 }
 0x5c6   :  { %5729 = vmatmul.mubr.f32.gmra.mrb[50].mxu1 %v2421_v8  ;;  %v2439_v61 = vadd.f32 %v2417_v3, %v2403_v17  ;;  %v2440_v12 = vadd.f32 %v2417_v3, %v2404_v46  ;;  %v2441_v45 = vadd.f32 %v2417_v3, %v2405_v31  ;;  %v2410_v60 = vmul.f32 %v8350_v11, %v8328_v48 }
 0x5c7   :  { %5731 = vmatprep.mubr.f32.mxu1 %v2422_v9  ;;  %v2442_v25 = vadd.f32 %v2417_v3, %v2406_v33  ;;  %v2443_v18 = vadd.f32 %v2417_v3, %v2407_v41  ;;  %v2444_v35 = vadd.f32 %v2417_v3, %v2408_v14  ;;  %v2445_v15 = vadd.f32 %v2417_v3, %v2409_v16 }
 0x5c8   :  { %v2446_v51 = vadd.f32 %v2417_v3, %v2410_v60  ;;  %v2411_v34 = vmul.f32 %v8350_v11, %v8325_v10  ;;  %v2412_v26 = vmul.f32 %v8350_v11, %v8339_v39  ;;  %v2413_v50 = vmul.f32 %v8350_v11, %v8337_v40  ;;  %v8421_v10 = vld [vmem:[%s9832_s2 + $0x8] sm:$0xff] }
 0x5c9   :  { %v8425_v48 = vrot.slane %v8421_v10, %v7762_v1 }
 0x5ca   :  { %5732 = vmatmul.mubr.f32.gmra.mrb[52].mxu1 %v2423_v23  ;;  %v2447_v53 = vadd.f32 %v2417_v3, %v2411_v34  ;;  %v2448_v63 = vadd.f32 %v2417_v3, %v2412_v26  ;;  %v2449_v62 = vadd.f32 %v2417_v3, %v2413_v50 }
 0x5cb   :  { %5734 = vmatprep.mubr.f32.mxu1 %v2424_v21 }
 0x5ce   :  { %5735 = vmatmul.mubr.f32.gmra.mrb[54].mxu1 %v2425_v32 }
 0x5cf   :  { %5737 = vmatprep.mubr.f32.mxu1 %v2426_v4 }
 0x5d2   :  { %5738 = vmatmul.mubr.f32.gmra.mrb[56].mxu1 %v2427_v36 }
 0x5d3   :  { %5740 = vmatprep.mubr.f32.mxu1 %v2428_v56 }
 0x5d6   :  { %5741 = vmatmul.mubr.f32.gmra.mrb[58].mxu1 %v2429_v49 }
 0x5d7   :  { %5743 = vmatprep.mubr.f32.mxu1 %v2430_v2 }
 0x5da   :  { %5744 = vmatmul.mubr.f32.gmra.mrb[60].mxu1 %v2431_v22 }
 0x5db   :  { %5746 = vmatprep.mubr.f32.mxu1 %v2432_v13 }
 0x5de   :  { %5747 = vmatmul.mubr.f32.gmra.mrb[62].mxu1 %v2433_v29 }
 0x5df   :  { %5749 = vmatprep.mubr.f32.mxu1 %v2434_v55 }
 0x5e2   :  { %5750 = vmatmul.mubr.f32.gmra.mrb[64].mxu1 %v2435_v44 }
 0x5e3   :  { %5752 = vmatprep.mubr.f32.mxu1 %v2436_v27 }
 0x5e6   :  { %5753 = vmatmul.mubr.f32.gmra.mrb[66].mxu1 %v2437_v42 }
 0x5e7   :  { %5755 = vmatprep.mubr.f32.mxu1 %v2438_v57 }
 0x5ea   :  { %5756 = vmatmul.mubr.f32.gmra.mrb[68].mxu1 %v2439_v61 }
 0x5eb   :  { %5758 = vmatprep.mubr.f32.mxu1 %v2440_v12 }
 0x5ee   :  { %5759 = vmatmul.mubr.f32.gmra.mrb[70].mxu1 %v2441_v45 }
 0x5ef   :  { %5761 = vmatprep.mubr.f32.mxu1 %v2442_v25 }
 0x5f2   :  { %5762 = vmatmul.mubr.f32.gmra.mrb[72].mxu1 %v2443_v18 }
 0x5f3   :  { %5764 = vmatprep.mubr.f32.mxu1 %v2444_v35 }
 0x5f6   :  { %5765 = vmatmul.mubr.f32.gmra.mrb[74].mxu1 %v2445_v15 }
 0x5f7   :  { %5767 = vmatprep.mubr.f32.mxu1 %v2446_v51 }
 0x5fa   :  { %5768 = vmatmul.mubr.f32.gmra.mrb[76].mxu1 %v2447_v53 }
 0x5fb   :  { %5770 = vmatprep.mubr.f32.mxu1 %v2448_v63 }
 0x5fe   :  { %5771 = vmatmul.mubr.f32.gmra.mrb[78].mxu1 %v2449_v62 }
 0x695   :  { %v5727_v40 = vpop.f32.mrb[48].mxu1 }
 0x696   :  { %v2543_v39 = vadd.f32 %v5727_v40, %v8425_v48  ;;  %v2537_v11 = vpop.f32.mrb[49].mxu1 }
 0x697   :  { %v2538_v3 = vadd.f32 %v2537_v11, %v8425_v48 }
 0x698   :  { %2698 = vst.msk [vmem:[%s9834_s4 + $0x8] sm:$0xff] %vm2696_vm0, %v2543_v39 }
 0x699   :  { %2697 = vst.msk [vmem:[%s9834_s4] sm:$0xff] %vm2696_vm0, %v2538_v3  ;;  %v5730_v28 = vpop.f32.mrb[50].mxu1  ;;  %5805 = vmatprep.mubr.f32.mxu0 %v2538_v3 }
 0x69a   :  { %v2553_v6 = vadd.f32 %v5730_v28, %v8425_v48  ;;  %v2547_v52 = vpop.f32.mrb[51].mxu1  ;;  %5806 = vmatmul.mubr.f32.vlgmr.msra.gmra.mrb[48].mxu0 %v2543_v39 }
 0x69b   :  { %v2548_v5 = vadd.f32 %v2547_v52, %v8425_v48 }
 0x69c   :  { %2700 = vst.msk [vmem:[%s9834_s4 + $0x18] sm:$0xff] %vm2696_vm0, %v2553_v6 }
 0x69d   :  { %2699 = vst.msk [vmem:[%s9834_s4 + $0x10] sm:$0xff] %vm2696_vm0, %v2548_v5  ;;  %v5733_v54 = vpop.f32.mrb[52].mxu1  ;;  %5808 = vmatprep.mubr.f32.mxu0 %v2548_v5 }
 0x69e   :  { %v2563_v24 = vadd.f32 %v5733_v54, %v8425_v48  ;;  %v2557_v0 = vpop.f32.mrb[53].mxu1  ;;  %5809 = vmatmul.mubr.f32.gmra.mrb[50].mxu0 %v2553_v6 }
 0x69f   :  { %v2558_v30 = vadd.f32 %v2557_v0, %v8425_v48  ;;  %v3231_v0 = vld [vmem:[#allocation2 + $0x300] sm:$0xff] }
 0x6a0   :  { %2702 = vst.msk [vmem:[%s9834_s4 + $0x28] sm:$0xff] %vm2696_vm0, %v2563_v24 }
 0x6a1   :  { %2701 = vst.msk [vmem:[%s9834_s4 + $0x20] sm:$0xff] %vm2696_vm0, %v2558_v30  ;;  %v5736_v19 = vpop.f32.mrb[54].mxu1  ;;  %5811 = vmatprep.mubr.f32.mxu0 %v2558_v30  ;;  %v3232_v30 = vld [vmem:[#allocation2 + $0x308] sm:$0xff] }
 0x6a2   :  { %v2573_v37 = vadd.f32 %v5736_v19, %v8425_v48  ;;  %v2567_v8 = vpop.f32.mrb[55].mxu1  ;;  %5812 = vmatmul.mubr.f32.gmra.mrb[52].mxu0 %v2563_v24  ;;  %v6333_v19 = vpack.c.bf16 %v3232_v30, %v3231_v0 }
 0x6a3   :  { %v2568_v9 = vadd.f32 %v2567_v8, %v8425_v48  ;;  %v3234_v8 = vld [vmem:[#allocation2 + $0x318] sm:$0xff] }
 0x6a4   :  { %2704 = vst.msk [vmem:[%s9834_s4 + $0x38] sm:$0xff] %vm2696_vm0, %v2573_v37  ;;  %6334 = vmatprep.subr.bf16.mxu1 %v6333_v19 }
 0x6a5   :  { %2703 = vst.msk [vmem:[%s9834_s4 + $0x30] sm:$0xff] %vm2696_vm0, %v2568_v9  ;;  %v5739_v23 = vpop.f32.mrb[56].mxu1  ;;  %5814 = vmatprep.mubr.f32.mxu0 %v2568_v9  ;;  %6336 = vmatpush3.bf16.msra.mxu1 %v6333_v19  ;;  %v3235_v9 = vld [vmem:[#allocation2 + $0x320] sm:$0xff] }
 0x6a6   :  { %v2583_v21 = vadd.f32 %v5739_v23, %v8425_v48  ;;  %v2577_v32 = vpop.f32.mrb[57].mxu1  ;;  %5815 = vmatmul.mubr.f32.gmra.mrb[54].mxu0 %v2573_v37  ;;  %v3233_v37 = vld [vmem:[#allocation2 + $0x310] sm:$0xff]  ;;  %v3236_v23 = vld [vmem:[#allocation2 + $0x328] sm:$0xff] }
 0x6a7   :  { %v2578_v4 = vadd.f32 %v2577_v32, %v8425_v48  ;;  %v3237_v32 = vld [vmem:[#allocation2 + $0x330] sm:$0xff] }
 0x6a8   :  { %2706 = vst.msk [vmem:[%s9834_s4 + $0x48] sm:$0xff] %vm2696_vm0, %v2583_v21 }
 0x6a9   :  { %2705 = vst.msk [vmem:[%s9834_s4 + $0x40] sm:$0xff] %vm2696_vm0, %v2578_v4  ;;  %v5742_v36 = vpop.f32.mrb[58].mxu1  ;;  %5817 = vmatprep.mubr.f32.mxu0 %v2578_v4  ;;  %v3238_v4 = vld [vmem:[#allocation2 + $0x338] sm:$0xff] }
 0x6aa   :  { %v2593_v56 = vadd.f32 %v5742_v36, %v8425_v48  ;;  %v2587_v49 = vpop.f32.mrb[59].mxu1  ;;  %5818 = vmatmul.mubr.f32.gmra.mrb[56].mxu0 %v2583_v21  ;;  %v6341_v21 = vpack.c.bf16 %v3236_v23, %v3235_v9  ;;  %v6345_v36 = vpack.c.bf16 %v3238_v4, %v3237_v32 }
 0x6ab   :  { %v2588_v2 = vadd.f32 %v2587_v49, %v8425_v48  ;;  %v3240_v49 = vld [vmem:[#allocation2 + $0x348] sm:$0xff] }
 0x6ac   :  { %2708 = vst.msk [vmem:[%s9834_s4 + $0x58] sm:$0xff] %vm2696_vm0, %v2593_v56 }
 0x6ad   :  { %2707 = vst.msk [vmem:[%s9834_s4 + $0x50] sm:$0xff] %vm2696_vm0, %v2588_v2  ;;  %v5745_v22 = vpop.f32.mrb[60].mxu1  ;;  %5820 = vmatprep.mubr.f32.mxu0 %v2588_v2 }
 0x6ae   :  { %v2603_v13 = vadd.f32 %v5745_v22, %v8425_v48  ;;  %v2597_v29 = vpop.f32.mrb[61].mxu1  ;;  %5821 = vmatmul.mubr.f32.gmra.mrb[58].mxu0 %v2593_v56  ;;  %v3239_v56 = vld [vmem:[#allocation2 + $0x340] sm:$0xff]  ;;  %v3241_v22 = vld [vmem:[#allocation2 + $0x350] sm:$0xff] }
 0x6af   :  { %v2598_v55 = vadd.f32 %v2597_v29, %v8425_v48  ;;  %v6349_v2 = vpack.c.bf16 %v3240_v49, %v3239_v56 }
 0x6b0   :  { %2710 = vst.msk [vmem:[%s9834_s4 + $0x68] sm:$0xff] %vm2696_vm0, %v2603_v13 }
 0x6b1   :  { %2709 = vst.msk [vmem:[%s9834_s4 + $0x60] sm:$0xff] %vm2696_vm0, %v2598_v55  ;;  %v5748_v44 = vpop.f32.mrb[62].mxu1  ;;  %5823 = vmatprep.mubr.f32.mxu0 %v2598_v55  ;;  %v3243_v55 = vld [vmem:[#allocation2 + $0x360] sm:$0xff] }
 0x6b2   :  { %v2613_v27 = vadd.f32 %v5748_v44, %v8425_v48  ;;  %v2607_v42 = vpop.f32.mrb[63].mxu1  ;;  %5824 = vmatmul.mubr.f32.gmra.mrb[60].mxu0 %v2603_v13  ;;  %v3242_v13 = vld [vmem:[#allocation2 + $0x358] sm:$0xff]  ;;  %v3244_v44 = vld [vmem:[#allocation2 + $0x368] sm:$0xff] }
 0x6b3   :  { %v2608_v57 = vadd.f32 %v2607_v42, %v8425_v48  ;;  %v6353_v29 = vpack.c.bf16 %v3242_v13, %v3241_v22  ;;  %v3245_v42 = vld [vmem:[#allocation2 + $0x370] sm:$0xff] }
 0x6b4   :  { %2712 = vst.msk [vmem:[%s9834_s4 + $0x78] sm:$0xff] %vm2696_vm0, %v2613_v27 }
 0x6b5   :  { %2711 = vst.msk [vmem:[%s9834_s4 + $0x70] sm:$0xff] %vm2696_vm0, %v2608_v57  ;;  %v5751_v17 = vpop.f32.mrb[64].mxu1  ;;  %5826 = vmatprep.mubr.f32.mxu0 %v2608_v57  ;;  %v3246_v57 = vld [vmem:[#allocation2 + $0x378] sm:$0xff] }
 0x6b6   :  { %v2623_v46 = vadd.f32 %v5751_v17, %v8425_v48  ;;  %v2617_v31 = vpop.f32.mrb[65].mxu1  ;;  %5827 = vmatmul.mubr.f32.gmra.mrb[62].mxu0 %v2613_v27  ;;  %v6357_v27 = vpack.c.bf16 %v3244_v44, %v3243_v55  ;;  %v6361_v17 = vpack.c.bf16 %v3246_v57, %v3245_v42 }
 0x6b7   :  { %v2618_v33 = vadd.f32 %v2617_v31, %v8425_v48 }
 0x6b8   :  { %2714 = vst.msk [vmem:[%s9834_s4 + $0x88] sm:$0xff] %vm2696_vm0, %v2623_v46 }
 0x6b9   :  { %2713 = vst.msk [vmem:[%s9834_s4 + $0x80] sm:$0xff] %vm2696_vm0, %v2618_v33  ;;  %v5754_v41 = vpop.f32.mrb[66].mxu1  ;;  %5829 = vmatprep.mubr.f32.mxu0 %v2618_v33 }
 0x6ba   :  { %v2633_v14 = vadd.f32 %v5754_v41, %v8425_v48  ;;  %v2627_v16 = vpop.f32.mrb[67].mxu1  ;;  %5830 = vmatmul.mubr.f32.gmra.mrb[64].mxu0 %v2623_v46  ;;  %v8589_v46 = vrot.slane %v8421_v10, %v7768_v7 }
 0x6bb   :  { %v2628_v61 = vadd.f32 %v2627_v16, %v8425_v48 }
 0x6bc   :  { %2716 = vst.msk [vmem:[%s9834_s4 + $0x98] sm:$0xff] %vm2696_vm0, %v2633_v14 }
 0x6bd   :  { %2715 = vst.msk [vmem:[%s9834_s4 + $0x90] sm:$0xff] %vm2696_vm0, %v2628_v61  ;;  %v5757_v12 = vpop.f32.mrb[68].mxu1  ;;  %5832 = vmatprep.mubr.f32.mxu0 %v2628_v61 }
 0x6be   :  { %v2643_v45 = vadd.f32 %v5757_v12, %v8425_v48  ;;  %v2637_v60 = vpop.f32.mrb[69].mxu1  ;;  %5833 = vmatmul.mubr.f32.gmra.mrb[66].mxu0 %v2633_v14 }
 0x6bf   :  { %v2638_v25 = vadd.f32 %v2637_v60, %v8425_v48 }
 0x6c0   :  { %2718 = vst.msk [vmem:[%s9834_s4 + $0xa8] sm:$0xff] %vm2696_vm0, %v2643_v45 }
 0x6c1   :  { %2717 = vst.msk [vmem:[%s9834_s4 + $0xa0] sm:$0xff] %vm2696_vm0, %v2638_v25  ;;  %v5760_v18 = vpop.f32.mrb[70].mxu1  ;;  %5835 = vmatprep.mubr.f32.mxu0 %v2638_v25 }
 0x6c2   :  { %v2653_v35 = vadd.f32 %v5760_v18, %v8425_v48  ;;  %v2647_v15 = vpop.f32.mrb[71].mxu1  ;;  %5836 = vmatmul.mubr.f32.gmra.mrb[68].mxu0 %v2643_v45 }
 0x6c3   :  { %v2648_v51 = vadd.f32 %v2647_v15, %v8425_v48 }
 0x6c4   :  { %2720 = vst.msk [vmem:[%s9834_s4 + $0xb8] sm:$0xff] %vm2696_vm0, %v2653_v35 }
 0x6c5   :  { %2719 = vst.msk [vmem:[%s9834_s4 + $0xb0] sm:$0xff] %vm2696_vm0, %v2648_v51  ;;  %v5763_v34 = vpop.f32.mrb[72].mxu1  ;;  %5838 = vmatprep.mubr.f32.mxu0 %v2648_v51 }
 0x6c6   :  { %v2663_v26 = vadd.f32 %v5763_v34, %v8425_v48  ;;  %v2657_v50 = vpop.f32.mrb[73].mxu1  ;;  %5839 = vmatmul.mubr.f32.gmra.mrb[70].mxu0 %v2653_v35 }
 0x6c7   :  { %v2658_v53 = vadd.f32 %v2657_v50, %v8425_v48 }
 0x6c8   :  { %2722 = vst.msk [vmem:[%s9834_s4 + $0xc8] sm:$0xff] %vm2696_vm0, %v2663_v26 }
 0x6c9   :  { %2721 = vst.msk [vmem:[%s9834_s4 + $0xc0] sm:$0xff] %vm2696_vm0, %v2658_v53  ;;  %v5766_v63 = vpop.f32.mrb[74].mxu1  ;;  %5841 = vmatprep.mubr.f32.mxu0 %v2658_v53 }
 0x6ca   :  { %v2673_v62 = vadd.f32 %v5766_v63, %v8425_v48  ;;  %v2667_v40 = vpop.f32.mrb[75].mxu1  ;;  %5842 = vmatmul.mubr.f32.gmra.mrb[72].mxu0 %v2663_v26 }
 0x6cb   :  { %v2668_v39 = vadd.f32 %v2667_v40, %v8425_v48 }
 0x6cc   :  { %2724 = vst.msk [vmem:[%s9834_s4 + $0xd8] sm:$0xff] %vm2696_vm0, %v2673_v62 }
 0x6cd   :  { %2723 = vst.msk [vmem:[%s9834_s4 + $0xd0] sm:$0xff] %vm2696_vm0, %v2668_v39  ;;  %v5769_v11 = vpop.f32.mrb[76].mxu1  ;;  %5844 = vmatprep.mubr.f32.mxu0 %v2668_v39 }
 0x6ce   :  { %v2683_v3 = vadd.f32 %v5769_v11, %v8425_v48  ;;  %v2677_v28 = vpop.f32.mrb[77].mxu1  ;;  %5845 = vmatmul.mubr.f32.gmra.mrb[74].mxu0 %v2673_v62 }
 0x6cf   :  { %v2678_v6 = vadd.f32 %v2677_v28, %v8425_v48 }
 0x6d0   :  { %2726 = vst.msk [vmem:[%s9834_s4 + $0xe8] sm:$0xff] %vm2696_vm0, %v2683_v3 }
 0x6d1   :  { %2725 = vst.msk [vmem:[%s9834_s4 + $0xe0] sm:$0xff] %vm2696_vm0, %v2678_v6  ;;  %v5772_v52 = vpop.f32.mrb[78].mxu1  ;;  %5847 = vmatprep.mubr.f32.mxu0 %v2678_v6 }
 0x6d2   :  { %v2693_v5 = vadd.f32 %v5772_v52, %v8425_v48  ;;  %v2687_v54 = vpop.f32.mrb[79].mxu1  ;;  %5848 = vmatmul.mubr.f32.gmra.mrb[76].mxu0 %v2683_v3 }
 0x6d3   :  { %v2688_v24 = vadd.f32 %v2687_v54, %v8425_v48  ;;  %v6337_v48 = vpack.c.bf16 %v3234_v8, %v3233_v37 }
 0x6d4   :  { %2728 = vst.msk [vmem:[%s9834_s4 + $0xf8] sm:$0xff] %vm2696_vm0, %v2693_v5 }
 0x6d5   :  { %2727 = vst.msk [vmem:[%s9834_s4 + $0xf0] sm:$0xff] %vm2696_vm0, %v2688_v24  ;;  %5850 = vmatprep.mubr.f32.mxu0 %v2688_v24  ;;  %6338 = vmatprep.subr.bf16.mxu1 %v6337_v48 }
 0x6d6   :  { %5851 = vmatmul.mubr.f32.gmra.mrb[78].mxu0 %v2693_v5  ;;  %6340 = vmatpush3.bf16.msra.mxu1 %v6337_v48 }
 0x6d7   :  { %6342 = vmatprep.subr.bf16.mxu1 %v6341_v21 }
 0x6da   :  { %6344 = vmatpush3.bf16.msra.mxu1 %v6341_v21 }
 0x6db   :  { %6346 = vmatprep.subr.bf16.mxu1 %v6345_v36 }
 0x6de   :  { %6348 = vmatpush3.bf16.msra.mxu1 %v6345_v36 }
 0x6df   :  { %6350 = vmatprep.subr.bf16.mxu1 %v6349_v2 }
 0x6e2   :  { %6352 = vmatpush3.bf16.msra.mxu1 %v6349_v2 }
 0x6e3   :  { %6354 = vmatprep.subr.bf16.mxu1 %v6353_v29 }
 0x6e6   :  { %6356 = vmatpush3.bf16.msra.mxu1 %v6353_v29 }
 0x6e7   :  { %6358 = vmatprep.subr.bf16.mxu1 %v6357_v27 }
 0x6ea   :  { %6360 = vmatpush3.bf16.msra.mxu1 %v6357_v27 }
 0x6eb   :  { %6362 = vmatprep.subr.bf16.mxu1 %v6361_v17 }
 0x6ee   :  { %6364 = vmatpush3.bf16.msra.mxu1 %v6361_v17 }
 0x76d   :  { %v5807_v31 = vpop.f32.mrb[48].mxu0 }
 0x76e   :  { %v2822_v33 = vadd.f32 %v5807_v31, %v8589_v46  ;;  %v2816_v41 = vpop.f32.mrb[49].mxu0 }
 0x76f   :  { %v2817_v14 = vadd.f32 %v2816_v41, %v8589_v46 }
 0x770   :  { %v2976_v16 = vmul.f32 0.2, %v2822_v33 }
 0x771   :  { %v2975_v61 = vmul.f32 0.2, %v2817_v14  ;;  %v5810_v12 = vpop.f32.mrb[50].mxu0 }
 0x772   :  { %v8593_v45 = vmax.f32 %v2822_v33, %v2976_v16  ;;  %v2832_v60 = vadd.f32 %v5810_v12, %v8589_v46  ;;  %v2826_v25 = vpop.f32.mrb[51].mxu0 }
 0x773   :  { %v8596_v18 = vmax.f32 %v2817_v14, %v2975_v61  ;;  %v2827_v35 = vadd.f32 %v2826_v25, %v8589_v46 }
 0x774   :  { %v2978_v15 = vmul.f32 0.2, %v2832_v60  ;;  %v3078_v51 = vmul.f32 %v8593_v45, %v8593_v45 }
 0x775   :  { %v3077_v34 = vmul.f32 %v8596_v18, %v8596_v18  ;;  %v2977_v26 = vmul.f32 0.2, %v2827_v35  ;;  %v5813_v50 = vpop.f32.mrb[52].mxu0  ;;  %v3039_v40 = vadd.f32 %v8593_v45, %v8596_v18 }
 0x776   :  { %v8603_v53 = vmax.f32 %v2832_v60, %v2978_v15  ;;  %v2842_v63 = vadd.f32 %v5813_v50, %v8589_v46  ;;  %v2836_v62 = vpop.f32.mrb[53].mxu0 }
 0x777   :  { %v8608_v39 = vmax.f32 %v2827_v35, %v2977_v26  ;;  %v2837_v11 = vadd.f32 %v2836_v62, %v8589_v46  ;;  %v3109_v28 = vadd.f32 %v3078_v51, %v3077_v34 }
 0x778   :  { %v2980_v3 = vmul.f32 0.2, %v2842_v63  ;;  %v3080_v24 = vmul.f32 %v8603_v53, %v8603_v53 }
 0x779   :  { %v3040_v6 = vadd.f32 %v3039_v40, %v8608_v39  ;;  %v3079_v52 = vmul.f32 %v8608_v39, %v8608_v39  ;;  %v2979_v5 = vmul.f32 0.2, %v2837_v11  ;;  %v5816_v54 = vpop.f32.mrb[54].mxu0 }
 0x77a   :  { %v8616_v0 = vmax.f32 %v2842_v63, %v2980_v3  ;;  %v2852_v30 = vadd.f32 %v5816_v54, %v8589_v46  ;;  %v2846_v19 = vpop.f32.mrb[55].mxu0 }
 0x77b   :  { %v3110_v37 = vadd.f32 %v3109_v28, %v3079_v52  ;;  %v8619_v8 = vmax.f32 %v2837_v11, %v2979_v5  ;;  %v3041_v48 = vadd.f32 %v3040_v6, %v8603_v53  ;;  %v2847_v9 = vadd.f32 %v2846_v19, %v8589_v46 }
 0x77c   :  { %v2982_v23 = vmul.f32 0.2, %v2852_v30  ;;  %v3082_v49 = vmul.f32 %v8616_v0, %v8616_v0 }
 0x77d   :  { %v3042_v21 = vadd.f32 %v3041_v48, %v8619_v8  ;;  %v3081_v32 = vmul.f32 %v8619_v8, %v8619_v8  ;;  %v3111_v4 = vadd.f32 %v3110_v37, %v3080_v24  ;;  %v2981_v36 = vmul.f32 0.2, %v2847_v9  ;;  %v5819_v56 = vpop.f32.mrb[56].mxu0 }
 0x77e   :  { %v8628_v2 = vmax.f32 %v2852_v30, %v2982_v23  ;;  %v2862_v22 = vadd.f32 %v5819_v56, %v8589_v46  ;;  %v2856_v13 = vpop.f32.mrb[57].mxu0 }
 0x77f   :  { %v3112_v29 = vadd.f32 %v3111_v4, %v3081_v32  ;;  %v8631_v55 = vmax.f32 %v2847_v9, %v2981_v36  ;;  %v3043_v44 = vadd.f32 %v3042_v21, %v8616_v0  ;;  %v2857_v27 = vadd.f32 %v2856_v13, %v8589_v46 }
 0x780   :  { %v2984_v42 = vmul.f32 0.2, %v2862_v22  ;;  %v3084_v14 = vmul.f32 %v8628_v2, %v8628_v2 }
 0x781   :  { %v3044_v57 = vadd.f32 %v3043_v44, %v8631_v55  ;;  %v3083_v17 = vmul.f32 %v8631_v55, %v8631_v55  ;;  %v3113_v31 = vadd.f32 %v3112_v29, %v3082_v49  ;;  %v2983_v33 = vmul.f32 0.2, %v2857_v27  ;;  %v5822_v41 = vpop.f32.mrb[58].mxu0 }
 0x782   :  { %v8640_v16 = vmax.f32 %v2862_v22, %v2984_v42  ;;  %v2872_v61 = vadd.f32 %v5822_v41, %v8589_v46  ;;  %v2866_v12 = vpop.f32.mrb[59].mxu0 }
 0x783   :  { %v3114_v60 = vadd.f32 %v3113_v31, %v3083_v17  ;;  %v8643_v25 = vmax.f32 %v2857_v27, %v2983_v33  ;;  %v3045_v35 = vadd.f32 %v3044_v57, %v8628_v2  ;;  %v2867_v15 = vadd.f32 %v2866_v12, %v8589_v46 }
 0x784   :  { %v2986_v51 = vmul.f32 0.2, %v2872_v61  ;;  %v3086_v40 = vmul.f32 %v8640_v16, %v8640_v16 }
 0x785   :  { %v3046_v34 = vadd.f32 %v3045_v35, %v8643_v25  ;;  %v3085_v26 = vmul.f32 %v8643_v25, %v8643_v25  ;;  %v3115_v50 = vadd.f32 %v3114_v60, %v3084_v14  ;;  %v2985_v63 = vmul.f32 0.2, %v2867_v15  ;;  %v5825_v62 = vpop.f32.mrb[60].mxu0 }
 0x786   :  { %v8652_v11 = vmax.f32 %v2872_v61, %v2986_v51  ;;  %v2882_v3 = vadd.f32 %v5825_v62, %v8589_v46  ;;  %v2876_v28 = vpop.f32.mrb[61].mxu0 }
 0x787   :  { %v3116_v6 = vadd.f32 %v3115_v50, %v3085_v26  ;;  %v8655_v52 = vmax.f32 %v2867_v15, %v2985_v63  ;;  %v3047_v5 = vadd.f32 %v3046_v34, %v8640_v16  ;;  %v2877_v54 = vadd.f32 %v2876_v28, %v8589_v46 }
 0x788   :  { %v2988_v24 = vmul.f32 0.2, %v2882_v3  ;;  %v3088_v23 = vmul.f32 %v8652_v11, %v8652_v11 }
 0x789   :  { %v3048_v30 = vadd.f32 %v3047_v5, %v8655_v52  ;;  %v3087_v19 = vmul.f32 %v8655_v52, %v8655_v52  ;;  %v3117_v37 = vadd.f32 %v3116_v6, %v3086_v40  ;;  %v2987_v48 = vmul.f32 0.2, %v2877_v54  ;;  %v5828_v9 = vpop.f32.mrb[62].mxu0 }
 0x78a   :  { %v8664_v21 = vmax.f32 %v2882_v3, %v2988_v24  ;;  %v2892_v32 = vadd.f32 %v5828_v9, %v8589_v46  ;;  %v2886_v4 = vpop.f32.mrb[63].mxu0 }
 0x78b   :  { %v3118_v36 = vadd.f32 %v3117_v37, %v3087_v19  ;;  %v8667_v56 = vmax.f32 %v2877_v54, %v2987_v48  ;;  %v3049_v49 = vadd.f32 %v3048_v30, %v8652_v11  ;;  %v2887_v22 = vadd.f32 %v2886_v4, %v8589_v46 }
 0x78c   :  { %v2990_v13 = vmul.f32 0.2, %v2892_v32  ;;  %v3090_v17 = vmul.f32 %v8664_v21, %v8664_v21 }
 0x78d   :  { %v3050_v29 = vadd.f32 %v3049_v49, %v8667_v56  ;;  %v3089_v44 = vmul.f32 %v8667_v56, %v8667_v56  ;;  %v3119_v27 = vadd.f32 %v3118_v36, %v3088_v23  ;;  %v2989_v42 = vmul.f32 0.2, %v2887_v22  ;;  %v5831_v57 = vpop.f32.mrb[64].mxu0 }
 0x78e   :  { %v8676_v31 = vmax.f32 %v2892_v32, %v2990_v13  ;;  %v2902_v33 = vadd.f32 %v5831_v57, %v8589_v46  ;;  %v2896_v41 = vpop.f32.mrb[65].mxu0 }
 0x78f   :  { %v3120_v14 = vadd.f32 %v3119_v27, %v3089_v44  ;;  %v8679_v61 = vmax.f32 %v2887_v22, %v2989_v42  ;;  %v3051_v12 = vadd.f32 %v3050_v29, %v8664_v21  ;;  %v2897_v60 = vadd.f32 %v2896_v41, %v8589_v46 }
 0x790   :  { %v2992_v35 = vmul.f32 0.2, %v2902_v33  ;;  %v3092_v63 = vmul.f32 %v8676_v31, %v8676_v31 }
 0x791   :  { %v3052_v15 = vadd.f32 %v3051_v12, %v8679_v61  ;;  %v3091_v51 = vmul.f32 %v8679_v61, %v8679_v61  ;;  %v3121_v34 = vadd.f32 %v3120_v14, %v3090_v17  ;;  %v2991_v26 = vmul.f32 0.2, %v2897_v60  ;;  %v5834_v50 = vpop.f32.mrb[66].mxu0 }
 0x792   :  { %v8688_v62 = vmax.f32 %v2902_v33, %v2992_v35  ;;  %v2912_v40 = vadd.f32 %v5834_v50, %v8589_v46  ;;  %v2906_v3 = vpop.f32.mrb[67].mxu0 }
 0x793   :  { %v3122_v28 = vadd.f32 %v3121_v34, %v3091_v51  ;;  %v8691_v6 = vmax.f32 %v2897_v60, %v2991_v26  ;;  %v3053_v5 = vadd.f32 %v3052_v15, %v8676_v31  ;;  %v2907_v54 = vadd.f32 %v2906_v3, %v8589_v46 }
 0x794   :  { %v2994_v24 = vmul.f32 0.2, %v2912_v40  ;;  %v3094_v23 = vmul.f32 %v8688_v62, %v8688_v62 }
 0x795   :  { %v3054_v30 = vadd.f32 %v3053_v5, %v8691_v6  ;;  %v3093_v19 = vmul.f32 %v8691_v6, %v8691_v6  ;;  %v3123_v37 = vadd.f32 %v3122_v28, %v3092_v63  ;;  %v2993_v48 = vmul.f32 0.2, %v2907_v54  ;;  %v5837_v9 = vpop.f32.mrb[68].mxu0 }
 0x796   :  { %v8700_v32 = vmax.f32 %v2912_v40, %v2994_v24  ;;  %v2922_v4 = vadd.f32 %v5837_v9, %v8589_v46  ;;  %v2916_v36 = vpop.f32.mrb[69].mxu0 }
 0x797   :  { %v3124_v49 = vadd.f32 %v3123_v37, %v3093_v19  ;;  %v8703_v22 = vmax.f32 %v2907_v54, %v2993_v48  ;;  %v3055_v13 = vadd.f32 %v3054_v30, %v8688_v62  ;;  %v2917_v29 = vadd.f32 %v2916_v36, %v8589_v46 }
 0x798   :  { %v2996_v44 = vmul.f32 0.2, %v2922_v4  ;;  %v3096_v41 = vmul.f32 %v8700_v32, %v8700_v32 }
 0x799   :  { %v3056_v27 = vadd.f32 %v3055_v13, %v8703_v22  ;;  %v3095_v42 = vmul.f32 %v8703_v22, %v8703_v22  ;;  %v3125_v57 = vadd.f32 %v3124_v49, %v3094_v23  ;;  %v2995_v17 = vmul.f32 0.2, %v2917_v29  ;;  %v5840_v33 = vpop.f32.mrb[70].mxu0 }
 0x79a   :  { %v8712_v14 = vmax.f32 %v2922_v4, %v2996_v44  ;;  %v2932_v12 = vadd.f32 %v5840_v33, %v8589_v46  ;;  %v2926_v60 = vpop.f32.mrb[71].mxu0 }
 0x79b   :  { %v3126_v35 = vadd.f32 %v3125_v57, %v3095_v42  ;;  %v8715_v15 = vmax.f32 %v2917_v29, %v2995_v17  ;;  %v3057_v51 = vadd.f32 %v3056_v27, %v8700_v32  ;;  %v2927_v34 = vadd.f32 %v2926_v60, %v8589_v46 }
 0x79c   :  { %v2998_v26 = vmul.f32 0.2, %v2932_v12  ;;  %v3098_v5 = vmul.f32 %v8712_v14, %v8712_v14 }
 0x79d   :  { %v3058_v50 = vadd.f32 %v3057_v51, %v8715_v15  ;;  %v3097_v63 = vmul.f32 %v8715_v15, %v8715_v15  ;;  %v3127_v40 = vadd.f32 %v3126_v35, %v3096_v41  ;;  %v2997_v3 = vmul.f32 0.2, %v2927_v34  ;;  %v5843_v28 = vpop.f32.mrb[72].mxu0 }
 0x79e   :  { %v8724_v54 = vmax.f32 %v2932_v12, %v2998_v26  ;;  %v2942_v24 = vadd.f32 %v5843_v28, %v8589_v46  ;;  %v2936_v30 = vpop.f32.mrb[73].mxu0 }
 0x79f   :  { %v3128_v19 = vadd.f32 %v3127_v40, %v3097_v63  ;;  %v8727_v37 = vmax.f32 %v2927_v34, %v2997_v3  ;;  %v3059_v48 = vadd.f32 %v3058_v50, %v8712_v14  ;;  %v2937_v9 = vadd.f32 %v2936_v30, %v8589_v46 }
 0x7a0   :  { %v3000_v23 = vmul.f32 0.2, %v2942_v24  ;;  %v3100_v44 = vmul.f32 %v8724_v54, %v8724_v54 }
 0x7a1   :  { %v3060_v4 = vadd.f32 %v3059_v48, %v8727_v37  ;;  %v3099_v36 = vmul.f32 %v8727_v37, %v8727_v37  ;;  %v3129_v49 = vadd.f32 %v3128_v19, %v3098_v5  ;;  %v2999_v13 = vmul.f32 0.2, %v2937_v9  ;;  %v5846_v29 = vpop.f32.mrb[74].mxu0 }
 0x7a2   :  { %v8736_v27 = vmax.f32 %v2942_v24, %v3000_v23  ;;  %v2952_v42 = vadd.f32 %v5846_v29, %v8589_v46  ;;  %v2946_v57 = vpop.f32.mrb[75].mxu0 }
 0x7a3   :  { %v3130_v17 = vadd.f32 %v3129_v49, %v3099_v36  ;;  %v8739_v33 = vmax.f32 %v2937_v9, %v2999_v13  ;;  %v3061_v41 = vadd.f32 %v3060_v4, %v8724_v54  ;;  %v2947_v12 = vadd.f32 %v2946_v57, %v8589_v46 }
 0x7a4   :  { %v3002_v60 = vmul.f32 0.2, %v2952_v42  ;;  %v3102_v63 = vmul.f32 %v8736_v27, %v8736_v27 }
 0x7a5   :  { %v3062_v35 = vadd.f32 %v3061_v41, %v8739_v33  ;;  %v3101_v51 = vmul.f32 %v8739_v33, %v8739_v33  ;;  %v3131_v34 = vadd.f32 %v3130_v17, %v3100_v44  ;;  %v3001_v26 = vmul.f32 0.2, %v2947_v12  ;;  %v5849_v50 = vpop.f32.mrb[76].mxu0 }
 0x7a6   :  { %v8748_v40 = vmax.f32 %v2952_v42, %v3002_v60  ;;  %v2962_v3 = vadd.f32 %v5849_v50, %v8589_v46  ;;  %v2956_v28 = vpop.f32.mrb[77].mxu0 }
 0x7a7   :  { %v3132_v5 = vadd.f32 %v3131_v34, %v3101_v51  ;;  %v8751_v24 = vmax.f32 %v2947_v12, %v3001_v26  ;;  %v3063_v30 = vadd.f32 %v3062_v35, %v8736_v27  ;;  %v2957_v19 = vadd.f32 %v2956_v28, %v8589_v46 }
 0x7a8   :  { %v3004_v48 = vmul.f32 0.2, %v2962_v3  ;;  %v3104_v13 = vmul.f32 %v8748_v40, %v8748_v40 }
 0x7a9   :  { %v3064_v9 = vadd.f32 %v3063_v30, %v8751_v24  ;;  %v3103_v23 = vmul.f32 %v8751_v24, %v8751_v24  ;;  %v3133_v4 = vadd.f32 %v3132_v5, %v3102_v63  ;;  %v3003_v36 = vmul.f32 0.2, %v2957_v19  ;;  %v5852_v49 = vpop.f32.mrb[78].mxu0 }
 0x7aa   :  { %v8760_v29 = vmax.f32 %v2962_v3, %v3004_v48  ;;  %v2972_v44 = vadd.f32 %v5852_v49, %v8589_v46  ;;  %v2966_v42 = vpop.f32.mrb[79].mxu0 }
 0x7ab   :  { %v3134_v57 = vadd.f32 %v3133_v4, %v3103_v23  ;;  %v8763_v17 = vmax.f32 %v2957_v19, %v3003_v36  ;;  %v3065_v41 = vadd.f32 %v3064_v9, %v8748_v40  ;;  %v2967_v12 = vadd.f32 %v2966_v42, %v8589_v46 }
 0x7ac   :  { %v3006_v60 = vmul.f32 0.2, %v2972_v44  ;;  %v3106_v50 = vmul.f32 %v8760_v29, %v8760_v29 }
 0x7ad   :  { %v3066_v35 = vadd.f32 %v3065_v41, %v8763_v17  ;;  %v3105_v51 = vmul.f32 %v8763_v17, %v8763_v17  ;;  %v3135_v34 = vadd.f32 %v3134_v57, %v3104_v13  ;;  %v3005_v26 = vmul.f32 0.2, %v2967_v12 }
 0x7ae   :  { %v8772_v3 = vmax.f32 %v2972_v44, %v3006_v60 }
 0x7af   :  { %v3136_v63 = vadd.f32 %v3135_v34, %v3105_v51  ;;  %v8774_v28 = vmax.f32 %v2967_v12, %v3005_v26  ;;  %v3067_v5 = vadd.f32 %v3066_v35, %v8760_v29 }
 0x7b0   :  { %v3108_v48 = vmul.f32 %v8772_v3, %v8772_v3 }
 0x7b1   :  { %v3068_v46 = vadd.f32 %v3067_v5, %v8774_v28  ;;  %v3107_v30 = vmul.f32 %v8774_v28, %v8774_v28  ;;  %v3137_v19 = vadd.f32 %v3136_v63, %v3106_v50 }
 0x7b3   :  { %v3069_v9 = vadd.f32 %v3068_v46, %v8772_v3  ;;  %v3138_v23 = vadd.f32 %v3137_v19, %v3107_v30 }
 0x7b5   :  { %v3070_v4 = vrot.slane %v3069_v9, 4  ;;  %v3139_v36 = vadd.f32 %v3138_v23, %v3108_v48 }
 0x7b7   :  { %v3071_v49 = vadd.f32 %v3070_v4, %v3069_v9  ;;  %v3140_v13 = vrot.slane %v3139_v36, 4 }
 0x7b9   :  { %v3072_v44 = vrot.slane %v3071_v49, 2  ;;  %v3141_v42 = vadd.f32 %v3140_v13, %v3139_v36 }
 0x7bb   :  { %v3073_v57 = vadd.f32 %v3072_v44, %v3071_v49  ;;  %v3142_v41 = vrot.slane %v3141_v42, 2 }
 0x7bd   :  { %v3074_v12 = vrot.slane %v3073_v57, 1  ;;  %v3143_v60 = vadd.f32 %v3142_v41, %v3141_v42 }
 0x7bf   :  { %v3075_v35 = vadd.f32 %v3074_v12, %v3073_v57  ;;  %v3144_v51 = vrot.slane %v3143_v60, 1 }
 0x7c1   :  { %v3076_v34 = vmul.f32 0.00390625, %v3075_v35  ;;  %v3145_v26 = vadd.f32 %v3144_v51, %v3143_v60 }
 0x7c3   :  { %v3146_v50 = vmul.f32 0.00390625, %v3145_v26  ;;  %v3147_v63 = vmul.f32 %v3076_v34, %v3076_v34 }
 0x7c5   :  { %v3148_v5 = vsub.f32 %v3146_v50, %v3147_v63 }
 0x7c7   :  { %v3149_v7 = vmax.f32 %v3148_v5, 0.0 }
 0x7c9   :  { %v3150_v46 = vadd.f32 1e-05, %v3149_v7 }
 0x7cb   :  { %6553 = vrsqrt.f32 %v3150_v46 }
 0x7d5   :  { %v6554_v30 = vpop.eup %6553 }
 0x7d6   :  { %v3152_v19 = vmul.f32 %v8421_v10, %v6554_v30 }
 0x7d8   :  { %v3153_v48 = vmul.f32 %v3152_v19, %v3076_v34  ;;  %v8785_v9 = vrot.slane %v3152_v19, %v7871_v47 }
 0x7da   :  { %v3155_v23 = vrot.slane %v3153_v48, 7  ;;  %v3163_v4 = vmul.f32 %v8785_v9, %v8593_v45  ;;  %v3162_v36 = vmul.f32 %v8785_v9, %v8596_v18  ;;  %v3164_v49 = vmul.f32 %v8785_v9, %v8608_v39 }
 0x7db   :  { %v3165_v7 = vmul.f32 %v8785_v9, %v8603_v53  ;;  %v3166_v13 = vmul.f32 %v8785_v9, %v8619_v8  ;;  %v3167_v44 = vmul.f32 %v8785_v9, %v8616_v0  ;;  %v3168_v42 = vmul.f32 %v8785_v9, %v8631_v55 }
 0x7dc   :  { %v3157_v45 = vsub.f32 %v8421_v10, %v3155_v23  ;;  %v3169_v18 = vmul.f32 %v8785_v9, %v8628_v2  ;;  %v3170_v39 = vmul.f32 %v8785_v9, %v8643_v25  ;;  %v3171_v53 = vmul.f32 %v8785_v9, %v8640_v16 }
 0x7dd   :  { %v3172_v8 = vmul.f32 %v8785_v9, %v8655_v52  ;;  %v3173_v0 = vmul.f32 %v8785_v9, %v8652_v11  ;;  %v3174_v55 = vmul.f32 %v8785_v9, %v8667_v56  ;;  %v3175_v10 = vmul.f32 %v8785_v9, %v8664_v21 }
 0x7de   :  { %v3197_v2 = vrot.slane %v3157_v45, %v8075_v43  ;;  %v3176_v25 = vmul.f32 %v8785_v9, %v8679_v61  ;;  %v3177_v16 = vmul.f32 %v8785_v9, %v8676_v31  ;;  %v3178_v52 = vmul.f32 %v8785_v9, %v8691_v6 }
 0x7df   :  { %v3179_v11 = vmul.f32 %v8785_v9, %v8688_v62  ;;  %v3180_v56 = vmul.f32 %v8785_v9, %v8703_v22  ;;  %v3181_v21 = vmul.f32 %v8785_v9, %v8700_v32  ;;  %v3182_v57 = vmul.f32 %v8785_v9, %v8715_v15 }
 0x7e0   :  { %v3199_v41 = vadd.f32 %v3197_v2, %v3163_v4  ;;  %v3198_v61 = vadd.f32 %v3197_v2, %v3162_v36  ;;  %v3200_v12 = vadd.f32 %v3197_v2, %v3164_v49  ;;  %v3201_v60 = vadd.f32 %v3197_v2, %v3165_v7 }
 0x7e1   :  { %v3202_v31 = vadd.f32 %v3197_v2, %v3166_v13  ;;  %v3203_v35 = vadd.f32 %v3197_v2, %v3167_v44  ;;  %v3204_v51 = vadd.f32 %v3197_v2, %v3168_v42  ;;  %v3205_v6 = vadd.f32 %v3197_v2, %v3169_v18 }
 0x7e2   :  { %5885 = vmatprep.mubr.f32.mxu1 %v3198_v61  ;;  %v3206_v34 = vadd.f32 %v3197_v2, %v3170_v39  ;;  %v3207_v62 = vadd.f32 %v3197_v2, %v3171_v53  ;;  %v3208_v26 = vadd.f32 %v3197_v2, %v3172_v8  ;;  %v3209_v50 = vadd.f32 %v3197_v2, %v3173_v0  ;;  %v3742_v61 = vld [vmem:[#allocation2 + $0x3d0] sm:$0xff] }
 0x7e3   :  { %5886 = vmatmul.mubr.f32.vlgmr.msra.gmra.mrb[80].mxu1 %v3199_v41  ;;  %v3210_v22 = vadd.f32 %v3197_v2, %v3174_v55  ;;  %v3211_v63 = vadd.f32 %v3197_v2, %v3175_v10  ;;  %v3212_v32 = vadd.f32 %v3197_v2, %v3176_v25  ;;  %v3213_v5 = vadd.f32 %v3197_v2, %v3177_v16  ;;  %v3737_v25 = vld [vmem:[#allocation2 + $0x3a8] sm:$0xff] }
 0x7e4   :  { %5888 = vmatprep.mubr.f32.mxu1 %v3200_v12  ;;  %v3214_v15 = vadd.f32 %v3197_v2, %v3178_v52  ;;  %v3215_v46 = vadd.f32 %v3197_v2, %v3179_v11  ;;  %v3216_v30 = vadd.f32 %v3197_v2, %v3180_v56  ;;  %v3217_v19 = vadd.f32 %v3197_v2, %v3181_v21  ;;  %v3738_v52 = vld [vmem:[#allocation2 + $0x3b0] sm:$0xff]  ;;  %v3739_v11 = vld [vmem:[#allocation2 + $0x3b8] sm:$0xff]  ;;  %v3740_v21 = vld [vmem:[#allocation2 + $0x3c0] sm:$0xff] }
 0x7e5   :  { %v3218_v48 = vadd.f32 %v3197_v2, %v3182_v57  ;;  %v3183_v23 = vmul.f32 %v8785_v9, %v8712_v14  ;;  %v3184_v4 = vmul.f32 %v8785_v9, %v8727_v37  ;;  %v3185_v36 = vmul.f32 %v8785_v9, %v8724_v54  ;;  %v3741_v57 = vld [vmem:[#allocation2 + $0x3c8] sm:$0xff]  ;;  %v3743_v12 = vld [vmem:[#allocation2 + $0x3d8] sm:$0xff] }
 0x7e6   :  { %v3186_v49 = vmul.f32 %v8785_v9, %v8739_v33  ;;  %v3187_v7 = vmul.f32 %v8785_v9, %v8736_v27  ;;  %v3188_v13 = vmul.f32 %v8785_v9, %v8751_v24  ;;  %v3189_v44 = vmul.f32 %v8785_v9, %v8748_v40 }
 0x7e7   :  { %5889 = vmatmul.mubr.f32.gmra.mrb[82].mxu1 %v3201_v60  ;;  %v3219_v14 = vadd.f32 %v3197_v2, %v3183_v23  ;;  %v3220_v42 = vadd.f32 %v3197_v2, %v3184_v4  ;;  %v3221_v45 = vadd.f32 %v3197_v2, %v3185_v36  ;;  %v3190_v37 = vmul.f32 %v8785_v9, %v8763_v17  ;;  %v3733_v17 = vld [vmem:[#allocation2 + $0x388] sm:$0xff] }
 0x7e8   :  { %5891 = vmatprep.mubr.f32.mxu1 %v3202_v31  ;;  %v3222_v54 = vadd.f32 %v3197_v2, %v3186_v49  ;;  %v3223_v18 = vadd.f32 %v3197_v2, %v3187_v7  ;;  %v3224_v33 = vadd.f32 %v3197_v2, %v3188_v13  ;;  %v3225_v39 = vadd.f32 %v3197_v2, %v3189_v44  ;;  %v3744_v31 = vld [vmem:[#allocation2 + $0x3e0] sm:$0xff] }
 0x7e9   :  { %v3226_v53 = vadd.f32 %v3197_v2, %v3190_v37  ;;  %v3191_v27 = vmul.f32 %v8785_v9, %v8760_v29  ;;  %v3192_v24 = vmul.f32 %v8785_v9, %v8774_v28  ;;  %v3193_v40 = vmul.f32 %v8785_v9, %v8772_v3  ;;  %v3732_v29 = vld [vmem:[#allocation2 + $0x380] sm:$0xff]  ;;  %v3734_v28 = vld [vmem:[#allocation2 + $0x390] sm:$0xff]  ;;  %v3735_v9 = vld [vmem:[#allocation2 + $0x398] sm:$0xff] }
 0x7ea   :  { %v6365_v3 = vpack.c.bf16 %v3733_v17, %v3732_v29  ;;  %v6369_v10 = vpack.c.bf16 %v3735_v9, %v3734_v28  ;;  %v6377_v56 = vpack.c.bf16 %v3739_v11, %v3738_v52  ;;  %v6381_v41 = vpack.c.bf16 %v3741_v57, %v3740_v21 }
 0x7eb   :  { %5892 = vmatmul.mubr.f32.gmra.mrb[84].mxu1 %v3203_v35  ;;  %v3227_v8 = vadd.f32 %v3197_v2, %v3191_v27  ;;  %v3228_v0 = vadd.f32 %v3197_v2, %v3192_v24  ;;  %v3229_v55 = vadd.f32 %v3197_v2, %v3193_v40  ;;  %v3736_v2 = vld [vmem:[#allocation2 + $0x3a0] sm:$0xff]  ;;  %v6385_v60 = vpack.c.bf16 %v3743_v12, %v3742_v61  ;;  %v3745_v35 = vld [vmem:[#allocation2 + $0x3e8] sm:$0xff] }
 0x7ec   :  { %5894 = vmatprep.mubr.f32.mxu1 %v3204_v51  ;;  %6366 = vmatprep.subr.bf16.mxu0 %v6365_v3  ;;  %v6373_v16 = vpack.c.bf16 %v3737_v25, %v3736_v2  ;;  %v6389_v51 = vpack.c.bf16 %v3745_v35, %v3744_v31 }
 0x7ed   :  { %6368 = vmatpush3.bf16.msra.mxu0 %v6365_v3 }
 0x7ee   :  { %6370 = vmatprep.subr.bf16.mxu0 %v6369_v10 }
 0x7ef   :  { %5895 = vmatmul.mubr.f32.gmra.mrb[86].mxu1 %v3205_v6  ;;  %v3746_v6 = vld [vmem:[#allocation2 + $0x3f0] sm:$0xff] }
 0x7f0   :  { %5897 = vmatprep.mubr.f32.mxu1 %v3206_v34  ;;  %v3747_v34 = vld [vmem:[#allocation2 + $0x3f8] sm:$0xff] }
 0x7f1   :  { %6372 = vmatpush3.bf16.msra.mxu0 %v6369_v10 }
 0x7f2   :  { %6374 = vmatprep.subr.bf16.mxu0 %v6373_v16 }
 0x7f3   :  { %5898 = vmatmul.mubr.f32.gmra.mrb[88].mxu1 %v3207_v62  ;;  %v8856_v62 = vld [vmem:[%s9832_s2 + $0x10] sm:$0xff] }
 0x7f4   :  { %5900 = vmatprep.mubr.f32.mxu1 %v3208_v26  ;;  %v6393_v26 = vpack.c.bf16 %v3747_v34, %v3746_v6 }
 0x7f5   :  { %6376 = vmatpush3.bf16.msra.mxu0 %v6373_v16 }
 0x7f6   :  { %6378 = vmatprep.subr.bf16.mxu0 %v6377_v56 }
 0x7f7   :  { %5901 = vmatmul.mubr.f32.gmra.mrb[90].mxu1 %v3209_v50  ;;  %v8860_v50 = vrot.slane %v8856_v62, %v9860_v59 }
 0x7f8   :  { %5903 = vmatprep.mubr.f32.mxu1 %v3210_v22 }
 0x7f9   :  { %6380 = vmatpush3.bf16.msra.mxu0 %v6377_v56 }
 0x7fa   :  { %6382 = vmatprep.subr.bf16.mxu0 %v6381_v41 }
 0x7fb   :  { %5904 = vmatmul.mubr.f32.gmra.mrb[92].mxu1 %v3211_v63 }
 0x7fc   :  { %5906 = vmatprep.mubr.f32.mxu1 %v3212_v32 }
 0x7fd   :  { %6384 = vmatpush3.bf16.msra.mxu0 %v6381_v41 }
 0x7fe   :  { %6386 = vmatprep.subr.bf16.mxu0 %v6385_v60 }
 0x7ff   :  { %5907 = vmatmul.mubr.f32.gmra.mrb[94].mxu1 %v3213_v5 }
 0x800   :  { %5909 = vmatprep.mubr.f32.mxu1 %v3214_v15 }
 0x801   :  { %6388 = vmatpush3.bf16.msra.mxu0 %v6385_v60 }
 0x802   :  { %6390 = vmatprep.subr.bf16.mxu0 %v6389_v51 }
 0x803   :  { %5910 = vmatmul.mubr.f32.gmra.mrb[96].mxu1 %v3215_v46 }
 0x804   :  { %5912 = vmatprep.mubr.f32.mxu1 %v3216_v30 }
 0x805   :  { %6392 = vmatpush3.bf16.msra.mxu0 %v6389_v51 }
 0x806   :  { %6394 = vmatprep.subr.bf16.mxu0 %v6393_v26 }
 0x807   :  { %5913 = vmatmul.mubr.f32.gmra.mrb[98].mxu1 %v3217_v19 }
 0x808   :  { %5915 = vmatprep.mubr.f32.mxu1 %v3218_v48 }
 0x809   :  { %6396 = vmatpush3.bf16.msra.mxu0 %v6393_v26 }
 0x80b   :  { %5916 = vmatmul.mubr.f32.gmra.mrb[100].mxu1 %v3219_v14 }
 0x80c   :  { %5918 = vmatprep.mubr.f32.mxu1 %v3220_v42 }
 0x80f   :  { %5919 = vmatmul.mubr.f32.gmra.mrb[102].mxu1 %v3221_v45 }
 0x810   :  { %5921 = vmatprep.mubr.f32.mxu1 %v3222_v54 }
 0x813   :  { %5922 = vmatmul.mubr.f32.gmra.mrb[104].mxu1 %v3223_v18 }
 0x814   :  { %5924 = vmatprep.mubr.f32.mxu1 %v3224_v33 }
 0x817   :  { %5925 = vmatmul.mubr.f32.gmra.mrb[106].mxu1 %v3225_v39 }
 0x818   :  { %5927 = vmatprep.mubr.f32.mxu1 %v3226_v53 }
 0x81b   :  { %5928 = vmatmul.mubr.f32.gmra.mrb[108].mxu1 %v3227_v8 }
 0x81c   :  { %5930 = vmatprep.mubr.f32.mxu1 %v3228_v0 }
 0x81f   :  { %5931 = vmatmul.mubr.f32.gmra.mrb[110].mxu1 %v3229_v55 }
 0x8b6   :  { %v5887_v22 = vpop.f32.mrb[80].mxu1 }
 0x8b7   :  { %v3323_v63 = vadd.f32 %v5887_v22, %v8860_v50  ;;  %v3317_v32 = vpop.f32.mrb[81].mxu1 }
 0x8b8   :  { %v3318_v5 = vadd.f32 %v3317_v32, %v8860_v50 }
 0x8b9   :  { %v3477_v15 = vmul.f32 0.2, %v3323_v63 }
 0x8ba   :  { %v3476_v46 = vmul.f32 0.2, %v3318_v5  ;;  %v5890_v30 = vpop.f32.mrb[82].mxu1 }
 0x8bb   :  { %v8864_v19 = vmax.f32 %v3323_v63, %v3477_v15  ;;  %v3333_v48 = vadd.f32 %v5890_v30, %v8860_v50  ;;  %v3327_v23 = vpop.f32.mrb[83].mxu1 }
 0x8bc   :  { %v8867_v4 = vmax.f32 %v3318_v5, %v3476_v46  ;;  %v3328_v36 = vadd.f32 %v3327_v23, %v8860_v50 }
 0x8bd   :  { %v3479_v49 = vmul.f32 0.2, %v3333_v48  ;;  %v3579_v7 = vmul.f32 %v8864_v19, %v8864_v19 }
 0x8be   :  { %v3578_v13 = vmul.f32 %v8867_v4, %v8867_v4  ;;  %v3478_v44 = vmul.f32 0.2, %v3328_v36  ;;  %v5893_v14 = vpop.f32.mrb[84].mxu1  ;;  %v3540_v54 = vadd.f32 %v8864_v19, %v8867_v4 }
 0x8bf   :  { %v8874_v42 = vmax.f32 %v3333_v48, %v3479_v49  ;;  %v3343_v45 = vadd.f32 %v5893_v14, %v8860_v50  ;;  %v3337_v37 = vpop.f32.mrb[85].mxu1 }
 0x8c0   :  { %v8879_v18 = vmax.f32 %v3328_v36, %v3478_v44  ;;  %v3338_v33 = vadd.f32 %v3337_v37, %v8860_v50  ;;  %v3610_v53 = vadd.f32 %v3579_v7, %v3578_v13 }
 0x8c1   :  { %v3481_v39 = vmul.f32 0.2, %v3343_v45  ;;  %v3581_v0 = vmul.f32 %v8874_v42, %v8874_v42 }
 0x8c2   :  { %v3541_v27 = vadd.f32 %v3540_v54, %v8879_v18  ;;  %v3580_v24 = vmul.f32 %v8879_v18, %v8879_v18  ;;  %v3480_v40 = vmul.f32 0.2, %v3338_v33  ;;  %v5896_v8 = vpop.f32.mrb[86].mxu1 }
 0x8c3   :  { %v8887_v55 = vmax.f32 %v3343_v45, %v3481_v39  ;;  %v3353_v29 = vadd.f32 %v5896_v8, %v8860_v50  ;;  %v3347_v17 = vpop.f32.mrb[87].mxu1 }
 0x8c4   :  { %v3611_v3 = vadd.f32 %v3610_v53, %v3580_v24  ;;  %v8890_v28 = vmax.f32 %v3338_v33, %v3480_v40  ;;  %v3542_v9 = vadd.f32 %v3541_v27, %v8874_v42  ;;  %v3348_v10 = vadd.f32 %v3347_v17, %v8860_v50 }
 0x8c5   :  { %v3483_v2 = vmul.f32 0.2, %v3353_v29  ;;  %v3583_v21 = vmul.f32 %v8887_v55, %v8887_v55 }
 0x8c6   :  { %v3543_v25 = vadd.f32 %v3542_v9, %v8890_v28  ;;  %v3582_v16 = vmul.f32 %v8890_v28, %v8890_v28  ;;  %v3612_v52 = vadd.f32 %v3611_v3, %v3581_v0  ;;  %v3482_v11 = vmul.f32 0.2, %v3348_v10  ;;  %v5899_v56 = vpop.f32.mrb[88].mxu1 }
 0x8c7   :  { %v8899_v57 = vmax.f32 %v3353_v29, %v3483_v2  ;;  %v3363_v41 = vadd.f32 %v5899_v56, %v8860_v50  ;;  %v3357_v61 = vpop.f32.mrb[89].mxu1 }
 0x8c8   :  { %v3613_v12 = vadd.f32 %v3612_v52, %v3582_v16  ;;  %v8902_v60 = vmax.f32 %v3348_v10, %v3482_v11  ;;  %v3544_v31 = vadd.f32 %v3543_v25, %v8887_v55  ;;  %v3358_v35 = vadd.f32 %v3357_v61, %v8860_v50 }
 0x8c9   :  { %v3485_v51 = vmul.f32 0.2, %v3363_v41  ;;  %v3585_v32 = vmul.f32 %v8899_v57, %v8899_v57 }
 0x8ca   :  { %v3545_v6 = vadd.f32 %v3544_v31, %v8902_v60  ;;  %v3584_v34 = vmul.f32 %v8902_v60, %v8902_v60  ;;  %v3614_v26 = vadd.f32 %v3613_v12, %v3583_v21  ;;  %v3484_v22 = vmul.f32 0.2, %v3358_v35  ;;  %v5902_v63 = vpop.f32.mrb[90].mxu1 }
 0x8cb   :  { %v8911_v5 = vmax.f32 %v3363_v41, %v3485_v51  ;;  %v3373_v15 = vadd.f32 %v5902_v63, %v8860_v50  ;;  %v3367_v46 = vpop.f32.mrb[91].mxu1 }
 0x8cc   :  { %v3615_v30 = vadd.f32 %v3614_v26, %v3584_v34  ;;  %v8914_v48 = vmax.f32 %v3358_v35, %v3484_v22  ;;  %v3546_v23 = vadd.f32 %v3545_v6, %v8899_v57  ;;  %v3368_v36 = vadd.f32 %v3367_v46, %v8860_v50 }
 0x8cd   :  { %v3487_v49 = vmul.f32 0.2, %v3373_v15  ;;  %v3587_v37 = vmul.f32 %v8911_v5, %v8911_v5 }
 0x8ce   :  { %v3547_v7 = vadd.f32 %v3546_v23, %v8914_v48  ;;  %v3586_v13 = vmul.f32 %v8914_v48, %v8914_v48  ;;  %v3616_v44 = vadd.f32 %v3615_v30, %v3585_v32  ;;  %v3486_v14 = vmul.f32 0.2, %v3368_v36  ;;  %v5905_v45 = vpop.f32.mrb[92].mxu1 }
 0x8cf   :  { %v8923_v54 = vmax.f32 %v3373_v15, %v3487_v49  ;;  %v3383_v33 = vadd.f32 %v5905_v45, %v8860_v50  ;;  %v3377_v39 = vpop.f32.mrb[93].mxu1 }
 0x8d0   :  { %v3617_v53 = vadd.f32 %v3616_v44, %v3586_v13  ;;  %v8926_v27 = vmax.f32 %v3368_v36, %v3486_v14  ;;  %v3548_v24 = vadd.f32 %v3547_v7, %v8911_v5  ;;  %v3378_v40 = vadd.f32 %v3377_v39, %v8860_v50 }
 0x8d1   :  { %v3489_v8 = vmul.f32 0.2, %v3383_v33  ;;  %v3589_v10 = vmul.f32 %v8923_v54, %v8923_v54 }
 0x8d2   :  { %v3549_v0 = vadd.f32 %v3548_v24, %v8926_v27  ;;  %v3588_v29 = vmul.f32 %v8926_v27, %v8926_v27  ;;  %v3618_v17 = vadd.f32 %v3617_v53, %v3587_v37  ;;  %v3488_v3 = vmul.f32 0.2, %v3378_v40  ;;  %v5908_v9 = vpop.f32.mrb[94].mxu1 }
 0x8d3   :  { %v8935_v2 = vmax.f32 %v3383_v33, %v3489_v8  ;;  %v3393_v25 = vadd.f32 %v5908_v9, %v8860_v50  ;;  %v3387_v16 = vpop.f32.mrb[95].mxu1 }
 0x8d4   :  { %v3619_v52 = vadd.f32 %v3618_v17, %v3588_v29  ;;  %v8938_v11 = vmax.f32 %v3378_v40, %v3488_v3  ;;  %v3550_v56 = vadd.f32 %v3549_v0, %v8923_v54  ;;  %v3388_v21 = vadd.f32 %v3387_v16, %v8860_v50 }
 0x8d5   :  { %v3491_v41 = vmul.f32 0.2, %v3393_v25  ;;  %v3591_v6 = vmul.f32 %v8935_v2, %v8935_v2 }
 0x8d6   :  { %v3551_v61 = vadd.f32 %v3550_v56, %v8938_v11  ;;  %v3590_v12 = vmul.f32 %v8938_v11, %v8938_v11  ;;  %v3620_v31 = vadd.f32 %v3619_v52, %v3589_v10  ;;  %v3490_v35 = vmul.f32 0.2, %v3388_v21  ;;  %v5911_v51 = vpop.f32.mrb[96].mxu1 }
 0x8d7   :  { %v8947_v34 = vmax.f32 %v3393_v25, %v3491_v41  ;;  %v3403_v26 = vadd.f32 %v5911_v51, %v8860_v50  ;;  %v3397_v22 = vpop.f32.mrb[97].mxu1 }
 0x8d8   :  { %v3621_v63 = vadd.f32 %v3620_v31, %v3590_v12  ;;  %v8950_v32 = vmax.f32 %v3388_v21, %v3490_v35  ;;  %v3552_v15 = vadd.f32 %v3551_v61, %v8935_v2  ;;  %v3398_v46 = vadd.f32 %v3397_v22, %v8860_v50 }
 0x8d9   :  { %v3493_v30 = vmul.f32 0.2, %v3403_v26  ;;  %v3593_v44 = vmul.f32 %v8947_v34, %v8947_v34 }
 0x8da   :  { %v3553_v23 = vadd.f32 %v3552_v15, %v8950_v32  ;;  %v3592_v36 = vmul.f32 %v8950_v32, %v8950_v32  ;;  %v3622_v49 = vadd.f32 %v3621_v63, %v3591_v6  ;;  %v3492_v7 = vmul.f32 0.2, %v3398_v46  ;;  %v5914_v13 = vpop.f32.mrb[98].mxu1 }
 0x8db   :  { %v8959_v14 = vmax.f32 %v3403_v26, %v3493_v30  ;;  %v3413_v45 = vadd.f32 %v5914_v13, %v8860_v50  ;;  %v3407_v37 = vpop.f32.mrb[99].mxu1 }
 0x8dc   :  { %v3623_v33 = vadd.f32 %v3622_v49, %v3592_v36  ;;  %v8962_v39 = vmax.f32 %v3398_v46, %v3492_v7  ;;  %v3554_v53 = vadd.f32 %v3553_v23, %v8947_v34  ;;  %v3408_v24 = vadd.f32 %v3407_v37, %v8860_v50 }
 0x8dd   :  { %v3495_v40 = vmul.f32 0.2, %v3413_v45  ;;  %v3595_v9 = vmul.f32 %v8959_v14, %v8959_v14 }
 0x8de   :  { %v3555_v8 = vadd.f32 %v3554_v53, %v8962_v39  ;;  %v3594_v0 = vmul.f32 %v8962_v39, %v8962_v39  ;;  %v3624_v29 = vadd.f32 %v3623_v33, %v3593_v44  ;;  %v3494_v17 = vmul.f32 0.2, %v3408_v24  ;;  %v5917_v3 = vpop.f32.mrb[100].mxu1 }
 0x8df   :  { %v8971_v10 = vmax.f32 %v3413_v45, %v3495_v40  ;;  %v3423_v25 = vadd.f32 %v5917_v3, %v8860_v50  ;;  %v3417_v16 = vpop.f32.mrb[101].mxu1 }
 0x8e0   :  { %v3625_v52 = vadd.f32 %v3624_v29, %v3594_v0  ;;  %v8974_v56 = vmax.f32 %v3408_v24, %v3494_v17  ;;  %v3556_v21 = vadd.f32 %v3555_v8, %v8959_v14  ;;  %v3418_v41 = vadd.f32 %v3417_v16, %v8860_v50 }
 0x8e1   :  { %v3497_v61 = vmul.f32 0.2, %v3423_v25  ;;  %v3597_v26 = vmul.f32 %v8971_v10, %v8971_v10 }
 0x8e2   :  { %v3557_v12 = vadd.f32 %v3556_v21, %v8974_v56  ;;  %v3596_v31 = vmul.f32 %v8974_v56, %v8974_v56  ;;  %v3626_v35 = vadd.f32 %v3625_v52, %v3595_v9  ;;  %v3496_v51 = vmul.f32 0.2, %v3418_v41  ;;  %v5920_v6 = vpop.f32.mrb[102].mxu1 }
 0x8e3   :  { %v8983_v22 = vmax.f32 %v3423_v25, %v3497_v61  ;;  %v3433_v63 = vadd.f32 %v5920_v6, %v8860_v50  ;;  %v3427_v15 = vpop.f32.mrb[103].mxu1 }
 0x8e4   :  { %v3627_v46 = vadd.f32 %v3626_v35, %v3596_v31  ;;  %v8986_v30 = vmax.f32 %v3418_v41, %v3496_v51  ;;  %v3558_v23 = vadd.f32 %v3557_v12, %v8971_v10  ;;  %v3428_v36 = vadd.f32 %v3427_v15, %v8860_v50 }
 0x8e5   :  { %v3499_v49 = vmul.f32 0.2, %v3433_v63  ;;  %v3599_v33 = vmul.f32 %v8983_v22, %v8983_v22 }
 0x8e6   :  { %v3559_v7 = vadd.f32 %v3558_v23, %v8986_v30  ;;  %v3598_v13 = vmul.f32 %v8986_v30, %v8986_v30  ;;  %v3628_v44 = vadd.f32 %v3627_v46, %v3597_v26  ;;  %v3498_v45 = vmul.f32 0.2, %v3428_v36  ;;  %v5923_v37 = vpop.f32.mrb[104].mxu1 }
 0x8e7   :  { %v8995_v53 = vmax.f32 %v3433_v63, %v3499_v49  ;;  %v3443_v24 = vadd.f32 %v5923_v37, %v8860_v50  ;;  %v3437_v40 = vpop.f32.mrb[105].mxu1 }
 0x8e8   :  { %v3629_v8 = vadd.f32 %v3628_v44, %v3598_v13  ;;  %v8998_v0 = vmax.f32 %v3428_v36, %v3498_v45  ;;  %v3560_v29 = vadd.f32 %v3559_v7, %v8983_v22  ;;  %v3438_v17 = vadd.f32 %v3437_v40, %v8860_v50 }
 0x8e9   :  { %v3501_v3 = vmul.f32 0.2, %v3443_v24  ;;  %v3601_v41 = vmul.f32 %v8995_v53, %v8995_v53 }
 0x8ea   :  { %v3561_v9 = vadd.f32 %v3560_v29, %v8998_v0  ;;  %v3600_v25 = vmul.f32 %v8998_v0, %v8998_v0  ;;  %v3630_v16 = vadd.f32 %v3629_v8, %v3599_v33  ;;  %v3500_v52 = vmul.f32 0.2, %v3438_v17  ;;  %v5926_v21 = vpop.f32.mrb[106].mxu1 }
 0x8eb   :  { %v9007_v61 = vmax.f32 %v3443_v24, %v3501_v3  ;;  %v3453_v12 = vadd.f32 %v5926_v21, %v8860_v50  ;;  %v3447_v31 = vpop.f32.mrb[107].mxu1 }
 0x8ec   :  { %v3631_v35 = vadd.f32 %v3630_v16, %v3600_v25  ;;  %v9010_v51 = vmax.f32 %v3438_v17, %v3500_v52  ;;  %v3562_v6 = vadd.f32 %v3561_v9, %v8995_v53  ;;  %v3448_v26 = vadd.f32 %v3447_v31, %v8860_v50 }
 0x8ed   :  { %v3503_v63 = vmul.f32 0.2, %v3453_v12  ;;  %v3603_v7 = vmul.f32 %v9007_v61, %v9007_v61 }
 0x8ee   :  { %v3563_v15 = vadd.f32 %v3562_v6, %v9010_v51  ;;  %v3602_v46 = vmul.f32 %v9010_v51, %v9010_v51  ;;  %v3632_v23 = vadd.f32 %v3631_v35, %v3601_v41  ;;  %v3502_v36 = vmul.f32 0.2, %v3448_v26  ;;  %v5929_v49 = vpop.f32.mrb[108].mxu1 }
 0x8ef   :  { %v9019_v13 = vmax.f32 %v3453_v12, %v3503_v63  ;;  %v3463_v44 = vadd.f32 %v5929_v49, %v8860_v50  ;;  %v3457_v45 = vpop.f32.mrb[109].mxu1 }
 0x8f0   :  { %v3633_v37 = vadd.f32 %v3632_v23, %v3602_v46  ;;  %v9022_v33 = vmax.f32 %v3448_v26, %v3502_v36  ;;  %v3564_v24 = vadd.f32 %v3563_v15, %v9007_v61  ;;  %v3458_v40 = vadd.f32 %v3457_v45, %v8860_v50 }
 0x8f1   :  { %v3505_v8 = vmul.f32 0.2, %v3463_v44  ;;  %v3605_v16 = vmul.f32 %v9019_v13, %v9019_v13 }
 0x8f2   :  { %v3565_v29 = vadd.f32 %v3564_v24, %v9022_v33  ;;  %v3604_v17 = vmul.f32 %v9022_v33, %v9022_v33  ;;  %v3634_v3 = vadd.f32 %v3633_v37, %v3603_v7  ;;  %v3504_v9 = vmul.f32 0.2, %v3458_v40  ;;  %v5932_v25 = vpop.f32.mrb[110].mxu1 }
 0x8f3   :  { %v9031_v52 = vmax.f32 %v3463_v44, %v3505_v8  ;;  %v3473_v21 = vadd.f32 %v5932_v25, %v8860_v50  ;;  %v3467_v41 = vpop.f32.mrb[111].mxu1 }
 0x8f4   :  { %v3635_v12 = vadd.f32 %v3634_v3, %v3604_v17  ;;  %v9034_v31 = vmax.f32 %v3458_v40, %v3504_v9  ;;  %v3566_v35 = vadd.f32 %v3565_v29, %v9019_v13  ;;  %v3468_v6 = vadd.f32 %v3467_v41, %v8860_v50 }
 0x8f5   :  { %v3507_v26 = vmul.f32 0.2, %v3473_v21  ;;  %v3607_v36 = vmul.f32 %v9031_v52, %v9031_v52 }
 0x8f6   :  { %v3567_v63 = vadd.f32 %v3566_v35, %v9034_v31  ;;  %v3606_v15 = vmul.f32 %v9034_v31, %v9034_v31  ;;  %v3636_v46 = vadd.f32 %v3635_v12, %v3605_v16  ;;  %v3506_v23 = vmul.f32 0.2, %v3468_v6 }
 0x8f7   :  { %v9043_v7 = vmax.f32 %v3473_v21, %v3507_v26 }
 0x8f8   :  { %v3637_v49 = vadd.f32 %v3636_v46, %v3606_v15  ;;  %v9045_v44 = vmax.f32 %v3468_v6, %v3506_v23  ;;  %v3568_v45 = vadd.f32 %v3567_v63, %v9031_v52 }
 0x8f9   :  { %v3609_v40 = vmul.f32 %v9043_v7, %v9043_v7 }
 0x8fa   :  { %v3569_v50 = vadd.f32 %v3568_v45, %v9045_v44  ;;  %v3608_v37 = vmul.f32 %v9045_v44, %v9045_v44  ;;  %v3638_v24 = vadd.f32 %v3637_v49, %v3607_v36 }
 0x8fc   :  { %v3570_v8 = vadd.f32 %v3569_v50, %v9043_v7  ;;  %v3639_v29 = vadd.f32 %v3638_v24, %v3608_v37 }
 0x8fe   :  { %v3571_v17 = vrot.slane %v3570_v8, 4  ;;  %v3640_v3 = vadd.f32 %v3639_v29, %v3609_v40 }
 0x900   :  { %v3572_v9 = vadd.f32 %v3571_v17, %v3570_v8  ;;  %v3641_v25 = vrot.slane %v3640_v3, 4 }
 0x902   :  { %v3573_v16 = vrot.slane %v3572_v9, 2  ;;  %v3642_v21 = vadd.f32 %v3641_v25, %v3640_v3 }
 0x904   :  { %v3574_v41 = vadd.f32 %v3573_v16, %v3572_v9  ;;  %v3643_v12 = vrot.slane %v3642_v21, 2 }
 0x906   :  { %v3575_v35 = vrot.slane %v3574_v41, 1  ;;  %v3644_v6 = vadd.f32 %v3643_v12, %v3642_v21 }
 0x908   :  { %v3576_v26 = vadd.f32 %v3575_v35, %v3574_v41  ;;  %v3645_v63 = vrot.slane %v3644_v6, 1 }
 0x90a   :  { %v3577_v15 = vmul.f32 0.00390625, %v3576_v26  ;;  %v3646_v46 = vadd.f32 %v3645_v63, %v3644_v6 }
 0x90c   :  { %v3647_v23 = vmul.f32 0.00390625, %v3646_v46  ;;  %v3648_v36 = vmul.f32 %v3577_v15, %v3577_v15 }
 0x90e   :  { %v3649_v49 = vsub.f32 %v3647_v23, %v3648_v36 }
 0x910   :  { %v3650_v45 = vmax.f32 %v3649_v49, 0.0 }
 0x912   :  { %v3651_v50 = vadd.f32 1e-05, %v3650_v45 }
 0x914   :  { %6555 = vrsqrt.f32 %v3651_v50 }
 0x91e   :  { %v6556_v37 = vpop.eup %6555 }
 0x91f   :  { %v3653_v24 = vmul.f32 %v6556_v37, %v8856_v62 }
 0x921   :  { %v3654_v40 = vmul.f32 %v3653_v24, %v3577_v15  ;;  %v9056_v8 = vrot.slane %v3653_v24, %v6816_v38 }
 0x923   :  { %v3656_v29 = vrot.slane %v3654_v40, 7  ;;  %v3664_v17 = vmul.f32 %v9056_v8, %v8864_v19  ;;  %v3663_v3 = vmul.f32 %v9056_v8, %v8867_v4  ;;  %v3665_v9 = vmul.f32 %v9056_v8, %v8879_v18 }
 0x924   :  { %v3666_v25 = vmul.f32 %v9056_v8, %v8874_v42  ;;  %v3667_v16 = vmul.f32 %v9056_v8, %v8890_v28  ;;  %v3668_v21 = vmul.f32 %v9056_v8, %v8887_v55  ;;  %v3669_v41 = vmul.f32 %v9056_v8, %v8902_v60 }
 0x925   :  { %v3658_v19 = vsub.f32 %v8856_v62, %v3656_v29  ;;  %v3670_v4 = vmul.f32 %v9056_v8, %v8899_v57  ;;  %v3671_v18 = vmul.f32 %v9056_v8, %v8914_v48  ;;  %v3672_v42 = vmul.f32 %v9056_v8, %v8911_v5 }
 0x926   :  { %v3673_v28 = vmul.f32 %v9056_v8, %v8926_v27  ;;  %v3674_v55 = vmul.f32 %v9056_v8, %v8923_v54  ;;  %v3675_v60 = vmul.f32 %v9056_v8, %v8938_v11  ;;  %v3676_v12 = vmul.f32 %v9056_v8, %v8935_v2 }
 0x927   :  { %v3698_v57 = vrot.slane %v3658_v19, %v9855_v58  ;;  %v3677_v48 = vmul.f32 %v9056_v8, %v8950_v32  ;;  %v3678_v5 = vmul.f32 %v9056_v8, %v8947_v34  ;;  %v3679_v27 = vmul.f32 %v9056_v8, %v8962_v39 }
 0x928   :  { %v3680_v54 = vmul.f32 %v9056_v8, %v8959_v14  ;;  %v3681_v11 = vmul.f32 %v9056_v8, %v8974_v56  ;;  %v3682_v2 = vmul.f32 %v9056_v8, %v8971_v10  ;;  %v3683_v58 = vmul.f32 %v9056_v8, %v8986_v30 }
 0x929   :  { %v3700_v35 = vadd.f32 %v3698_v57, %v3664_v17  ;;  %v3699_v32 = vadd.f32 %v3698_v57, %v3663_v3  ;;  %v3701_v6 = vadd.f32 %v3698_v57, %v3665_v9  ;;  %v3702_v26 = vadd.f32 %v3698_v57, %v3666_v25 }
 0x92a   :  { %v3703_v34 = vadd.f32 %v3698_v57, %v3667_v16  ;;  %v3704_v63 = vadd.f32 %v3698_v57, %v3668_v21  ;;  %v3705_v15 = vadd.f32 %v3698_v57, %v3669_v41  ;;  %v3706_v39 = vadd.f32 %v3698_v57, %v3670_v4 }
 0x92b   :  { %5965 = vmatprep.mubr.f32.mxu0 %v3699_v32  ;;  %v3707_v46 = vadd.f32 %v3698_v57, %v3671_v18  ;;  %v3708_v14 = vadd.f32 %v3698_v57, %v3672_v42  ;;  %v3709_v23 = vadd.f32 %v3698_v57, %v3673_v28  ;;  %v3710_v36 = vadd.f32 %v3698_v57, %v3674_v55  ;;  %v4243_v32 = vld [vmem:[#allocation2 + $0x450] sm:$0xff] }
 0x92c   :  { %5966 = vmatmul.mubr.f32.vlgmr.msra.gmra.mrb[80].mxu0 %v3700_v35  ;;  %v3711_v56 = vadd.f32 %v3698_v57, %v3675_v60  ;;  %v3712_v49 = vadd.f32 %v3698_v57, %v3676_v12  ;;  %v3713_v10 = vadd.f32 %v3698_v57, %v3677_v48  ;;  %v3714_v45 = vadd.f32 %v3698_v57, %v3678_v5  ;;  %v4238_v48 = vld [vmem:[#allocation2 + $0x428] sm:$0xff] }
 0x92d   :  { %5968 = vmatprep.mubr.f32.mxu0 %v3701_v6  ;;  %v3715_v30 = vadd.f32 %v3698_v57, %v3679_v27  ;;  %v3716_v50 = vadd.f32 %v3698_v57, %v3680_v54  ;;  %v3717_v37 = vadd.f32 %v3698_v57, %v3681_v11  ;;  %v3718_v24 = vadd.f32 %v3698_v57, %v3682_v2  ;;  %v4239_v27 = vld [vmem:[#allocation2 + $0x430] sm:$0xff]  ;;  %v4240_v54 = vld [vmem:[#allocation2 + $0x438] sm:$0xff]  ;;  %v4241_v2 = vld [vmem:[#allocation2 + $0x440] sm:$0xff] }
 0x92e   :  { %v3719_v40 = vadd.f32 %v3698_v57, %v3683_v58  ;;  %v3684_v29 = vmul.f32 %v9056_v8, %v8983_v22  ;;  %v3685_v17 = vmul.f32 %v9056_v8, %v8998_v0  ;;  %v3686_v3 = vmul.f32 %v9056_v8, %v8995_v53  ;;  %v4242_v58 = vld [vmem:[#allocation2 + $0x448] sm:$0xff]  ;;  %v4244_v6 = vld [vmem:[#allocation2 + $0x458] sm:$0xff] }
 0x92f   :  { %v3687_v9 = vmul.f32 %v9056_v8, %v9010_v51  ;;  %v3688_v25 = vmul.f32 %v9056_v8, %v9007_v61  ;;  %v3689_v16 = vmul.f32 %v9056_v8, %v9022_v33  ;;  %v3690_v21 = vmul.f32 %v9056_v8, %v9019_v13 }
 0x930   :  { %5969 = vmatmul.mubr.f32.gmra.mrb[82].mxu0 %v3702_v26  ;;  %v3720_v22 = vadd.f32 %v3698_v57, %v3684_v29  ;;  %v3721_v41 = vadd.f32 %v3698_v57, %v3685_v17  ;;  %v3722_v19 = vadd.f32 %v3698_v57, %v3686_v3  ;;  %v3691_v0 = vmul.f32 %v9056_v8, %v9034_v31  ;;  %v4234_v31 = vld [vmem:[#allocation2 + $0x408] sm:$0xff] }
 0x931   :  { %5971 = vmatprep.mubr.f32.mxu0 %v3703_v34  ;;  %v3723_v53 = vadd.f32 %v3698_v57, %v3687_v9  ;;  %v3724_v4 = vadd.f32 %v3698_v57, %v3688_v25  ;;  %v3725_v51 = vadd.f32 %v3698_v57, %v3689_v16  ;;  %v3726_v18 = vadd.f32 %v3698_v57, %v3690_v21  ;;  %v4245_v34 = vld [vmem:[#allocation2 + $0x460] sm:$0xff] }
 0x932   :  { %v3727_v42 = vadd.f32 %v3698_v57, %v3691_v0  ;;  %v3692_v61 = vmul.f32 %v9056_v8, %v9031_v52  ;;  %v3693_v33 = vmul.f32 %v9056_v8, %v9045_v44  ;;  %v3694_v13 = vmul.f32 %v9056_v8, %v9043_v7  ;;  %v4233_v52 = vld [vmem:[#allocation2 + $0x400] sm:$0xff]  ;;  %v4235_v44 = vld [vmem:[#allocation2 + $0x410] sm:$0xff]  ;;  %v4236_v8 = vld [vmem:[#allocation2 + $0x418] sm:$0xff] }
 0x933   :  { %v6397_v7 = vpack.c.bf16 %v4234_v31, %v4233_v52  ;;  %v6401_v12 = vpack.c.bf16 %v4236_v8, %v4235_v44  ;;  %v6409_v11 = vpack.c.bf16 %v4240_v54, %v4239_v27  ;;  %v6413_v35 = vpack.c.bf16 %v4242_v58, %v4241_v2 }
 0x934   :  { %5972 = vmatmul.mubr.f32.gmra.mrb[84].mxu0 %v3704_v63  ;;  %v3728_v28 = vadd.f32 %v3698_v57, %v3692_v61  ;;  %v3729_v55 = vadd.f32 %v3698_v57, %v3693_v33  ;;  %v3730_v60 = vadd.f32 %v3698_v57, %v3694_v13  ;;  %v4237_v57 = vld [vmem:[#allocation2 + $0x420] sm:$0xff]  ;;  %v6417_v26 = vpack.c.bf16 %v4244_v6, %v4243_v32  ;;  %v4246_v63 = vld [vmem:[#allocation2 + $0x468] sm:$0xff] }
 0x935   :  { %5974 = vmatprep.mubr.f32.mxu0 %v3705_v15  ;;  %6398 = vmatprep.subr.bf16.mxu1 %v6397_v7  ;;  %v6405_v5 = vpack.c.bf16 %v4238_v48, %v4237_v57  ;;  %v6421_v15 = vpack.c.bf16 %v4246_v63, %v4245_v34 }
 0x936   :  { %6400 = vmatpush3.bf16.msra.mxu1 %v6397_v7 }
 0x937   :  { %6402 = vmatprep.subr.bf16.mxu1 %v6401_v12 }
 0x938   :  { %5975 = vmatmul.mubr.f32.gmra.mrb[86].mxu0 %v3706_v39  ;;  %v4247_v39 = vld [vmem:[#allocation2 + $0x470] sm:$0xff] }
 0x939   :  { %5977 = vmatprep.mubr.f32.mxu0 %v3707_v46  ;;  %v4248_v46 = vld [vmem:[#allocation2 + $0x478] sm:$0xff] }
 0x93a   :  { %6404 = vmatpush3.bf16.msra.mxu1 %v6401_v12 }
 0x93b   :  { %6406 = vmatprep.subr.bf16.mxu1 %v6405_v5 }
 0x93c   :  { %5978 = vmatmul.mubr.f32.gmra.mrb[88].mxu0 %v3708_v14  ;;  %v6425_v14 = vpack.c.bf16 %v4248_v46, %v4247_v39 }
 0x93d   :  { %5980 = vmatprep.mubr.f32.mxu0 %v3709_v23  ;;  %v9126_v23 = vrot.slane %v8856_v62, %v7514_v20 }
 0x93e   :  { %6408 = vmatpush3.bf16.msra.mxu1 %v6405_v5 }
 0x93f   :  { %6410 = vmatprep.subr.bf16.mxu1 %v6409_v11 }
 0x940   :  { %5981 = vmatmul.mubr.f32.gmra.mrb[90].mxu0 %v3710_v36 }
 0x941   :  { %5983 = vmatprep.mubr.f32.mxu0 %v3711_v56 }
 0x942   :  { %6412 = vmatpush3.bf16.msra.mxu1 %v6409_v11 }
 0x943   :  { %6414 = vmatprep.subr.bf16.mxu1 %v6413_v35 }
 0x944   :  { %5984 = vmatmul.mubr.f32.gmra.mrb[92].mxu0 %v3712_v49 }
 0x945   :  { %5986 = vmatprep.mubr.f32.mxu0 %v3713_v10 }
 0x946   :  { %6416 = vmatpush3.bf16.msra.mxu1 %v6413_v35 }
 0x947   :  { %6418 = vmatprep.subr.bf16.mxu1 %v6417_v26 }
 0x948   :  { %5987 = vmatmul.mubr.f32.gmra.mrb[94].mxu0 %v3714_v45 }
 0x949   :  { %5989 = vmatprep.mubr.f32.mxu0 %v3715_v30 }
 0x94a   :  { %6420 = vmatpush3.bf16.msra.mxu1 %v6417_v26 }
 0x94b   :  { %6422 = vmatprep.subr.bf16.mxu1 %v6421_v15 }
 0x94c   :  { %5990 = vmatmul.mubr.f32.gmra.mrb[96].mxu0 %v3716_v50 }
 0x94d   :  { %5992 = vmatprep.mubr.f32.mxu0 %v3717_v37 }
 0x94e   :  { %6424 = vmatpush3.bf16.msra.mxu1 %v6421_v15 }
 0x94f   :  { %6426 = vmatprep.subr.bf16.mxu1 %v6425_v14 }
 0x950   :  { %5993 = vmatmul.mubr.f32.gmra.mrb[98].mxu0 %v3718_v24 }
 0x951   :  { %5995 = vmatprep.mubr.f32.mxu0 %v3719_v40 }
 0x952   :  { %6428 = vmatpush3.bf16.msra.mxu1 %v6425_v14 }
 0x954   :  { %5996 = vmatmul.mubr.f32.gmra.mrb[100].mxu0 %v3720_v22 }
 0x955   :  { %5998 = vmatprep.mubr.f32.mxu0 %v3721_v41 }
 0x958   :  { %5999 = vmatmul.mubr.f32.gmra.mrb[102].mxu0 %v3722_v19 }
 0x959   :  { %6001 = vmatprep.mubr.f32.mxu0 %v3723_v53 }
 0x95c   :  { %6002 = vmatmul.mubr.f32.gmra.mrb[104].mxu0 %v3724_v4 }
 0x95d   :  { %6004 = vmatprep.mubr.f32.mxu0 %v3725_v51 }
 0x960   :  { %6005 = vmatmul.mubr.f32.gmra.mrb[106].mxu0 %v3726_v18 }
 0x961   :  { %6007 = vmatprep.mubr.f32.mxu0 %v3727_v42 }
 0x964   :  { %6008 = vmatmul.mubr.f32.gmra.mrb[108].mxu0 %v3728_v28 }
 0x965   :  { %6010 = vmatprep.mubr.f32.mxu0 %v3729_v55 }
 0x968   :  { %6011 = vmatmul.mubr.f32.gmra.mrb[110].mxu0 %v3730_v60 }
 0x9ff   :  { %v5967_v36 = vpop.f32.mrb[80].mxu0 }
 0xa00   :  { %v3824_v56 = vadd.f32 %v5967_v36, %v9126_v23  ;;  %v3818_v49 = vpop.f32.mrb[81].mxu0 }
 0xa01   :  { %v3819_v10 = vadd.f32 %v3818_v49, %v9126_v23 }
 0xa02   :  { %v3978_v45 = vmul.f32 0.2, %v3824_v56 }
 0xa03   :  { %v3977_v30 = vmul.f32 0.2, %v3819_v10  ;;  %v5970_v50 = vpop.f32.mrb[82].mxu0 }
 0xa04   :  { %v9130_v37 = vmax.f32 %v3824_v56, %v3978_v45  ;;  %v3834_v24 = vadd.f32 %v5970_v50, %v9126_v23  ;;  %v3828_v40 = vpop.f32.mrb[83].mxu0 }
 0xa05   :  { %v9133_v29 = vmax.f32 %v3819_v10, %v3977_v30  ;;  %v3829_v20 = vadd.f32 %v3828_v40, %v9126_v23 }
 0xa06   :  { %v3980_v62 = vmul.f32 0.2, %v3834_v24  ;;  %v4080_v17 = vmul.f32 %v9130_v37, %v9130_v37 }
 0xa07   :  { %v4079_v3 = vmul.f32 %v9133_v29, %v9133_v29  ;;  %v3979_v9 = vmul.f32 0.2, %v3829_v20  ;;  %v5973_v25 = vpop.f32.mrb[84].mxu0  ;;  %v4041_v41 = vadd.f32 %v9130_v37, %v9133_v29 }
 0xa08   :  { %v9140_v16 = vmax.f32 %v3834_v24, %v3980_v62  ;;  %v3844_v21 = vadd.f32 %v5973_v25, %v9126_v23  ;;  %v3838_v22 = vpop.f32.mrb[85].mxu0 }
 0xa09   :  { %v9145_v19 = vmax.f32 %v3829_v20, %v3979_v9  ;;  %v3839_v0 = vadd.f32 %v3838_v22, %v9126_v23  ;;  %v4111_v4 = vadd.f32 %v4080_v17, %v4079_v3 }
 0xa0a   :  { %v3982_v53 = vmul.f32 0.2, %v3844_v21  ;;  %v4082_v33 = vmul.f32 %v9140_v16, %v9140_v16 }
 0xa0b   :  { %v4042_v51 = vadd.f32 %v4041_v41, %v9145_v19  ;;  %v4081_v18 = vmul.f32 %v9145_v19, %v9145_v19  ;;  %v3981_v42 = vmul.f32 0.2, %v3839_v0  ;;  %v5976_v61 = vpop.f32.mrb[86].mxu0 }
 0xa0c   :  { %v9153_v13 = vmax.f32 %v3844_v21, %v3982_v53  ;;  %v3854_v28 = vadd.f32 %v5976_v61, %v9126_v23  ;;  %v3848_v55 = vpop.f32.mrb[87].mxu0 }
 0xa0d   :  { %v4112_v60 = vadd.f32 %v4111_v4, %v4081_v18  ;;  %v9156_v52 = vmax.f32 %v3839_v0, %v3981_v42  ;;  %v4043_v31 = vadd.f32 %v4042_v51, %v9140_v16  ;;  %v3849_v7 = vadd.f32 %v3848_v55, %v9126_v23 }
 0xa0e   :  { %v3984_v44 = vmul.f32 0.2, %v3854_v28  ;;  %v4084_v27 = vmul.f32 %v9153_v13, %v9153_v13 }
 0xa0f   :  { %v4044_v8 = vadd.f32 %v4043_v31, %v9156_v52  ;;  %v4083_v12 = vmul.f32 %v9156_v52, %v9156_v52  ;;  %v4113_v57 = vadd.f32 %v4112_v60, %v4082_v33  ;;  %v3983_v48 = vmul.f32 0.2, %v3849_v7  ;;  %v5979_v5 = vpop.f32.mrb[88].mxu0 }
 0xa10   :  { %v9165_v54 = vmax.f32 %v3854_v28, %v3984_v44  ;;  %v3864_v11 = vadd.f32 %v5979_v5, %v9126_v23  ;;  %v3858_v2 = vpop.f32.mrb[89].mxu0 }
 0xa11   :  { %v4114_v58 = vadd.f32 %v4113_v57, %v4083_v12  ;;  %v9168_v35 = vmax.f32 %v3849_v7, %v3983_v48  ;;  %v4045_v32 = vadd.f32 %v4044_v8, %v9153_v13  ;;  %v3859_v6 = vadd.f32 %v3858_v2, %v9126_v23 }
 0xa12   :  { %v3986_v26 = vmul.f32 0.2, %v3864_v11  ;;  %v4086_v14 = vmul.f32 %v9165_v54, %v9165_v54 }
 0xa13   :  { %v4046_v34 = vadd.f32 %v4045_v32, %v9168_v35  ;;  %v4085_v63 = vmul.f32 %v9168_v35, %v9168_v35  ;;  %v4115_v15 = vadd.f32 %v4114_v58, %v4084_v27  ;;  %v3985_v39 = vmul.f32 0.2, %v3859_v6  ;;  %v5982_v46 = vpop.f32.mrb[90].mxu0 }
 0xa14   :  { %v9177_v36 = vmax.f32 %v3864_v11, %v3986_v26  ;;  %v3874_v56 = vadd.f32 %v5982_v46, %v9126_v23  ;;  %v3868_v49 = vpop.f32.mrb[91].mxu0 }
 0xa15   :  { %v4116_v10 = vadd.f32 %v4115_v15, %v4085_v63  ;;  %v9180_v45 = vmax.f32 %v3859_v6, %v3985_v39  ;;  %v4047_v30 = vadd.f32 %v4046_v34, %v9165_v54  ;;  %v3869_v50 = vadd.f32 %v3868_v49, %v9126_v23 }
 0xa16   :  { %v3988_v24 = vmul.f32 0.2, %v3874_v56  ;;  %v4088_v9 = vmul.f32 %v9177_v36, %v9177_v36 }
 0xa17   :  { %v4048_v40 = vadd.f32 %v4047_v30, %v9180_v45  ;;  %v4087_v20 = vmul.f32 %v9180_v45, %v9180_v45  ;;  %v4117_v62 = vadd.f32 %v4116_v10, %v4086_v14  ;;  %v3987_v17 = vmul.f32 0.2, %v3869_v50  ;;  %v5985_v3 = vpop.f32.mrb[92].mxu0 }
 0xa18   :  { %v9189_v25 = vmax.f32 %v3874_v56, %v3988_v24  ;;  %v3884_v21 = vadd.f32 %v5985_v3, %v9126_v23  ;;  %v3878_v22 = vpop.f32.mrb[93].mxu0 }
 0xa19   :  { %v4118_v41 = vadd.f32 %v4117_v62, %v4087_v20  ;;  %v9192_v0 = vmax.f32 %v3869_v50, %v3987_v17  ;;  %v4049_v53 = vadd.f32 %v4048_v40, %v9177_v36  ;;  %v3879_v4 = vadd.f32 %v3878_v22, %v9126_v23 }
 0xa1a   :  { %v3990_v51 = vmul.f32 0.2, %v3884_v21  ;;  %v4090_v55 = vmul.f32 %v9189_v25, %v9189_v25 }
 0xa1b   :  { %v4050_v18 = vadd.f32 %v4049_v53, %v9192_v0  ;;  %v4089_v42 = vmul.f32 %v9192_v0, %v9192_v0  ;;  %v4119_v61 = vadd.f32 %v4118_v41, %v4088_v9  ;;  %v3989_v33 = vmul.f32 0.2, %v3879_v4  ;;  %v5988_v28 = vpop.f32.mrb[94].mxu0 }
 0xa1c   :  { %v9201_v60 = vmax.f32 %v3884_v21, %v3990_v51  ;;  %v3894_v31 = vadd.f32 %v5988_v28, %v9126_v23  ;;  %v3888_v7 = vpop.f32.mrb[95].mxu0 }
 0xa1d   :  { %v4120_v44 = vadd.f32 %v4119_v61, %v4089_v42  ;;  %v9204_v8 = vmax.f32 %v3879_v4, %v3989_v33  ;;  %v4051_v12 = vadd.f32 %v4050_v18, %v9189_v25  ;;  %v3889_v57 = vadd.f32 %v3888_v7, %v9126_v23 }
 0xa1e   :  { %v3992_v48 = vmul.f32 0.2, %v3894_v31  ;;  %v4092_v32 = vmul.f32 %v9201_v60, %v9201_v60 }
 0xa1f   :  { %v4052_v5 = vadd.f32 %v4051_v12, %v9204_v8  ;;  %v4091_v27 = vmul.f32 %v9204_v8, %v9204_v8  ;;  %v4121_v11 = vadd.f32 %v4120_v44, %v4090_v55  ;;  %v3991_v2 = vmul.f32 0.2, %v3889_v57  ;;  %v5991_v58 = vpop.f32.mrb[96].mxu0 }
 0xa20   :  { %v9213_v6 = vmax.f32 %v3894_v31, %v3992_v48  ;;  %v3904_v26 = vadd.f32 %v5991_v58, %v9126_v23  ;;  %v3898_v34 = vpop.f32.mrb[97].mxu0 }
 0xa21   :  { %v4122_v63 = vadd.f32 %v4121_v11, %v4091_v27  ;;  %v9216_v15 = vmax.f32 %v3889_v57, %v3991_v2  ;;  %v4053_v39 = vadd.f32 %v4052_v5, %v9201_v60  ;;  %v3899_v46 = vadd.f32 %v3898_v34, %v9126_v23 }
 0xa22   :  { %v3994_v14 = vmul.f32 0.2, %v3904_v26  ;;  %v4094_v24 = vmul.f32 %v9213_v6, %v9213_v6 }
 0xa23   :  { %v4054_v56 = vadd.f32 %v4053_v39, %v9216_v15  ;;  %v4093_v49 = vmul.f32 %v9216_v15, %v9216_v15  ;;  %v4123_v10 = vadd.f32 %v4122_v63, %v4092_v32  ;;  %v3993_v30 = vmul.f32 0.2, %v3899_v46  ;;  %v5994_v50 = vpop.f32.mrb[98].mxu0 }
 0xa24   :  { %v9225_v40 = vmax.f32 %v3904_v26, %v3994_v14  ;;  %v3914_v20 = vadd.f32 %v5994_v50, %v9126_v23  ;;  %v3908_v62 = vpop.f32.mrb[99].mxu0 }
 0xa25   :  { %v4124_v17 = vadd.f32 %v4123_v10, %v4093_v49  ;;  %v9228_v3 = vmax.f32 %v3899_v46, %v3993_v30  ;;  %v4055_v9 = vadd.f32 %v4054_v56, %v9213_v6  ;;  %v3909_v21 = vadd.f32 %v3908_v62, %v9126_v23 }
 0xa26   :  { %v3996_v22 = vmul.f32 0.2, %v3914_v20  ;;  %v4096_v42 = vmul.f32 %v9225_v40, %v9225_v40 }
 0xa27   :  { %v4056_v41 = vadd.f32 %v4055_v9, %v9228_v3  ;;  %v4095_v53 = vmul.f32 %v9228_v3, %v9228_v3  ;;  %v4125_v4 = vadd.f32 %v4124_v17, %v4094_v24  ;;  %v3995_v51 = vmul.f32 0.2, %v3909_v21  ;;  %v5997_v18 = vpop.f32.mrb[100].mxu0 }
 0xa28   :  { %v9237_v61 = vmax.f32 %v3914_v20, %v3996_v22  ;;  %v3924_v33 = vadd.f32 %v5997_v18, %v9126_v23  ;;  %v3918_v28 = vpop.f32.mrb[101].mxu0 }
 0xa29   :  { %v4126_v55 = vadd.f32 %v4125_v4, %v4095_v53  ;;  %v9240_v31 = vmax.f32 %v3909_v21, %v3995_v51  ;;  %v4057_v7 = vadd.f32 %v4056_v41, %v9225_v40  ;;  %v3919_v44 = vadd.f32 %v3918_v28, %v9126_v23 }
 0xa2a   :  { %v3998_v12 = vmul.f32 0.2, %v3924_v33  ;;  %v4098_v2 = vmul.f32 %v9237_v61, %v9237_v61 }
 0xa2b   :  { %v4058_v57 = vadd.f32 %v4057_v7, %v9240_v31  ;;  %v4097_v48 = vmul.f32 %v9240_v31, %v9240_v31  ;;  %v4127_v5 = vadd.f32 %v4126_v55, %v4096_v42  ;;  %v3997_v27 = vmul.f32 0.2, %v3919_v44  ;;  %v6000_v11 = vpop.f32.mrb[102].mxu0 }
 0xa2c   :  { %v9249_v58 = vmax.f32 %v3924_v33, %v3998_v12  ;;  %v3934_v32 = vadd.f32 %v6000_v11, %v9126_v23  ;;  %v3928_v26 = vpop.f32.mrb[103].mxu0 }
 0xa2d   :  { %v4128_v34 = vadd.f32 %v4127_v5, %v4097_v48  ;;  %v9252_v63 = vmax.f32 %v3919_v44, %v3997_v27  ;;  %v4059_v39 = vadd.f32 %v4058_v57, %v9237_v61  ;;  %v3929_v46 = vadd.f32 %v3928_v26, %v9126_v23 }
 0xa2e   :  { %v4000_v14 = vmul.f32 0.2, %v3934_v32  ;;  %v4100_v24 = vmul.f32 %v9249_v58, %v9249_v58 }
 0xa2f   :  { %v4060_v56 = vadd.f32 %v4059_v39, %v9252_v63  ;;  %v4099_v49 = vmul.f32 %v9252_v63, %v9252_v63  ;;  %v4129_v10 = vadd.f32 %v4128_v34, %v4098_v2  ;;  %v3999_v30 = vmul.f32 0.2, %v3929_v46  ;;  %v6003_v50 = vpop.f32.mrb[104].mxu0 }
 0xa30   :  { %v9261_v20 = vmax.f32 %v3934_v32, %v4000_v14  ;;  %v3944_v62 = vadd.f32 %v6003_v50, %v9126_v23  ;;  %v3938_v17 = vpop.f32.mrb[105].mxu0 }
 0xa31   :  { %v4130_v9 = vadd.f32 %v4129_v10, %v4099_v49  ;;  %v9264_v21 = vmax.f32 %v3929_v46, %v3999_v30  ;;  %v4061_v22 = vadd.f32 %v4060_v56, %v9249_v58  ;;  %v3939_v41 = vadd.f32 %v3938_v17, %v9126_v23 }
 0xa32   :  { %v4002_v53 = vmul.f32 0.2, %v3944_v62  ;;  %v4102_v28 = vmul.f32 %v9261_v20, %v9261_v20 }
 0xa33   :  { %v4062_v4 = vadd.f32 %v4061_v22, %v9264_v21  ;;  %v4101_v51 = vmul.f32 %v9264_v21, %v9264_v21  ;;  %v4131_v18 = vadd.f32 %v4130_v9, %v4100_v24  ;;  %v4001_v42 = vmul.f32 0.2, %v3939_v41  ;;  %v6006_v33 = vpop.f32.mrb[106].mxu0 }
 0xa34   :  { %v9273_v55 = vmax.f32 %v3944_v62, %v4002_v53  ;;  %v3954_v7 = vadd.f32 %v6006_v33, %v9126_v23  ;;  %v3948_v44 = vpop.f32.mrb[107].mxu0 }
 0xa35   :  { %v4132_v12 = vadd.f32 %v4131_v18, %v4101_v51  ;;  %v9276_v57 = vmax.f32 %v3939_v41, %v4001_v42  ;;  %v4063_v48 = vadd.f32 %v4062_v4, %v9261_v20  ;;  %v3949_v5 = vadd.f32 %v3948_v44, %v9126_v23 }
 0xa36   :  { %v4004_v27 = vmul.f32 0.2, %v3954_v7  ;;  %v4104_v39 = vmul.f32 %v9273_v55, %v9273_v55 }
 0xa37   :  { %v4064_v11 = vadd.f32 %v4063_v48, %v9276_v57  ;;  %v4103_v2 = vmul.f32 %v9276_v57, %v9276_v57  ;;  %v4133_v32 = vadd.f32 %v4132_v12, %v4102_v28  ;;  %v4003_v26 = vmul.f32 0.2, %v3949_v5  ;;  %v6009_v34 = vpop.f32.mrb[108].mxu0 }
 0xa38   :  { %v9285_v46 = vmax.f32 %v3954_v7, %v4004_v27  ;;  %v3964_v14 = vadd.f32 %v6009_v34, %v9126_v23  ;;  %v3958_v56 = vpop.f32.mrb[109].mxu0 }
 0xa39   :  { %v4134_v49 = vadd.f32 %v4133_v32, %v4103_v2  ;;  %v9288_v10 = vmax.f32 %v3949_v5, %v4003_v26  ;;  %v4065_v30 = vadd.f32 %v4064_v11, %v9273_v55  ;;  %v3959_v50 = vadd.f32 %v3958_v56, %v9126_v23 }
 0xa3a   :  { %v4006_v24 = vmul.f32 0.2, %v3964_v14  ;;  %v4106_v53 = vmul.f32 %v9285_v46, %v9285_v46 }
 0xa3b   :  { %v4066_v62 = vadd.f32 %v4065_v30, %v9288_v10  ;;  %v4105_v17 = vmul.f32 %v9288_v10, %v9288_v10  ;;  %v4135_v9 = vadd.f32 %v4134_v49, %v4104_v39  ;;  %v4005_v22 = vmul.f32 0.2, %v3959_v50  ;;  %v6012_v41 = vpop.f32.mrb[110].mxu0 }
 0xa3c   :  { %v9297_v4 = vmax.f32 %v3964_v14, %v4006_v24  ;;  %v3974_v51 = vadd.f32 %v6012_v41, %v9126_v23  ;;  %v3968_v18 = vpop.f32.mrb[111].mxu0 }
 0xa3d   :  { %v4136_v42 = vadd.f32 %v4135_v9, %v4105_v17  ;;  %v9300_v33 = vmax.f32 %v3959_v50, %v4005_v22  ;;  %v4067_v28 = vadd.f32 %v4066_v62, %v9285_v46  ;;  %v3969_v7 = vadd.f32 %v3968_v18, %v9126_v23 }
 0xa3e   :  { %v4008_v44 = vmul.f32 0.2, %v3974_v51  ;;  %v4108_v11 = vmul.f32 %v9297_v4, %v9297_v4 }
 0xa3f   :  { %v4068_v12 = vadd.f32 %v4067_v28, %v9300_v33  ;;  %v4107_v48 = vmul.f32 %v9300_v33, %v9300_v33  ;;  %v4137_v5 = vadd.f32 %v4136_v42, %v4106_v53  ;;  %v4007_v27 = vmul.f32 0.2, %v3969_v7 }
 0xa40   :  { %v9309_v32 = vmax.f32 %v3974_v51, %v4008_v44 }
 0xa41   :  { %v4138_v2 = vadd.f32 %v4137_v5, %v4107_v48  ;;  %v9311_v26 = vmax.f32 %v3969_v7, %v4007_v27  ;;  %v4069_v34 = vadd.f32 %v4068_v12, %v9297_v4 }
 0xa42   :  { %v4110_v56 = vmul.f32 %v9309_v32, %v9309_v32 }
 0xa43   :  { %v4070_v23 = vadd.f32 %v4069_v34, %v9311_v26  ;;  %v4109_v39 = vmul.f32 %v9311_v26, %v9311_v26  ;;  %v4139_v14 = vadd.f32 %v4138_v2, %v4108_v11  ;;  %v9323_v34 = vld [vmem:[%s9832_s2 + $0x10] sm:$0xff] }
 0xa45   :  { %v4071_v49 = vadd.f32 %v4070_v23, %v9309_v32  ;;  %v4140_v30 = vadd.f32 %v4139_v14, %v4109_v39 }
 0xa47   :  { %v4072_v50 = vrot.slane %v4071_v49, 4  ;;  %v4141_v24 = vadd.f32 %v4140_v30, %v4110_v56 }
 0xa49   :  { %v4073_v62 = vadd.f32 %v4072_v50, %v4071_v49  ;;  %v4142_v17 = vrot.slane %v4141_v24, 4 }
 0xa4b   :  { %v4074_v9 = vrot.slane %v4073_v62, 2  ;;  %v4143_v22 = vadd.f32 %v4142_v17, %v4141_v24 }
 0xa4d   :  { %v4075_v41 = vadd.f32 %v4074_v9, %v4073_v62  ;;  %v4144_v53 = vrot.slane %v4143_v22, 2 }
 0xa4f   :  { %v4076_v51 = vrot.slane %v4075_v41, 1  ;;  %v4145_v18 = vadd.f32 %v4144_v53, %v4143_v22  ;;  %v9861_v22 = vld [vmem:[#allocation7_spill] sm:$0xff] }
 0xa51   :  { %v4077_v42 = vadd.f32 %v4076_v51, %v4075_v41  ;;  %v4146_v28 = vrot.slane %v4145_v18, 1 }
 0xa53   :  { %v4078_v7 = vmul.f32 0.00390625, %v4077_v42  ;;  %v4147_v44 = vadd.f32 %v4146_v28, %v4145_v18 }
 0xa55   :  { %v4148_v12 = vmul.f32 0.00390625, %v4147_v44  ;;  %v4149_v48 = vmul.f32 %v4078_v7, %v4078_v7 }
 0xa57   :  { %v4150_v5 = vsub.f32 %v4148_v12, %v4149_v48 }
 0xa59   :  { %v4151_v27 = vmax.f32 %v4150_v5, 0.0 }
 0xa5b   :  { %v4152_v11 = vadd.f32 1e-05, %v4151_v27 }
 0xa5d   :  { %6557 = vrsqrt.f32 %v4152_v11 }
 0xa67   :  { %v6558_v2 = vpop.eup %6557 }
 0xa68   :  { %v4154_v23 = vmul.f32 %v9323_v34, %v6558_v2 }
 0xa6a   :  { %v4155_v39 = vmul.f32 %v4154_v23, %v4078_v7  ;;  %v9327_v14 = vrot.slane %v4154_v23, %v7762_v1 }
 0xa6c   :  { %v4157_v56 = vrot.slane %v4155_v39, 7  ;;  %v4165_v49 = vmul.f32 %v9327_v14, %v9130_v37  ;;  %v4164_v30 = vmul.f32 %v9327_v14, %v9133_v29  ;;  %v4166_v50 = vmul.f32 %v9327_v14, %v9145_v19 }
 0xa6d   :  { %v4167_v24 = vmul.f32 %v9327_v14, %v9140_v16  ;;  %v4168_v62 = vmul.f32 %v9327_v14, %v9156_v52  ;;  %v4169_v1 = vmul.f32 %v9327_v14, %v9153_v13  ;;  %v4170_v17 = vmul.f32 %v9327_v14, %v9168_v35 }
 0xa6e   :  { %v4159_v37 = vsub.f32 %v9323_v34, %v4157_v56  ;;  %v4171_v29 = vmul.f32 %v9327_v14, %v9165_v54  ;;  %v4172_v19 = vmul.f32 %v9327_v14, %v9180_v45  ;;  %v4173_v16 = vmul.f32 %v9327_v14, %v9177_v36 }
 0xa6f   :  { %v4174_v52 = vmul.f32 %v9327_v14, %v9192_v0  ;;  %v4175_v13 = vmul.f32 %v9327_v14, %v9189_v25  ;;  %v4176_v35 = vmul.f32 %v9327_v14, %v9204_v8  ;;  %v4177_v9 = vmul.f32 %v9327_v14, %v9201_v60 }
 0xa70   :  { %v4199_v54 = vrot.slane %v4159_v37, %v9861_v22  ;;  %v4178_v45 = vmul.f32 %v9327_v14, %v9216_v15  ;;  %v4179_v36 = vmul.f32 %v9327_v14, %v9213_v6  ;;  %v4180_v0 = vmul.f32 %v9327_v14, %v9228_v3  ;;  %v4739_v22 = vld [vmem:[#allocation2 + $0x4a8] sm:$0xff] }
 0xa71   :  { %v4181_v25 = vmul.f32 %v9327_v14, %v9225_v40  ;;  %v4182_v8 = vmul.f32 %v9327_v14, %v9240_v31  ;;  %v4183_v60 = vmul.f32 %v9327_v14, %v9237_v61  ;;  %v4184_v41 = vmul.f32 %v9327_v14, %v9252_v63 }
 0xa72   :  { %v4201_v53 = vadd.f32 %v4199_v54, %v4165_v49  ;;  %v4200_v15 = vadd.f32 %v4199_v54, %v4164_v30  ;;  %v4202_v51 = vadd.f32 %v4199_v54, %v4166_v50  ;;  %v4203_v18 = vadd.f32 %v4199_v54, %v4167_v24 }
 0xa73   :  { %v4204_v6 = vadd.f32 %v4199_v54, %v4168_v62  ;;  %v4205_v42 = vadd.f32 %v4199_v54, %v4169_v1  ;;  %v4206_v28 = vadd.f32 %v4199_v54, %v4170_v17  ;;  %v4207_v3 = vadd.f32 %v4199_v54, %v4171_v29 }
 0xa74   :  { %6045 = vmatprep.mubr.f32.mxu1 %v4200_v15  ;;  %v4208_v7 = vadd.f32 %v4199_v54, %v4172_v19  ;;  %v4209_v40 = vadd.f32 %v4199_v54, %v4173_v16  ;;  %v4210_v44 = vadd.f32 %v4199_v54, %v4174_v52  ;;  %v4211_v12 = vadd.f32 %v4199_v54, %v4175_v13 }
 0xa75   :  { %6046 = vmatmul.mubr.f32.vlgmr.msra.gmra.mrb[112].mxu1 %v4201_v53  ;;  %v4212_v31 = vadd.f32 %v4199_v54, %v4176_v35  ;;  %v4213_v48 = vadd.f32 %v4199_v54, %v4177_v9  ;;  %v4214_v61 = vadd.f32 %v4199_v54, %v4178_v45  ;;  %v4215_v5 = vadd.f32 %v4199_v54, %v4179_v36  ;;  %v4738_v9 = vld [vmem:[#allocation2 + $0x4a0] sm:$0xff]  ;;  %v4740_v45 = vld [vmem:[#allocation2 + $0x4b0] sm:$0xff]  ;;  %v4741_v36 = vld [vmem:[#allocation2 + $0x4b8] sm:$0xff] }
 0xa76   :  { %6048 = vmatprep.mubr.f32.mxu1 %v4202_v51  ;;  %v4216_v63 = vadd.f32 %v4199_v54, %v4180_v0  ;;  %v4217_v27 = vadd.f32 %v4199_v54, %v4181_v25  ;;  %v4218_v11 = vadd.f32 %v4199_v54, %v4182_v8  ;;  %v4219_v2 = vadd.f32 %v4199_v54, %v4183_v60  ;;  %v4742_v25 = vld [vmem:[#allocation2 + $0x4c0] sm:$0xff]  ;;  %v4743_v8 = vld [vmem:[#allocation2 + $0x4c8] sm:$0xff]  ;;  %v4745_v53 = vld [vmem:[#allocation2 + $0x4d8] sm:$0xff] }
 0xa77   :  { %v4220_v23 = vadd.f32 %v4199_v54, %v4184_v41  ;;  %v4185_v39 = vmul.f32 %v9327_v14, %v9249_v58  ;;  %v4186_v56 = vmul.f32 %v9327_v14, %v9264_v21  ;;  %v4187_v49 = vmul.f32 %v9327_v14, %v9261_v20  ;;  %v4744_v41 = vld [vmem:[#allocation2 + $0x4d0] sm:$0xff]  ;;  %v4746_v51 = vld [vmem:[#allocation2 + $0x4e0] sm:$0xff] }
 0xa78   :  { %v4188_v30 = vmul.f32 %v9327_v14, %v9276_v57  ;;  %v4189_v50 = vmul.f32 %v9327_v14, %v9273_v55  ;;  %v4190_v24 = vmul.f32 %v9327_v14, %v9288_v10  ;;  %v4191_v62 = vmul.f32 %v9327_v14, %v9285_v46 }
 0xa79   :  { %6049 = vmatmul.mubr.f32.gmra.mrb[114].mxu1 %v4203_v18  ;;  %v4221_v58 = vadd.f32 %v4199_v54, %v4185_v39  ;;  %v4222_v1 = vadd.f32 %v4199_v54, %v4186_v56  ;;  %v4223_v17 = vadd.f32 %v4199_v54, %v4187_v49  ;;  %v4192_v21 = vmul.f32 %v9327_v14, %v9300_v33  ;;  %v4735_v33 = vld [vmem:[#allocation2 + $0x488] sm:$0xff] }
 0xa7a   :  { %6051 = vmatprep.mubr.f32.mxu1 %v4204_v6  ;;  %v4224_v20 = vadd.f32 %v4199_v54, %v4188_v30  ;;  %v4225_v37 = vadd.f32 %v4199_v54, %v4189_v50  ;;  %v4226_v57 = vadd.f32 %v4199_v54, %v4190_v24  ;;  %v4227_v29 = vadd.f32 %v4199_v54, %v4191_v62  ;;  %v4747_v18 = vld [vmem:[#allocation2 + $0x4e8] sm:$0xff] }
 0xa7b   :  { %v4228_v19 = vadd.f32 %v4199_v54, %v4192_v21  ;;  %v4193_v55 = vmul.f32 %v9327_v14, %v9297_v4  ;;  %v4194_v10 = vmul.f32 %v9327_v14, %v9311_v26  ;;  %v4195_v46 = vmul.f32 %v9327_v14, %v9309_v32  ;;  %v4734_v4 = vld [vmem:[#allocation2 + $0x480] sm:$0xff]  ;;  %v4736_v26 = vld [vmem:[#allocation2 + $0x490] sm:$0xff]  ;;  %v4737_v14 = vld [vmem:[#allocation2 + $0x498] sm:$0xff] }
 0xa7c   :  { %v6429_v32 = vpack.c.bf16 %v4735_v33, %v4734_v4  ;;  %v6433_v35 = vpack.c.bf16 %v4737_v14, %v4736_v26  ;;  %v6441_v0 = vpack.c.bf16 %v4741_v36, %v4740_v45  ;;  %v6445_v60 = vpack.c.bf16 %v4743_v8, %v4742_v25 }
 0xa7d   :  { %6052 = vmatmul.mubr.f32.gmra.mrb[116].mxu1 %v4205_v42  ;;  %v4229_v16 = vadd.f32 %v4199_v54, %v4193_v55  ;;  %v4230_v52 = vadd.f32 %v4199_v54, %v4194_v10  ;;  %v4231_v13 = vadd.f32 %v4199_v54, %v4195_v46  ;;  %v6437_v54 = vpack.c.bf16 %v4739_v22, %v4738_v9  ;;  %v4748_v42 = vld [vmem:[#allocation2 + $0x4f0] sm:$0xff] }
 0xa7e   :  { %6054 = vmatprep.mubr.f32.mxu1 %v4206_v28  ;;  %6430 = vmatprep.subr.bf16.mxu0 %v6429_v32  ;;  %v6449_v15 = vpack.c.bf16 %v4745_v53, %v4744_v41  ;;  %v6453_v6 = vpack.c.bf16 %v4747_v18, %v4746_v51  ;;  %v4749_v28 = vld [vmem:[#allocation2 + $0x4f8] sm:$0xff] }
 0xa7f   :  { %6432 = vmatpush3.bf16.msra.mxu0 %v6429_v32 }
 0xa80   :  { %6434 = vmatprep.subr.bf16.mxu0 %v6433_v35 }
 0xa81   :  { %6055 = vmatmul.mubr.f32.gmra.mrb[118].mxu1 %v4207_v3  ;;  %v6457_v3 = vpack.c.bf16 %v4749_v28, %v4748_v42 }
 0xa82   :  { %6057 = vmatprep.mubr.f32.mxu1 %v4208_v7  ;;  %v9397_v7 = vrot.slane %v9323_v34, %v7871_v47 }
 0xa83   :  { %6436 = vmatpush3.bf16.msra.mxu0 %v6433_v35 }
 0xa84   :  { %6438 = vmatprep.subr.bf16.mxu0 %v6437_v54 }
 0xa85   :  { %6058 = vmatmul.mubr.f32.gmra.mrb[120].mxu1 %v4209_v40 }
 0xa86   :  { %6060 = vmatprep.mubr.f32.mxu1 %v4210_v44 }
 0xa87   :  { %6440 = vmatpush3.bf16.msra.mxu0 %v6437_v54 }
 0xa88   :  { %6442 = vmatprep.subr.bf16.mxu0 %v6441_v0 }
 0xa89   :  { %6061 = vmatmul.mubr.f32.gmra.mrb[122].mxu1 %v4211_v12 }
 0xa8a   :  { %6063 = vmatprep.mubr.f32.mxu1 %v4212_v31 }
 0xa8b   :  { %6444 = vmatpush3.bf16.msra.mxu0 %v6441_v0 }
 0xa8c   :  { %6446 = vmatprep.subr.bf16.mxu0 %v6445_v60 }
 0xa8d   :  { %6064 = vmatmul.mubr.f32.gmra.mrb[124].mxu1 %v4213_v48 }
 0xa8e   :  { %6066 = vmatprep.mubr.f32.mxu1 %v4214_v61 }
 0xa8f   :  { %6448 = vmatpush3.bf16.msra.mxu0 %v6445_v60 }
 0xa90   :  { %6450 = vmatprep.subr.bf16.mxu0 %v6449_v15 }
 0xa91   :  { %6067 = vmatmul.mubr.f32.gmra.mrb[126].mxu1 %v4215_v5 }
 0xa92   :  { %6069 = vmatprep.mubr.f32.mxu1 %v4216_v63 }
 0xa93   :  { %6452 = vmatpush3.bf16.msra.mxu0 %v6449_v15 }
 0xa94   :  { %6454 = vmatprep.subr.bf16.mxu0 %v6453_v6 }
 0xa95   :  { %6070 = vmatmul.mubr.f32.gmra.mrb[128].mxu1 %v4217_v27 }
 0xa96   :  { %6072 = vmatprep.mubr.f32.mxu1 %v4218_v11 }
 0xa97   :  { %6456 = vmatpush3.bf16.msra.mxu0 %v6453_v6 }
 0xa98   :  { %6458 = vmatprep.subr.bf16.mxu0 %v6457_v3 }
 0xa99   :  { %6073 = vmatmul.mubr.f32.gmra.mrb[130].mxu1 %v4219_v2 }
 0xa9a   :  { %6075 = vmatprep.mubr.f32.mxu1 %v4220_v23 }
 0xa9b   :  { %6460 = vmatpush3.bf16.msra.mxu0 %v6457_v3 }
 0xa9d   :  { %6076 = vmatmul.mubr.f32.gmra.mrb[132].mxu1 %v4221_v58 }
 0xa9e   :  { %6078 = vmatprep.mubr.f32.mxu1 %v4222_v1 }
 0xaa1   :  { %6079 = vmatmul.mubr.f32.gmra.mrb[134].mxu1 %v4223_v17 }
 0xaa2   :  { %6081 = vmatprep.mubr.f32.mxu1 %v4224_v20 }
 0xaa5   :  { %6082 = vmatmul.mubr.f32.gmra.mrb[136].mxu1 %v4225_v37 }
 0xaa6   :  { %6084 = vmatprep.mubr.f32.mxu1 %v4226_v57 }
 0xaa9   :  { %6085 = vmatmul.mubr.f32.gmra.mrb[138].mxu1 %v4227_v29 }
 0xaaa   :  { %6087 = vmatprep.mubr.f32.mxu1 %v4228_v19 }
 0xaad   :  { %6088 = vmatmul.mubr.f32.gmra.mrb[140].mxu1 %v4229_v16 }
 0xaae   :  { %6090 = vmatprep.mubr.f32.mxu1 %v4230_v52 }
 0xab1   :  { %6091 = vmatmul.mubr.f32.gmra.mrb[142].mxu1 %v4231_v13 }
 0xb48   :  { %v6047_v40 = vpop.f32.mrb[112].mxu1 }
 0xb49   :  { %v4325_v44 = vadd.f32 %v6047_v40, %v9397_v7  ;;  %v4319_v12 = vpop.f32.mrb[113].mxu1 }
 0xb4a   :  { %v4320_v31 = vadd.f32 %v4319_v12, %v9397_v7 }
 0xb4b   :  { %v4479_v48 = vmul.f32 0.2, %v4325_v44 }
 0xb4c   :  { %v4478_v61 = vmul.f32 0.2, %v4320_v31  ;;  %v6050_v5 = vpop.f32.mrb[114].mxu1 }
 0xb4d   :  { %v9401_v63 = vmax.f32 %v4325_v44, %v4479_v48  ;;  %v4335_v27 = vadd.f32 %v6050_v5, %v9397_v7  ;;  %v4329_v11 = vpop.f32.mrb[115].mxu1 }
 0xb4e   :  { %v9404_v2 = vmax.f32 %v4320_v31, %v4478_v61  ;;  %v4330_v47 = vadd.f32 %v4329_v11, %v9397_v7 }
 0xb4f   :  { %v4481_v23 = vmul.f32 0.2, %v4335_v27  ;;  %v4581_v39 = vmul.f32 %v9401_v63, %v9401_v63 }
 0xb50   :  { %v4580_v56 = vmul.f32 %v9404_v2, %v9404_v2  ;;  %v4480_v49 = vmul.f32 0.2, %v4330_v47  ;;  %v6053_v30 = vpop.f32.mrb[116].mxu1  ;;  %v4542_v58 = vadd.f32 %v9401_v63, %v9404_v2 }
 0xb51   :  { %v9411_v50 = vmax.f32 %v4335_v27, %v4481_v23  ;;  %v4345_v24 = vadd.f32 %v6053_v30, %v9397_v7  ;;  %v4339_v62 = vpop.f32.mrb[117].mxu1 }
 0xb52   :  { %v9416_v1 = vmax.f32 %v4330_v47, %v4480_v49  ;;  %v4340_v17 = vadd.f32 %v4339_v62, %v9397_v7  ;;  %v4612_v20 = vadd.f32 %v4581_v39, %v4580_v56 }
 0xb53   :  { %v4483_v21 = vmul.f32 0.2, %v4345_v24  ;;  %v4583_v55 = vmul.f32 %v9411_v50, %v9411_v50 }
 0xb54   :  { %v4543_v37 = vadd.f32 %v4542_v58, %v9416_v1  ;;  %v4582_v57 = vmul.f32 %v9416_v1, %v9416_v1  ;;  %v4482_v29 = vmul.f32 0.2, %v4340_v17  ;;  %v6056_v19 = vpop.f32.mrb[118].mxu1 }
 0xb55   :  { %v9424_v10 = vmax.f32 %v4345_v24, %v4483_v21  ;;  %v4355_v46 = vadd.f32 %v6056_v19, %v9397_v7  ;;  %v4349_v16 = vpop.f32.mrb[119].mxu1 }
 0xb56   :  { %v4613_v52 = vadd.f32 %v4612_v20, %v4582_v57  ;;  %v9427_v13 = vmax.f32 %v4340_v17, %v4482_v29  ;;  %v4544_v4 = vadd.f32 %v4543_v37, %v9411_v50  ;;  %v4350_v33 = vadd.f32 %v4349_v16, %v9397_v7 }
 0xb57   :  { %v4485_v32 = vmul.f32 0.2, %v4355_v46  ;;  %v4585_v54 = vmul.f32 %v9424_v10, %v9424_v10 }
 0xb58   :  { %v4545_v26 = vadd.f32 %v4544_v4, %v9427_v13  ;;  %v4584_v14 = vmul.f32 %v9427_v13, %v9427_v13  ;;  %v4614_v35 = vadd.f32 %v4613_v52, %v4583_v55  ;;  %v4484_v9 = vmul.f32 0.2, %v4350_v33  ;;  %v6059_v22 = vpop.f32.mrb[120].mxu1 }
 0xb59   :  { %v9436_v45 = vmax.f32 %v4355_v46, %v4485_v32  ;;  %v4365_v36 = vadd.f32 %v6059_v22, %v9397_v7  ;;  %v4359_v0 = vpop.f32.mrb[121].mxu1 }
 0xb5a   :  { %v4615_v25 = vadd.f32 %v4614_v35, %v4584_v14  ;;  %v9439_v8 = vmax.f32 %v4350_v33, %v4484_v9  ;;  %v4546_v60 = vadd.f32 %v4545_v26, %v9424_v10  ;;  %v4360_v41 = vadd.f32 %v4359_v0, %v9397_v7 }
 0xb5b   :  { %v4487_v53 = vmul.f32 0.2, %v4365_v36  ;;  %v4587_v28 = vmul.f32 %v9436_v45, %v9436_v45 }
 0xb5c   :  { %v4547_v15 = vadd.f32 %v4546_v60, %v9439_v8  ;;  %v4586_v51 = vmul.f32 %v9439_v8, %v9439_v8  ;;  %v4616_v18 = vadd.f32 %v4615_v25, %v4585_v54  ;;  %v4486_v6 = vmul.f32 0.2, %v4360_v41  ;;  %v6062_v42 = vpop.f32.mrb[122].mxu1 }
 0xb5d   :  { %v9448_v3 = vmax.f32 %v4365_v36, %v4487_v53  ;;  %v4375_v40 = vadd.f32 %v6062_v42, %v9397_v7  ;;  %v4369_v44 = vpop.f32.mrb[123].mxu1 }
 0xb5e   :  { %v4617_v12 = vadd.f32 %v4616_v18, %v4586_v51  ;;  %v9451_v31 = vmax.f32 %v4360_v41, %v4486_v6  ;;  %v4548_v48 = vadd.f32 %v4547_v15, %v9436_v45  ;;  %v4370_v61 = vadd.f32 %v4369_v44, %v9397_v7 }
 0xb5f   :  { %v4489_v5 = vmul.f32 0.2, %v4375_v40  ;;  %v4589_v56 = vmul.f32 %v9448_v3, %v9448_v3 }
 0xb60   :  { %v4549_v27 = vadd.f32 %v4548_v48, %v9451_v31  ;;  %v4588_v11 = vmul.f32 %v9451_v31, %v9451_v31  ;;  %v4618_v47 = vadd.f32 %v4617_v12, %v4587_v28  ;;  %v4488_v23 = vmul.f32 0.2, %v4370_v61  ;;  %v6065_v39 = vpop.f32.mrb[124].mxu1 }
 0xb61   :  { %v9460_v49 = vmax.f32 %v4375_v40, %v4489_v5  ;;  %v4385_v30 = vadd.f32 %v6065_v39, %v9397_v7  ;;  %v4379_v24 = vpop.f32.mrb[125].mxu1 }
 0xb62   :  { %v4619_v62 = vadd.f32 %v4618_v47, %v4588_v11  ;;  %v9463_v58 = vmax.f32 %v4370_v61, %v4488_v23  ;;  %v4550_v17 = vadd.f32 %v4549_v27, %v9448_v3  ;;  %v4380_v21 = vadd.f32 %v4379_v24, %v9397_v7 }
 0xb63   :  { %v4491_v20 = vmul.f32 0.2, %v4385_v30  ;;  %v4591_v46 = vmul.f32 %v9460_v49, %v9460_v49 }
 0xb64   :  { %v4551_v37 = vadd.f32 %v4550_v17, %v9463_v58  ;;  %v4590_v57 = vmul.f32 %v9463_v58, %v9463_v58  ;;  %v4620_v29 = vadd.f32 %v4619_v62, %v4589_v56  ;;  %v4490_v19 = vmul.f32 0.2, %v4380_v21  ;;  %v6068_v55 = vpop.f32.mrb[126].mxu1 }
 0xb65   :  { %v9472_v16 = vmax.f32 %v4385_v30, %v4491_v20  ;;  %v4395_v52 = vadd.f32 %v6068_v55, %v9397_v7  ;;  %v4389_v4 = vpop.f32.mrb[127].mxu1 }
 0xb66   :  { %v4621_v33 = vadd.f32 %v4620_v29, %v4590_v57  ;;  %v9475_v32 = vmax.f32 %v4380_v21, %v4490_v19  ;;  %v4552_v26 = vadd.f32 %v4551_v37, %v9460_v49  ;;  %v4390_v14 = vadd.f32 %v4389_v4, %v9397_v7 }
 0xb67   :  { %v4493_v35 = vmul.f32 0.2, %v4395_v52  ;;  %v4593_v25 = vmul.f32 %v9472_v16, %v9472_v16 }
 0xb68   :  { %v4553_v9 = vadd.f32 %v4552_v26, %v9475_v32  ;;  %v4592_v22 = vmul.f32 %v9475_v32, %v9475_v32  ;;  %v4622_v54 = vadd.f32 %v4621_v33, %v4591_v46  ;;  %v4492_v36 = vmul.f32 0.2, %v4390_v14  ;;  %v6071_v0 = vpop.f32.mrb[128].mxu1 }
 0xb69   :  { %v9484_v60 = vmax.f32 %v4395_v52, %v4493_v35  ;;  %v4405_v41 = vadd.f32 %v6071_v0, %v9397_v7  ;;  %v4399_v53 = vpop.f32.mrb[129].mxu1 }
 0xb6a   :  { %v4623_v15 = vadd.f32 %v4622_v54, %v4592_v22  ;;  %v9487_v51 = vmax.f32 %v4390_v14, %v4492_v36  ;;  %v4554_v18 = vadd.f32 %v4553_v9, %v9472_v16  ;;  %v4400_v6 = vadd.f32 %v4399_v53, %v9397_v7 }
 0xb6b   :  { %v4495_v42 = vmul.f32 0.2, %v4405_v41  ;;  %v4595_v61 = vmul.f32 %v9484_v60, %v9484_v60 }
 0xb6c   :  { %v4555_v28 = vadd.f32 %v4554_v18, %v9487_v51  ;;  %v4594_v40 = vmul.f32 %v9487_v51, %v9487_v51  ;;  %v4624_v44 = vadd.f32 %v4623_v15, %v4593_v25  ;;  %v4494_v12 = vmul.f32 0.2, %v4400_v6  ;;  %v6074_v48 = vpop.f32.mrb[130].mxu1 }
 0xb6d   :  { %v9496_v5 = vmax.f32 %v4405_v41, %v4495_v42  ;;  %v4415_v27 = vadd.f32 %v6074_v48, %v9397_v7  ;;  %v4409_v11 = vpop.f32.mrb[131].mxu1 }
 0xb6e   :  { %v4625_v47 = vadd.f32 %v4624_v44, %v4594_v40  ;;  %v9499_v23 = vmax.f32 %v4400_v6, %v4494_v12  ;;  %v4556_v39 = vadd.f32 %v4555_v28, %v9484_v60  ;;  %v4410_v56 = vadd.f32 %v4409_v11, %v9397_v7 }
 0xb6f   :  { %v4497_v30 = vmul.f32 0.2, %v4415_v27  ;;  %v4597_v37 = vmul.f32 %v9496_v5, %v9496_v5 }
 0xb70   :  { %v4557_v24 = vadd.f32 %v4556_v39, %v9499_v23  ;;  %v4596_v62 = vmul.f32 %v9499_v23, %v9499_v23  ;;  %v4626_v17 = vadd.f32 %v4625_v47, %v4595_v61  ;;  %v4496_v21 = vmul.f32 0.2, %v4410_v56  ;;  %v6077_v20 = vpop.f32.mrb[132].mxu1 }
 0xb71   :  { %v9508_v57 = vmax.f32 %v4415_v27, %v4497_v30  ;;  %v4425_v29 = vadd.f32 %v6077_v20, %v9397_v7  ;;  %v4419_v19 = vpop.f32.mrb[133].mxu1 }
 0xb72   :  { %v4627_v55 = vadd.f32 %v4626_v17, %v4596_v62  ;;  %v9511_v46 = vmax.f32 %v4410_v56, %v4496_v21  ;;  %v4558_v52 = vadd.f32 %v4557_v24, %v9496_v5  ;;  %v4420_v4 = vadd.f32 %v4419_v19, %v9397_v7 }
 0xb73   :  { %v4499_v33 = vmul.f32 0.2, %v4425_v29  ;;  %v4599_v54 = vmul.f32 %v9508_v57, %v9508_v57 }
 0xb74   :  { %v4559_v26 = vadd.f32 %v4558_v52, %v9511_v46  ;;  %v4598_v14 = vmul.f32 %v9511_v46, %v9511_v46  ;;  %v4628_v35 = vadd.f32 %v4627_v55, %v4597_v37  ;;  %v4498_v9 = vmul.f32 0.2, %v4420_v4  ;;  %v6080_v22 = vpop.f32.mrb[134].mxu1 }
 0xb75   :  { %v9520_v36 = vmax.f32 %v4425_v29, %v4499_v33  ;;  %v4435_v0 = vadd.f32 %v6080_v22, %v9397_v7  ;;  %v4429_v25 = vpop.f32.mrb[135].mxu1 }
 0xb76   :  { %v4629_v41 = vadd.f32 %v4628_v35, %v4598_v14  ;;  %v9523_v53 = vmax.f32 %v4420_v4, %v4498_v9  ;;  %v4560_v15 = vadd.f32 %v4559_v26, %v9508_v57  ;;  %v4430_v18 = vadd.f32 %v4429_v25, %v9397_v7 }
 0xb77   :  { %v4501_v6 = vmul.f32 0.2, %v4435_v0  ;;  %v4601_v48 = vmul.f32 %v9520_v36, %v9520_v36 }
 0xb78   :  { %v4561_v42 = vadd.f32 %v4560_v15, %v9523_v53  ;;  %v4600_v28 = vmul.f32 %v9523_v53, %v9523_v53  ;;  %v4630_v40 = vadd.f32 %v4629_v41, %v4599_v54  ;;  %v4500_v44 = vmul.f32 0.2, %v4430_v18  ;;  %v6083_v12 = vpop.f32.mrb[136].mxu1 }
 0xb79   :  { %v9532_v61 = vmax.f32 %v4435_v0, %v4501_v6  ;;  %v4445_v27 = vadd.f32 %v6083_v12, %v9397_v7  ;;  %v4439_v11 = vpop.f32.mrb[137].mxu1 }
 0xb7a   :  { %v4631_v47 = vadd.f32 %v4630_v40, %v4600_v28  ;;  %v9535_v39 = vmax.f32 %v4430_v18, %v4500_v44  ;;  %v4562_v56 = vadd.f32 %v4561_v42, %v9520_v36  ;;  %v4440_v30 = vadd.f32 %v4439_v11, %v9397_v7 }
 0xb7b   :  { %v4503_v24 = vmul.f32 0.2, %v4445_v27  ;;  %v4603_v29 = vmul.f32 %v9532_v61, %v9532_v61 }
 0xb7c   :  { %v4563_v62 = vadd.f32 %v4562_v56, %v9535_v39  ;;  %v4602_v17 = vmul.f32 %v9535_v39, %v9535_v39  ;;  %v4632_v21 = vadd.f32 %v4631_v47, %v4601_v48  ;;  %v4502_v20 = vmul.f32 0.2, %v4440_v30  ;;  %v6086_v37 = vpop.f32.mrb[138].mxu1 }
 0xb7d   :  { %v9544_v19 = vmax.f32 %v4445_v27, %v4503_v24  ;;  %v4455_v55 = vadd.f32 %v6086_v37, %v9397_v7  ;;  %v4449_v52 = vpop.f32.mrb[139].mxu1 }
 0xb7e   :  { %v4633_v4 = vadd.f32 %v4632_v21, %v4602_v17  ;;  %v9547_v33 = vmax.f32 %v4440_v30, %v4502_v20  ;;  %v4564_v26 = vadd.f32 %v4563_v62, %v9532_v61  ;;  %v4450_v14 = vadd.f32 %v4449_v52, %v9397_v7 }
 0xb7f   :  { %v4505_v35 = vmul.f32 0.2, %v4455_v55  ;;  %v4605_v41 = vmul.f32 %v9544_v19, %v9544_v19 }
 0xb80   :  { %v4565_v9 = vadd.f32 %v4564_v26, %v9547_v33  ;;  %v4604_v22 = vmul.f32 %v9547_v33, %v9547_v33  ;;  %v4634_v54 = vadd.f32 %v4633_v4, %v4603_v29  ;;  %v4504_v0 = vmul.f32 0.2, %v4450_v14  ;;  %v6089_v25 = vpop.f32.mrb[140].mxu1 }
 0xb81   :  { %v9556_v15 = vmax.f32 %v4455_v55, %v4505_v35  ;;  %v4465_v18 = vadd.f32 %v6089_v25, %v9397_v7  ;;  %v4459_v6 = vpop.f32.mrb[141].mxu1 }
 0xb82   :  { %v4635_v42 = vadd.f32 %v4634_v54, %v4604_v22  ;;  %v9559_v28 = vmax.f32 %v4450_v14, %v4504_v0  ;;  %v4566_v40 = vadd.f32 %v4565_v9, %v9544_v19  ;;  %v4460_v44 = vadd.f32 %v4459_v6, %v9397_v7 }
 0xb83   :  { %v4507_v12 = vmul.f32 0.2, %v4465_v18  ;;  %v4607_v30 = vmul.f32 %v9556_v15, %v9556_v15 }
 0xb84   :  { %v4567_v48 = vadd.f32 %v4566_v40, %v9559_v28  ;;  %v4606_v27 = vmul.f32 %v9559_v28, %v9559_v28  ;;  %v4636_v11 = vadd.f32 %v4635_v42, %v4605_v41  ;;  %v4506_v47 = vmul.f32 0.2, %v4460_v44  ;;  %v6092_v56 = vpop.f32.mrb[142].mxu1 }
 0xb85   :  { %v9568_v24 = vmax.f32 %v4465_v18, %v4507_v12  ;;  %v4475_v62 = vadd.f32 %v6092_v56, %v9397_v7  ;;  %v4469_v17 = vpop.f32.mrb[143].mxu1 }
 0xb86   :  { %v4637_v21 = vadd.f32 %v4636_v11, %v4606_v27  ;;  %v9571_v20 = vmax.f32 %v4460_v44, %v4506_v47  ;;  %v4568_v37 = vadd.f32 %v4567_v48, %v9556_v15  ;;  %v4470_v29 = vadd.f32 %v4469_v17, %v9397_v7 }
 0xb87   :  { %v4509_v55 = vmul.f32 0.2, %v4475_v62  ;;  %v4609_v35 = vmul.f32 %v9568_v24, %v9568_v24 }
 0xb88   :  { %v4569_v52 = vadd.f32 %v4568_v37, %v9571_v20  ;;  %v4608_v4 = vmul.f32 %v9571_v20, %v9571_v20  ;;  %v4638_v26 = vadd.f32 %v4637_v21, %v4607_v30  ;;  %v4508_v14 = vmul.f32 0.2, %v4470_v29 }
 0xb89   :  { %v9580_v22 = vmax.f32 %v4475_v62, %v4509_v55 }
 0xb8a   :  { %v4639_v9 = vadd.f32 %v4638_v26, %v4608_v4  ;;  %v9582_v54 = vmax.f32 %v4470_v29, %v4508_v14  ;;  %v4570_v0 = vadd.f32 %v4569_v52, %v9568_v24 }
 0xb8b   :  { %v4611_v18 = vmul.f32 %v9580_v22, %v9580_v22 }
 0xb8c   :  { %v4571_v7 = vadd.f32 %v4570_v0, %v9582_v54  ;;  %v4610_v25 = vmul.f32 %v9582_v54, %v9582_v54  ;;  %v4640_v41 = vadd.f32 %v4639_v9, %v4609_v35 }
 0xb8e   :  { %v4572_v6 = vadd.f32 %v4571_v7, %v9580_v22  ;;  %v4641_v42 = vadd.f32 %v4640_v41, %v4610_v25  ;;  %v9598_v25 = vld [vmem:[%s9832_s2 + $0x18] sm:$0x3] }
 0xb90   :  { %v4573_v40 = vrot.slane %v4572_v6, 4  ;;  %v4642_v44 = vadd.f32 %v4641_v42, %v4611_v18 }
 0xb92   :  { %v4574_v12 = vadd.f32 %v4573_v40, %v4572_v6  ;;  %v4643_v48 = vrot.slane %v4642_v44, 4 }
 0xb94   :  { %v4575_v27 = vrot.slane %v4574_v12, 2  ;;  %v4644_v11 = vadd.f32 %v4643_v48, %v4642_v44 }
 0xb96   :  { %v4576_v47 = vadd.f32 %v4575_v27, %v4574_v12  ;;  %v4645_v56 = vrot.slane %v4644_v11, 2 }
 0xb98   :  { %v4577_v30 = vrot.slane %v4576_v47, 1  ;;  %v4646_v62 = vadd.f32 %v4645_v56, %v4644_v11 }
 0xb9a   :  { %v4578_v17 = vadd.f32 %v4577_v30, %v4576_v47  ;;  %v4647_v21 = vrot.slane %v4646_v62, 1 }
 0xb9c   :  { %v4579_v37 = vmul.f32 0.00390625, %v4578_v17  ;;  %v4648_v29 = vadd.f32 %v4647_v21, %v4646_v62 }
 0xb9e   :  { %v4649_v55 = vmul.f32 0.00390625, %v4648_v29  ;;  %v4650_v52 = vmul.f32 %v4579_v37, %v4579_v37 }
 0xba0   :  { %v4651_v4 = vsub.f32 %v4649_v55, %v4650_v52 }
 0xba2   :  { %v4652_v26 = vmax.f32 %v4651_v4, 0.0 }
 0xba4   :  { %v4653_v14 = vadd.f32 1e-05, %v4652_v26 }
 0xba6   :  { %6559 = vrsqrt.f32 %v4653_v14 }
 0xbb0   :  { %v6560_v35 = vpop.eup %6559 }
 0xbb1   :  { %v4655_v9 = vmul.f32 %v9323_v34, %v6560_v35 }
 0xbb3   :  { %v4656_v0 = vmul.f32 %v4655_v9, %v4579_v37  ;;  %v9593_v7 = vrot.slane %v4655_v9, %v8075_v43 }
 0xbb5   :  { %v4658_v41 = vrot.slane %v4656_v0, 7  ;;  %v4666_v18 = vmul.f32 %v9593_v7, %v9401_v63  ;;  %v4665_v6 = vmul.f32 %v9593_v7, %v9404_v2  ;;  %v4667_v42 = vmul.f32 %v9593_v7, %v9416_v1 }
 0xbb6   :  { %v4668_v34 = vmul.f32 %v9593_v7, %v9411_v50  ;;  %v4669_v43 = vmul.f32 %v9593_v7, %v9427_v13  ;;  %v4670_v40 = vmul.f32 %v9593_v7, %v9424_v10  ;;  %v4671_v44 = vmul.f32 %v9593_v7, %v9439_v8 }
 0xbb7   :  { %v4660_v63 = vsub.f32 %v9598_v25, %v4658_v41  ;;  %v4672_v2 = vmul.f32 %v9593_v7, %v9436_v45  ;;  %v4673_v1 = vmul.f32 %v9593_v7, %v9451_v31  ;;  %v4674_v50 = vmul.f32 %v9593_v7, %v9448_v3 }
 0xbb8   :  { %v4675_v13 = vmul.f32 %v9593_v7, %v9463_v58  ;;  %v4676_v10 = vmul.f32 %v9593_v7, %v9460_v49  ;;  %v4677_v8 = vmul.f32 %v9593_v7, %v9475_v32  ;;  %v4678_v12 = vmul.f32 %v9593_v7, %v9472_v16 }
 0xbb9   :  { %v4700_v45 = vrot.slane %v4660_v63, %v9860_v59  ;;  %v4679_v31 = vmul.f32 %v9593_v7, %v9487_v51  ;;  %v4680_v3 = vmul.f32 %v9593_v7, %v9484_v60  ;;  %v4681_v58 = vmul.f32 %v9593_v7, %v9499_v23 }
 0xbba   :  { %v4682_v49 = vmul.f32 %v9593_v7, %v9496_v5  ;;  %v4683_v32 = vmul.f32 %v9593_v7, %v9511_v46  ;;  %v4684_v16 = vmul.f32 %v9593_v7, %v9508_v57  ;;  %v4685_v59 = vmul.f32 %v9593_v7, %v9523_v53 }
 0xbbb   :  { %v4702_v48 = vadd.f32 %v4700_v45, %v4666_v18  ;;  %v4701_v51 = vadd.f32 %v4700_v45, %v4665_v6  ;;  %v4703_v27 = vadd.f32 %v4700_v45, %v4667_v42  ;;  %v4704_v11 = vadd.f32 %v4700_v45, %v4668_v34 }
 0xbbc   :  { %v4705_v60 = vadd.f32 %v4700_v45, %v4669_v43  ;;  %v4706_v47 = vadd.f32 %v4700_v45, %v4670_v40  ;;  %v4707_v56 = vadd.f32 %v4700_v45, %v4671_v44  ;;  %v4708_v23 = vadd.f32 %v4700_v45, %v4672_v2 }
 0xbbd   :  { %6125 = vmatprep.mubr.f32.mxu0 %v4701_v51  ;;  %v4709_v30 = vadd.f32 %v4700_v45, %v4673_v1  ;;  %v4710_v5 = vadd.f32 %v4700_v45, %v4674_v50  ;;  %v4711_v62 = vadd.f32 %v4700_v45, %v4675_v13  ;;  %v4712_v17 = vadd.f32 %v4700_v45, %v4676_v10 }
 0xbbe   :  { %6126 = vmatmul.mubr.f32.vlgmr.msra.gmra.mrb[112].mxu0 %v4702_v48  ;;  %v4713_v46 = vadd.f32 %v4700_v45, %v4677_v8  ;;  %v4714_v21 = vadd.f32 %v4700_v45, %v4678_v12  ;;  %v4715_v57 = vadd.f32 %v4700_v45, %v4679_v31  ;;  %v4716_v37 = vadd.f32 %v4700_v45, %v4680_v3 }
 0xbbf   :  { %6128 = vmatprep.mubr.f32.mxu0 %v4703_v27  ;;  %v4717_v53 = vadd.f32 %v4700_v45, %v4681_v58  ;;  %v4718_v29 = vadd.f32 %v4700_v45, %v4682_v49  ;;  %v4719_v55 = vadd.f32 %v4700_v45, %v4683_v32  ;;  %v4720_v52 = vadd.f32 %v4700_v45, %v4684_v16 }
 0xbc0   :  { %v4721_v4 = vadd.f32 %v4700_v45, %v4685_v59  ;;  %v4686_v26 = vmul.f32 %v9593_v7, %v9520_v36  ;;  %v4687_v14 = vmul.f32 %v9593_v7, %v9535_v39  ;;  %v4688_v35 = vmul.f32 %v9593_v7, %v9532_v61 }
 0xbc1   :  { %v4689_v9 = vmul.f32 %v9593_v7, %v9547_v33  ;;  %v4690_v0 = vmul.f32 %v9593_v7, %v9544_v19  ;;  %v4691_v41 = vmul.f32 %v9593_v7, %v9559_v28  ;;  %v4692_v18 = vmul.f32 %v9593_v7, %v9556_v15 }
 0xbc2   :  { %6129 = vmatmul.mubr.f32.gmra.mrb[114].mxu0 %v4704_v11  ;;  %v4722_v36 = vadd.f32 %v4700_v45, %v4686_v26  ;;  %v4723_v6 = vadd.f32 %v4700_v45, %v4687_v14  ;;  %v4724_v42 = vadd.f32 %v4700_v45, %v4688_v35  ;;  %v4693_v39 = vmul.f32 %v9593_v7, %v9571_v20 }
 0xbc3   :  { %6131 = vmatprep.mubr.f32.mxu0 %v4705_v60  ;;  %v4725_v61 = vadd.f32 %v4700_v45, %v4689_v9  ;;  %v4726_v34 = vadd.f32 %v4700_v45, %v4690_v0  ;;  %v4727_v33 = vadd.f32 %v4700_v45, %v4691_v41  ;;  %v4728_v43 = vadd.f32 %v4700_v45, %v4692_v18 }
 0xbc4   :  { %v4729_v40 = vadd.f32 %v4700_v45, %v4693_v39  ;;  %v4694_v19 = vmul.f32 %v9593_v7, %v9568_v24  ;;  %v4695_v28 = vmul.f32 %v9593_v7, %v9582_v54  ;;  %v4696_v15 = vmul.f32 %v9593_v7, %v9580_v22 }
 0xbc5   :  { %v9668_v24 = vrot.slane %v9598_v25, %v6816_v38 }
 0xbc6   :  { %6132 = vmatmul.mubr.f32.gmra.mrb[116].mxu0 %v4706_v47  ;;  %v4730_v44 = vadd.f32 %v4700_v45, %v4694_v19  ;;  %v4731_v63 = vadd.f32 %v4700_v45, %v4695_v28  ;;  %v4732_v2 = vadd.f32 %v4700_v45, %v4696_v15 }
 0xbc7   :  { %6134 = vmatprep.mubr.f32.mxu0 %v4707_v56 }
 0xbca   :  { %6135 = vmatmul.mubr.f32.gmra.mrb[118].mxu0 %v4708_v23 }
 0xbcb   :  { %6137 = vmatprep.mubr.f32.mxu0 %v4709_v30 }
 0xbce   :  { %6138 = vmatmul.mubr.f32.gmra.mrb[120].mxu0 %v4710_v5 }
 0xbcf   :  { %6140 = vmatprep.mubr.f32.mxu0 %v4711_v62 }
 0xbd2   :  { %6141 = vmatmul.mubr.f32.gmra.mrb[122].mxu0 %v4712_v17 }
 0xbd3   :  { %6143 = vmatprep.mubr.f32.mxu0 %v4713_v46 }
 0xbd6   :  { %6144 = vmatmul.mubr.f32.gmra.mrb[124].mxu0 %v4714_v21 }
 0xbd7   :  { %6146 = vmatprep.mubr.f32.mxu0 %v4715_v57 }
 0xbda   :  { %6147 = vmatmul.mubr.f32.gmra.mrb[126].mxu0 %v4716_v37 }
 0xbdb   :  { %6149 = vmatprep.mubr.f32.mxu0 %v4717_v53 }
 0xbde   :  { %6150 = vmatmul.mubr.f32.gmra.mrb[128].mxu0 %v4718_v29 }
 0xbdf   :  { %6152 = vmatprep.mubr.f32.mxu0 %v4719_v55 }
 0xbe2   :  { %6153 = vmatmul.mubr.f32.gmra.mrb[130].mxu0 %v4720_v52 }
 0xbe3   :  { %6155 = vmatprep.mubr.f32.mxu0 %v4721_v4 }
 0xbe6   :  { %6156 = vmatmul.mubr.f32.gmra.mrb[132].mxu0 %v4722_v36 }
 0xbe7   :  { %6158 = vmatprep.mubr.f32.mxu0 %v4723_v6 }
 0xbea   :  { %6159 = vmatmul.mubr.f32.gmra.mrb[134].mxu0 %v4724_v42 }
 0xbeb   :  { %6161 = vmatprep.mubr.f32.mxu0 %v4725_v61 }
 0xbee   :  { %6162 = vmatmul.mubr.f32.gmra.mrb[136].mxu0 %v4726_v34 }
 0xbef   :  { %6164 = vmatprep.mubr.f32.mxu0 %v4727_v33 }
 0xbf2   :  { %6165 = vmatmul.mubr.f32.gmra.mrb[138].mxu0 %v4728_v43 }
 0xbf3   :  { %6167 = vmatprep.mubr.f32.mxu0 %v4729_v40 }
 0xbf6   :  { %6168 = vmatmul.mubr.f32.gmra.mrb[140].mxu0 %v4730_v44 }
 0xbf7   :  { %6170 = vmatprep.mubr.f32.mxu0 %v4731_v63 }
 0xbfa   :  { %6171 = vmatmul.mubr.f32.gmra.mrb[142].mxu0 %v4732_v2 }
 0xc91   :  { %v6127_v20 = vpop.f32.mrb[112].mxu0 }
 0xc92   :  { %v4826_v22 = vadd.f32 %v6127_v20, %v9668_v24  ;;  %v4820_v54 = vpop.f32.mrb[113].mxu0 }
 0xc93   :  { %v4821_v7 = vadd.f32 %v4820_v54, %v9668_v24 }
 0xc94   :  { %4981 = vst.msk [vmem:[%s9833_s3 + $0x8] sm:$0xff] %vm4979_vm1, %v4826_v22 }
 0xc95   :  { %4980 = vst.msk [vmem:[%s9833_s3] sm:$0xff] %vm4979_vm1, %v4821_v7  ;;  %v6130_v1 = vpop.f32.mrb[114].mxu0 }
 0xc96   :  { %v4836_v38 = vadd.f32 %v6130_v1, %v9668_v24  ;;  %v4830_v25 = vpop.f32.mrb[115].mxu0 }
 0xc97   :  { %v4831_v50 = vadd.f32 %v4830_v25, %v9668_v24 }
 0xc98   :  { %4983 = vst.msk [vmem:[%s9833_s3 + $0x18] sm:$0xff] %vm4979_vm1, %v4836_v38 }
 0xc99   :  { %4982 = vst.msk [vmem:[%s9833_s3 + $0x10] sm:$0xff] %vm4979_vm1, %v4831_v50  ;;  %v6133_v13 = vpop.f32.mrb[116].mxu0 }
 0xc9a   :  { %v4846_v10 = vadd.f32 %v6133_v13, %v9668_v24  ;;  %v4840_v8 = vpop.f32.mrb[117].mxu0 }
 0xc9b   :  { %v4841_v12 = vadd.f32 %v4840_v8, %v9668_v24 }
 0xc9c   :  { %4985 = vst.msk [vmem:[%s9833_s3 + $0x28] sm:$0xff] %vm4979_vm1, %v4846_v10 }
 0xc9d   :  { %4984 = vst.msk [vmem:[%s9833_s3 + $0x20] sm:$0xff] %vm4979_vm1, %v4841_v12  ;;  %v6136_v45 = vpop.f32.mrb[118].mxu0 }
 0xc9e   :  { %v4856_v31 = vadd.f32 %v6136_v45, %v9668_v24  ;;  %v4850_v3 = vpop.f32.mrb[119].mxu0 }
 0xc9f   :  { %v4851_v58 = vadd.f32 %v4850_v3, %v9668_v24 }
 0xca0   :  { %4987 = vst.msk [vmem:[%s9833_s3 + $0x38] sm:$0xff] %vm4979_vm1, %v4856_v31 }
 0xca1   :  { %4986 = vst.msk [vmem:[%s9833_s3 + $0x30] sm:$0xff] %vm4979_vm1, %v4851_v58  ;;  %v6139_v49 = vpop.f32.mrb[120].mxu0 }
 0xca2   :  { %v4866_v32 = vadd.f32 %v6139_v49, %v9668_v24  ;;  %v4860_v16 = vpop.f32.mrb[121].mxu0 }
 0xca3   :  { %v4861_v59 = vadd.f32 %v4860_v16, %v9668_v24 }
 0xca4   :  { %4989 = vst.msk [vmem:[%s9833_s3 + $0x48] sm:$0xff] %vm4979_vm1, %v4866_v32 }
 0xca5   :  { %4988 = vst.msk [vmem:[%s9833_s3 + $0x40] sm:$0xff] %vm4979_vm1, %v4861_v59  ;;  %v6142_v48 = vpop.f32.mrb[122].mxu0 }
 0xca6   :  { %v4876_v51 = vadd.f32 %v6142_v48, %v9668_v24  ;;  %v4870_v27 = vpop.f32.mrb[123].mxu0 }
 0xca7   :  { %v4871_v11 = vadd.f32 %v4870_v27, %v9668_v24 }
 0xca8   :  { %4991 = vst.msk [vmem:[%s9833_s3 + $0x58] sm:$0xff] %vm4979_vm1, %v4876_v51 }
 0xca9   :  { %4990 = vst.msk [vmem:[%s9833_s3 + $0x50] sm:$0xff] %vm4979_vm1, %v4871_v11  ;;  %v6145_v60 = vpop.f32.mrb[124].mxu0 }
 0xcaa   :  { %v4886_v47 = vadd.f32 %v6145_v60, %v9668_v24  ;;  %v4880_v56 = vpop.f32.mrb[125].mxu0 }
 0xcab   :  { %v4881_v23 = vadd.f32 %v4880_v56, %v9668_v24 }
 0xcac   :  { %4993 = vst.msk [vmem:[%s9833_s3 + $0x68] sm:$0xff] %vm4979_vm1, %v4886_v47 }
 0xcad   :  { %4992 = vst.msk [vmem:[%s9833_s3 + $0x60] sm:$0xff] %vm4979_vm1, %v4881_v23  ;;  %v6148_v30 = vpop.f32.mrb[126].mxu0 }
 0xcae   :  { %v4896_v5 = vadd.f32 %v6148_v30, %v9668_v24  ;;  %v4890_v62 = vpop.f32.mrb[127].mxu0 }
 0xcaf   :  { %v4891_v17 = vadd.f32 %v4890_v62, %v9668_v24 }
 0xcb0   :  { %4995 = vst.msk [vmem:[%s9833_s3 + $0x78] sm:$0xff] %vm4979_vm1, %v4896_v5 }
 0xcb1   :  { %4994 = vst.msk [vmem:[%s9833_s3 + $0x70] sm:$0xff] %vm4979_vm1, %v4891_v17  ;;  %v6151_v46 = vpop.f32.mrb[128].mxu0 }
 0xcb2   :  { %v4906_v21 = vadd.f32 %v6151_v46, %v9668_v24  ;;  %v4900_v57 = vpop.f32.mrb[129].mxu0 }
 0xcb3   :  { %v4901_v37 = vadd.f32 %v4900_v57, %v9668_v24 }
 0xcb4   :  { %4997 = vst.msk [vmem:[%s9833_s3 + $0x88] sm:$0xff] %vm4979_vm1, %v4906_v21 }
 0xcb5   :  { %4996 = vst.msk [vmem:[%s9833_s3 + $0x80] sm:$0xff] %vm4979_vm1, %v4901_v37  ;;  %v6154_v53 = vpop.f32.mrb[130].mxu0 }
 0xcb6   :  { %v4916_v29 = vadd.f32 %v6154_v53, %v9668_v24  ;;  %v4910_v55 = vpop.f32.mrb[131].mxu0 }
 0xcb7   :  { %v4911_v52 = vadd.f32 %v4910_v55, %v9668_v24 }
 0xcb8   :  { %4999 = vst.msk [vmem:[%s9833_s3 + $0x98] sm:$0xff] %vm4979_vm1, %v4916_v29 }
 0xcb9   :  { %4998 = vst.msk [vmem:[%s9833_s3 + $0x90] sm:$0xff] %vm4979_vm1, %v4911_v52  ;;  %v6157_v4 = vpop.f32.mrb[132].mxu0 }
 0xcba   :  { %v4926_v26 = vadd.f32 %v6157_v4, %v9668_v24  ;;  %v4920_v14 = vpop.f32.mrb[133].mxu0 }
 0xcbb   :  { %v4921_v35 = vadd.f32 %v4920_v14, %v9668_v24 }
 0xcbc   :  { %5001 = vst.msk [vmem:[%s9833_s3 + $0xa8] sm:$0xff] %vm4979_vm1, %v4926_v26 }
 0xcbd   :  { %5000 = vst.msk [vmem:[%s9833_s3 + $0xa0] sm:$0xff] %vm4979_vm1, %v4921_v35  ;;  %v6160_v9 = vpop.f32.mrb[134].mxu0 }
 0xcbe   :  { %v4936_v0 = vadd.f32 %v6160_v9, %v9668_v24  ;;  %v4930_v41 = vpop.f32.mrb[135].mxu0 }
 0xcbf   :  { %v4931_v18 = vadd.f32 %v4930_v41, %v9668_v24 }
 0xcc0   :  { %5003 = vst.msk [vmem:[%s9833_s3 + $0xb8] sm:$0xff] %vm4979_vm1, %v4936_v0 }
 0xcc1   :  { %5002 = vst.msk [vmem:[%s9833_s3 + $0xb0] sm:$0xff] %vm4979_vm1, %v4931_v18  ;;  %v6163_v36 = vpop.f32.mrb[136].mxu0 }
 0xcc2   :  { %v4946_v6 = vadd.f32 %v6163_v36, %v9668_v24  ;;  %v4940_v42 = vpop.f32.mrb[137].mxu0 }
 0xcc3   :  { %v4941_v39 = vadd.f32 %v4940_v42, %v9668_v24 }
 0xcc4   :  { %5005 = vst.msk [vmem:[%s9833_s3 + $0xc8] sm:$0xff] %vm4979_vm1, %v4946_v6 }
 0xcc5   :  { %5004 = vst.msk [vmem:[%s9833_s3 + $0xc0] sm:$0xff] %vm4979_vm1, %v4941_v39  ;;  %v6166_v61 = vpop.f32.mrb[138].mxu0 }
 0xcc6   :  { %v4956_v34 = vadd.f32 %v6166_v61, %v9668_v24  ;;  %v4950_v33 = vpop.f32.mrb[139].mxu0 }
 0xcc7   :  { %v4951_v43 = vadd.f32 %v4950_v33, %v9668_v24 }
 0xcc8   :  { %5007 = vst.msk [vmem:[%s9833_s3 + $0xd8] sm:$0xff] %vm4979_vm1, %v4956_v34 }
 0xcc9   :  { %5006 = vst.msk [vmem:[%s9833_s3 + $0xd0] sm:$0xff] %vm4979_vm1, %v4951_v43  ;;  %v6169_v40 = vpop.f32.mrb[140].mxu0 }
 0xcca   :  { %v4966_v19 = vadd.f32 %v6169_v40, %v9668_v24  ;;  %v4960_v28 = vpop.f32.mrb[141].mxu0 }
 0xccb   :  { %v4961_v15 = vadd.f32 %v4960_v28, %v9668_v24 }
 0xccc   :  { %5009 = vst.msk [vmem:[%s9833_s3 + $0xe8] sm:$0xff] %vm4979_vm1, %v4966_v19 }
 0xccd   :  { %5008 = vst.msk [vmem:[%s9833_s3 + $0xe0] sm:$0xff] %vm4979_vm1, %v4961_v15  ;;  %v6172_v44 = vpop.f32.mrb[142].mxu0 }
 0xcce   :  { %v4976_v63 = vadd.f32 %v6172_v44, %v9668_v24  ;;  %v4970_v2 = vpop.f32.mrb[143].mxu0 }
 0xccf   :  { %v4971_v20 = vadd.f32 %v4970_v2, %v9668_v24 }
 0xcd0   :  { %5011 = vst.msk [vmem:[%s9833_s3 + $0xf8] sm:$0xff] %vm4979_vm1, %v4976_v63 }
 0xcd1   :  { %5010 = vst.msk [vmem:[%s9833_s3 + $0xf0] sm:$0xff] %vm4979_vm1, %v4971_v20 }
 0xcd2   :  { %5020 = vsyncpa [#allocation3], 1 }

</bundles_post_ra>
